<compile_context>
chip_gen: v6e
topology: v6e:2x2x1
jax: 0.10.0
libtpu: 0.0.40
codegen_flags: <defaults>
</compile_context>

<pallas_src>
import functools

import jax
import jax.numpy as jnp
from jax.experimental import pallas as pl
from jax.experimental.pallas import tpu as pltpu

# ---------------- model configuration (HPNCritic spec) ----------------
BS = 8                     # critic batch
SELF_DIM = 7
ALLY_DIM = 5
ADV_DIM = 6
ACT = 5                    # action_shape[0]
NUM_ALLY = 2               # max_num_RUAVs - 1
NUM_ADV = 3                # max_num_BUAVs
N_AGENTS = NUM_ALLY + 1    # action list length

HYP = 128                  # hyper_dim
HID = 256                  # hidden_dim
HEAD = 4

SELF_IN = SELF_DIM + ACT               # 12
ALLY_IN = ALLY_DIM + ACT               # 10
ADV_IN = ADV_DIM                       # 6
ALLY_BLK = ALLY_IN + 1                 # 11 (feature blocks + hyper-bias block)
ADV_BLK = ADV_IN + 1                   # 7
ALLY_W = ALLY_BLK * HID                # 2816  (head-folded width)
ADV_W = ADV_BLK * HID                  # 1792
W2_COLS = ALLY_W + ADV_W               # 4608

ALLY_ROWS = NUM_ALLY * BS              # 16  (entity-major rows)
ADV_ROWS = NUM_ADV * BS                # 24
HYP_ROWS = ALLY_ROWS + ADV_ROWS        # 40
X_ROWS = BS + HYP_ROWS                 # 48

# stacked-input X column layout (block-diagonal against the first-layer slab)
C_SELF1 = SELF_IN                      # 12  (self bias indicator)
C_ALLY = 13                            # 13..22 ally feats
C_ALLY1 = C_ALLY + ALLY_IN             # 23  (ally bias indicator)
C_ADV = 24                             # 24..29 adv feats
C_ADV1 = C_ADV + ADV_IN                # 30  (adv bias indicator)
XCOLS = 32

COMB_COLS = 128                        # compact comb slab lane width
W2B_ROWS = 24                          # 11 ally + 7 adv folded-bias blocks (padded)
WOUT_ROWS = HID + 8                    # wfc1 rows + aligned aux block (bfc1|wfc2|bfc2)
QPAD = 128                             # lane-dense Q output width

STATE_DIM = SELF_DIM + NUM_ALLY * ALLY_DIM + NUM_ADV * ADV_DIM + NUM_ALLY + NUM_ADV  # 40


# ---------------------------- Pallas kernel ----------------------------
def hpn_critic_kernel(x_ref, comb_ref, wg_ref, w2b_ref, w2_hbm, wo_hbm, q_ref,
                      w2_ref, wo_ref, sem):
    f32 = jnp.float32
    bf16 = jnp.bfloat16

    # Kick off the two big weight DMAs; the first-layer matmul runs under them.
    w2_cp = pltpu.make_async_copy(w2_hbm, w2_ref, sem.at[0])
    wo_cp = pltpu.make_async_copy(wo_hbm, wo_ref, sem.at[1])
    w2_cp.start()
    wo_cp.start()

    # fused first layer: self_fc | hyper_ally[0] | hyper_adv[0] (+biases via
    # indicator columns) as ONE block-diagonal MXU matmul.
    h_all = jnp.dot(x_ref[...], wg_ref[...], preferred_element_type=f32)     # (48, 384)
    self_out = h_all[0:BS, 0:HID]                                            # (8, 256)
    hz = h_all[BS:X_ROWS, HID:HID + HYP]                                     # (40, 128)
    h = jnp.where(hz > 0, hz, 0.01 * hz)                                     # LeakyReLU (f32 VPU)
    h16 = h.astype(bf16)                                                     # MXU operand only
    h_a = h16[0:ALLY_ROWS]                                                   # (16, 128)
    h_d = h16[ALLY_ROWS:HYP_ROWS]                                            # (24, 128)

    comb_a = comb_ref[0:ALLY_ROWS, :]                                        # (16, 128) f32
    comb_d = comb_ref[ALLY_ROWS:HYP_ROWS, :]                                 # (24, 128) f32

    w2_cp.wait()   # hyper second-layer weights resident from here on

    def block(h_rows, comb_rows, wcol0, brow0, d):
        # One 256-wide block: dot -> +bias (f32 table) -> *comb (lane bcast).
        # Kept per-block so only a few vregs stay live; the VPU/XLU work hides
        # under the vmatmul stream.
        c0 = wcol0 + d * HID
        o = jnp.dot(h_rows, w2_ref[:, c0:c0 + HID], preferred_element_type=f32)
        o = o + w2b_ref[brow0 + d:brow0 + d + 1, :]
        return o * comb_rows[:, d:d + 1]

    # ---- ally branch (merger softmax + head reduction folded offline into the
    #      w2 slab; ally death mask folded into comb). Two interleaved accs.
    acc_a = [block(h_a, comb_a, 0, 0, 0), block(h_a, comb_a, 0, 0, 1)]
    for d in range(2, ALLY_BLK):
        acc_a[d & 1] = acc_a[d & 1] + block(h_a, comb_a, 0, 0, d)
    sum_a = acc_a[0] + acc_a[1]                                              # (16, 256)
    ally_red = sum_a[0:BS] + sum_a[BS:ALLY_ROWS]                             # entity sum -> (8,256)

    # ---- adversary branch (no death mask, matching the original module) ----
    acc_d = [block(h_d, comb_d, ALLY_W, ALLY_BLK, 0),
             block(h_d, comb_d, ALLY_W, ALLY_BLK, 1)]
    for d in range(2, ADV_BLK):
        acc_d[d & 1] = acc_d[d & 1] + block(h_d, comb_d, ALLY_W, ALLY_BLK, d)
    sum_d = acc_d[0] + acc_d[1]                                              # (24, 256)
    adv_red = (sum_d[0:BS] + sum_d[BS:2 * BS]) + sum_d[2 * BS:ADV_ROWS]

    # ---- merge + output MLP ----
    out = jnp.maximum(self_out + ally_red + adv_red, 0.0)                    # (8, 256)

    wo_cp.wait()   # small output-MLP DMA, fully hidden under the hyper loops
    w_fc1 = wo_ref[0:HID, :]
    aux = wo_ref[HID:HID + 8, :]     # row 0 = bfc1, row 1 = wfc2ᵀ, row 2 = bfc2 (replicated)
    x1 = jnp.maximum(jnp.dot(out, w_fc1, preferred_element_type=f32) + aux[0:1, :], 0.0)
    # fc2 (256 -> 1) as VPU multiply + XLU lane reduction: no 127-lane zero pad DMA
    qcol = jnp.sum(x1 * aux[1:2, :], axis=-1, keepdims=True)                 # (8, 1)
    q_ref[...] = qcol + aux[2:3, 0:QPAD]                                     # lane-dense (8, 128)


# ------------------------------ parameter packing ------------------------------
def init_raw_params(key):
    """Raw params, stored as (in, out) matrices and (1, out) biases."""
    def linear(key, fi, fo):
        k1, k2 = jax.random.split(key)
        bound = 1.0 / (fi ** 0.5)
        w = jax.random.uniform(k1, (fi, fo), jnp.float32, -bound, bound)
        b = jax.random.uniform(k2, (1, fo), jnp.float32, -bound, bound)
        return w, b

    ks = jax.random.split(key, 8)
    wself, bself = linear(ks[0], SELF_IN, HID)
    w1a, b1a = linear(ks[1], ALLY_IN, HYP)
    w2a, b2a = linear(ks[2], HYP, ALLY_BLK * HEAD * HID)
    w1d, b1d = linear(ks[3], ADV_IN, HYP)
    w2d, b2d = linear(ks[4], HYP, ADV_BLK * HEAD * HID)
    wfc1, bfc1 = linear(ks[5], HID, HID)
    wfc2, bfc2 = linear(ks[6], HID, 1)
    # Spec initializes the merger weight to fill(1.0); perturb slightly so the
    # softmax-fold path is actually exercised by the numerical check.
    merger_w = 1.0 + 0.1 * jax.random.normal(ks[7], (HEAD, HID), jnp.float32)
    return dict(wself=wself, bself=bself, w1a=w1a, b1a=b1a, w2a=w2a, b2a=b2a,
                w1d=w1d, b1d=b1d, w2d=w2d, b2d=b2d,
                wfc1=wfc1, bfc1=bfc1, wfc2=wfc2, bfc2=bfc2, merger_w=merger_w)


def pack_params(raw):
    """Fold merger softmax + head reduction into W2/b2 and pack the slabs (done once)."""
    f32 = jnp.float32
    sm = jax.nn.softmax(raw["merger_w"], axis=0)                 # (HEAD, HID)

    def fold(w2, b2, nblk):
        w2f = jnp.einsum("knhj,hj->knj",
                         w2.reshape(HYP, nblk, HEAD, HID), sm).reshape(HYP, nblk * HID)
        b2f = jnp.einsum("nhj,hj->nj", b2.reshape(nblk, HEAD, HID), sm)      # (nblk, HID)
        return w2f, b2f

    w2a_f, b2a_f = fold(raw["w2a"], raw["b2a"], ALLY_BLK)        # (128, 2816), (11, 256)
    w2d_f, b2d_f = fold(raw["w2d"], raw["b2d"], ADV_BLK)         # (128, 1792), (7, 256)

    # slab 2: hyper second-layer weights, bf16 (dominant DMA, halved)
    w2slab = jnp.concatenate([w2a_f, w2d_f], axis=1).astype(jnp.bfloat16)    # (128, 4608)

    # small f32 folded-bias table: rows 0..10 ally blocks, 11..17 adv blocks
    w2bias = jnp.zeros((W2B_ROWS, HID), f32)
    w2bias = w2bias.at[0:ALLY_BLK].set(b2a_f)
    w2bias = w2bias.at[ALLY_BLK:ALLY_BLK + ADV_BLK].set(b2d_f)

    # slab 1: block-diagonal first layer (self_fc | hyper first layers), biases via 1-columns
    wgrand = jnp.zeros((XCOLS, HID + HYP), f32)
    wgrand = wgrand.at[0:SELF_IN, :HID].set(raw["wself"])
    wgrand = wgrand.at[C_SELF1, :HID].set(raw["bself"][0])
    wgrand = wgrand.at[C_ALLY:C_ALLY + ALLY_IN, HID:].set(raw["w1a"])
    wgrand = wgrand.at[C_ALLY1, HID:].set(raw["b1a"][0])
    wgrand = wgrand.at[C_ADV:C_ADV + ADV_IN, HID:].set(raw["w1d"])
    wgrand = wgrand.at[C_ADV1, HID:].set(raw["b1d"][0])

    # slab 3: output MLP, fc2 stored as a 256-wide row (no 127-lane zero pad)
    wout = jnp.zeros((WOUT_ROWS, HID), f32)
    wout = wout.at[:HID, :].set(raw["wfc1"])
    wout = wout.at[HID].set(raw["bfc1"][0])
    wout = wout.at[HID + 1].set(raw["wfc2"][:, 0])
    wout = wout.at[HID + 2].set(jnp.full((HID,), raw["bfc2"][0, 0], f32))
    return wgrand, w2bias, w2slab, wout


# ------------------------------ input packing ------------------------------
def build_inputs(state, action, agent_id):
    """Mirror of HPNCritic._build_input, packed into two small lane-dense slabs."""
    f32 = jnp.float32
    self_raw = state[:, :SELF_DIM]
    off = SELF_DIM
    ally_raw = state[:, off:off + NUM_ALLY * ALLY_DIM].reshape(BS, NUM_ALLY, ALLY_DIM)
    off += NUM_ALLY * ALLY_DIM
    adv_raw = state[:, off:off + NUM_ADV * ADV_DIM].reshape(BS, NUM_ADV, ADV_DIM)
    off += NUM_ADV * ADV_DIM
    ally_mask = state[:, off:off + NUM_ALLY]
    # adv mask exists in the state but the original module never applies it.

    self_feats = jnp.concatenate([self_raw, action[:, agent_id]], axis=-1)    # (BS, 12)
    other_idx = jnp.array([i for i in range(N_AGENTS) if i != agent_id])
    ally_feats = jnp.concatenate([ally_raw, action[:, other_idx]], axis=-1)   # (BS, 2, 10)
    keep = (ally_mask >= 0.5).astype(f32)                                     # (BS, 2)

    # entity-major flattening: row = e*BS + b
    ally_em = jnp.transpose(ally_feats, (1, 0, 2)).reshape(ALLY_ROWS, ALLY_IN)
    keep_em = jnp.transpose(keep, (1, 0)).reshape(ALLY_ROWS, 1)
    adv_em = jnp.transpose(adv_raw, (1, 0, 2)).reshape(ADV_ROWS, ADV_IN)

    # stacked input X (self rows | ally rows | adv rows), bias indicator columns
    x = jnp.zeros((X_ROWS, XCOLS), f32)
    x = x.at[0:BS, 0:SELF_IN].set(self_feats)
    x = x.at[0:BS, C_SELF1].set(1.0)
    x = x.at[BS:BS + ALLY_ROWS, C_ALLY:C_ALLY + ALLY_IN].set(ally_em)
    x = x.at[BS:BS + ALLY_ROWS, C_ALLY1].set(1.0)
    x = x.at[BS + ALLY_ROWS:X_ROWS, C_ADV:C_ADV + ADV_IN].set(adv_em)
    x = x.at[BS + ALLY_ROWS:X_ROWS, C_ADV1].set(1.0)

    # COMPACT combination slab (ally death mask folded in): ally rows use
    # columns 0..10 = [feats*keep, keep], adv rows use columns 0..6 = [feats, 1].
    # The 256-wide block broadcast happens inside the kernel (idle XLU).
    comb = jnp.zeros((HYP_ROWS, COMB_COLS), f32)
    comb = comb.at[0:ALLY_ROWS, 0:ALLY_IN].set(ally_em * keep_em)
    comb = comb.at[0:ALLY_ROWS, ALLY_IN].set(keep_em[:, 0])
    comb = comb.at[ALLY_ROWS:HYP_ROWS, 0:ADV_IN].set(adv_em)
    comb = comb.at[ALLY_ROWS:HYP_ROWS, ADV_IN].set(1.0)
    return x, comb


# ------------------------------ forward wrapper ------------------------------
@functools.partial(jax.jit, static_argnums=(3,))
def hpn_critic_forward(state, action, packed, agent_id):
    x, comb = build_inputs(state, action, agent_id)
    wgrand, w2bias, w2slab, wout = packed
    vmem = pl.BlockSpec(memory_space=pltpu.MemorySpace.VMEM)
    hbm = pl.BlockSpec(memory_space=pl.ANY)
    q_pad = pl.pallas_call(
        hpn_critic_kernel,
        out_shape=jax.ShapeDtypeStruct((BS, QPAD), jnp.float32),
        in_specs=[vmem, vmem, vmem, vmem, hbm, hbm],
        out_specs=vmem,
        scratch_shapes=[
            pltpu.VMEM((HYP, W2_COLS), jnp.bfloat16),   # w2 slab landing buffer
            pltpu.VMEM((WOUT_ROWS, HID), jnp.float32),  # output-MLP slab landing buffer
            pltpu.SemaphoreType.DMA((2,)),
        ],
    )(x, comb, wgrand, w2bias, w2slab, wout)
    return q_pad[:, :1]


# ----------------------- pure-JAX reference (PyTorch semantics) -----------------------
def reference_forward(state, action, agent_id, raw):
    f32 = jnp.float32
    self_raw = state[:, :SELF_DIM]
    off = SELF_DIM
    ally_raw = state[:, off:off + NUM_ALLY * ALLY_DIM].reshape(BS, NUM_ALLY, ALLY_DIM)
    off += NUM_ALLY * ALLY_DIM
    adv_raw = state[:, off:off + NUM_ADV * ADV_DIM].reshape(BS, NUM_ADV, ADV_DIM)
    off += NUM_ADV * ADV_DIM
    ally_mask = state[:, off:off + NUM_ALLY]

    self_feats = jnp.concatenate([self_raw, action[:, agent_id]], axis=-1)
    other_idx = jnp.array([i for i in range(N_AGENTS) if i != agent_id])
    ally_feats = jnp.concatenate([ally_raw, action[:, other_idx]], axis=-1)   # (BS, 2, 10)
    adv_feats = adv_raw                                                       # (BS, 3, 6)
    keep = (ally_mask >= 0.5).astype(f32)[..., None, None]                    # (BS, 2, 1, 1)

    def leaky(v):
        return jnp.where(v > 0, v, 0.01 * v)

    def branch(feats, w1, b1, w2, b2, ent_in, num_ent, mask=None):
        hk = HEAD * HID
        hh = leaky(feats @ w1 + b1)
        ho = hh @ w2 + b2
        w = ho[..., :ent_in * hk].reshape(BS * num_ent, ent_in, hk)
        bb = ho[..., ent_in * hk:].reshape(BS * num_ent, 1, hk)
        ff = feats.reshape(BS * num_ent, 1, ent_in)
        o = (jnp.matmul(ff, w) + bb).reshape(BS, num_ent, HEAD, HID)
        if mask is not None:
            o = o * mask                      # masked_fill(ally_mask < 0.5, 0)
        return o.sum(axis=1)                  # (BS, HEAD, HID)

    self_out = self_feats @ raw["wself"] + raw["bself"]
    tmp = (branch(ally_feats, raw["w1a"], raw["b1a"], raw["w2a"], raw["b2a"],
                  ALLY_IN, NUM_ALLY, keep)
           + branch(adv_feats, raw["w1d"], raw["b1d"], raw["w2d"], raw["b2d"],
                    ADV_IN, NUM_ADV))        # adv: no mask, matching the original module
    sm = jax.nn.softmax(raw["merger_w"], axis=0)
    merged = jnp.sum(sm[None] * tmp, axis=1)
    out = jax.nn.relu(self_out + merged)
    x = jax.nn.relu(out @ raw["wfc1"] + raw["bfc1"])
    return x @ raw["wfc2"] + raw["bfc2"]


if __name__ == "__main__":
    key = jax.random.PRNGKey(0)
    k_feat, k_mask, k_act, k_par = jax.random.split(key, 4)
    feat_part = jax.random.normal(
        k_feat, (BS, SELF_DIM + NUM_ALLY * ALLY_DIM + NUM_ADV * ADV_DIM), jnp.float32)
    mask_part = jax.random.uniform(k_mask, (BS, NUM_ALLY + NUM_ADV), jnp.float32)
    state = jnp.concatenate([feat_part, mask_part], axis=-1)          # (8, 40)
    action = jax.random.normal(k_act, (BS, N_AGENTS, ACT), jnp.float32)
    agent_id = 0

    raw = init_raw_params(k_par)
    packed = pack_params(raw)                                         # one-time offline packing

    q = hpn_critic_forward(state, action, packed, agent_id)
    jax.block_until_ready(q)

    q_ref = reference_forward(state, action, agent_id, raw)
    assert q.shape == (BS, 1)
    # Tolerance loosened vs. the pure-f32 version: the hyper second-layer slab
    # (and the h operand of its matmuls) is bf16; everything else stays f32.
    assert jnp.allclose(q, q_ref, atol=3e-2, rtol=3e-2), float(jnp.max(jnp.abs(q - q_ref)))
    print("KERNEL_OK")
</pallas_src>

<mosaic_0001>
module attributes {stable_mosaic.version = 11 : i64} {
  func.func @hpn_critic_kernel(%arg0: memref<48x32xf32, #tpu.memory_space<vmem>>, %arg1: memref<40x128xf32, #tpu.memory_space<vmem>>, %arg2: memref<32x384xf32, #tpu.memory_space<vmem>>, %arg3: memref<24x256xf32, #tpu.memory_space<vmem>>, %arg4: memref<128x4608xbf16, #tpu.memory_space<any>>, %arg5: memref<264x256xf32, #tpu.memory_space<any>>, %arg6: memref<8x128xf32, #tpu.memory_space<vmem>>, %arg7: memref<128x4608xbf16, #tpu.memory_space<vmem>>, %arg8: memref<264x256xf32, #tpu.memory_space<vmem>>, %arg9: memref<2x!tpu.dma_semaphore, #tpu.memory_space<semaphore_mem>>) attributes {dimension_semantics = [], scalar_prefetch = 0 : i64, scratch_operands = 3 : i64, tpu.core_type = #tpu.core_type<tc>} {
    %c0_i32 = arith.constant 0 : i32
    %0 = tpu.memref_slice %arg9[%c0_i32] : memref<2x!tpu.dma_semaphore, #tpu.memory_space<semaphore_mem>> -> memref<1x!tpu.dma_semaphore, #tpu.memory_space<semaphore_mem>>
    %1 = tpu.memref_squeeze %0 : memref<1x!tpu.dma_semaphore, #tpu.memory_space<semaphore_mem>> -> memref<!tpu.dma_semaphore, #tpu.memory_space<semaphore_mem>>
    tpu.enqueue_dma source(%arg4 : memref<128x4608xbf16, #tpu.memory_space<any>>) target(%arg7 : memref<128x4608xbf16, #tpu.memory_space<vmem>>) target_semaphore(%1 : memref<!tpu.dma_semaphore, #tpu.memory_space<semaphore_mem>>)
    %c1_i32 = arith.constant 1 : i32
    %2 = tpu.memref_slice %arg9[%c1_i32] : memref<2x!tpu.dma_semaphore, #tpu.memory_space<semaphore_mem>> -> memref<1x!tpu.dma_semaphore, #tpu.memory_space<semaphore_mem>>
    %3 = tpu.memref_squeeze %2 : memref<1x!tpu.dma_semaphore, #tpu.memory_space<semaphore_mem>> -> memref<!tpu.dma_semaphore, #tpu.memory_space<semaphore_mem>>
    tpu.enqueue_dma source(%arg5 : memref<264x256xf32, #tpu.memory_space<any>>) target(%arg8 : memref<264x256xf32, #tpu.memory_space<vmem>>) target_semaphore(%3 : memref<!tpu.dma_semaphore, #tpu.memory_space<semaphore_mem>>)
    %c0 = arith.constant 0 : index
    %c0_0 = arith.constant 0 : index
    %4 = vector.load %arg0[%c0, %c0_0] : memref<48x32xf32, #tpu.memory_space<vmem>>, vector<48x32xf32>
    %c0_1 = arith.constant 0 : index
    %c0_2 = arith.constant 0 : index
    %5 = vector.load %arg2[%c0_1, %c0_2] : memref<32x384xf32, #tpu.memory_space<vmem>>, vector<32x384xf32>
    %cst = arith.constant dense<0.000000e+00> : vector<48x384xf32>
    %6 = tpu.matmul %4, %5, %cst {dimension_numbers = #tpu.dot_dimension_numbers<[1], [0], [0], [1], [0, 0, 1, 1], [], []>} : vector<48x32xf32>, vector<32x384xf32>, vector<48x384xf32> -> vector<48x384xf32>
    %7 = vector.extract_strided_slice %6 {offsets = [0, 0], sizes = [8, 256], strides = [1, 1]} : vector<48x384xf32> to vector<8x256xf32>
    %8 = vector.extract_strided_slice %6 {offsets = [8, 256], sizes = [40, 128], strides = [1, 1]} : vector<48x384xf32> to vector<40x128xf32>
    %cst_3 = arith.constant 0.000000e+00 : f32
    %9 = vector.broadcast %cst_3 : f32 to vector<40x128xf32>
    %10 = arith.cmpf ogt, %8, %9 : vector<40x128xf32>
    %cst_4 = arith.constant 0.00999999977 : f32
    %11 = vector.broadcast %cst_4 : f32 to vector<40x128xf32>
    %12 = arith.mulf %11, %8 : vector<40x128xf32>
    %13 = arith.select %10, %8, %12 : vector<40x128xi1>, vector<40x128xf32>
    %14 = arith.truncf %13 : vector<40x128xf32> to vector<40x128xbf16>
    %15 = vector.extract_strided_slice %14 {offsets = [0, 0], sizes = [16, 128], strides = [1, 1]} : vector<40x128xbf16> to vector<16x128xbf16>
    %16 = vector.extract_strided_slice %14 {offsets = [16, 0], sizes = [24, 128], strides = [1, 1]} : vector<40x128xbf16> to vector<24x128xbf16>
    %c0_5 = arith.constant 0 : index
    %c0_6 = arith.constant 0 : index
    %17 = vector.load %arg1[%c0_5, %c0_6] : memref<40x128xf32, #tpu.memory_space<vmem>>, vector<16x128xf32>
    %c16 = arith.constant 16 : index
    %c0_7 = arith.constant 0 : index
    %18 = vector.load %arg1[%c16, %c0_7] : memref<40x128xf32, #tpu.memory_space<vmem>>, vector<24x128xf32>
    %c0_i32_8 = arith.constant 0 : i32
    %19 = tpu.memref_slice %arg9[%c0_i32_8] : memref<2x!tpu.dma_semaphore, #tpu.memory_space<semaphore_mem>> -> memref<1x!tpu.dma_semaphore, #tpu.memory_space<semaphore_mem>>
    %20 = tpu.memref_squeeze %19 : memref<1x!tpu.dma_semaphore, #tpu.memory_space<semaphore_mem>> -> memref<!tpu.dma_semaphore, #tpu.memory_space<semaphore_mem>>
    tpu.wait_dma2 semaphore(%20 : memref<!tpu.dma_semaphore, #tpu.memory_space<semaphore_mem>>) src(%arg4 : memref<128x4608xbf16, #tpu.memory_space<any>>) dst(%arg7 : memref<128x4608xbf16, #tpu.memory_space<vmem>>)
    %c0_9 = arith.constant 0 : index
    %c0_10 = arith.constant 0 : index
    %21 = vector.load %arg7[%c0_9, %c0_10] : memref<128x4608xbf16, #tpu.memory_space<vmem>>, vector<128x256xbf16>
    %cst_11 = arith.constant dense<0.000000e+00> : vector<16x256xf32>
    %22 = tpu.matmul %15, %21, %cst_11 {dimension_numbers = #tpu.dot_dimension_numbers<[1], [0], [0], [1], [0, 0, 1, 1], [], []>} : vector<16x128xbf16>, vector<128x256xbf16>, vector<16x256xf32> -> vector<16x256xf32>
    %c0_12 = arith.constant 0 : index
    %c0_13 = arith.constant 0 : index
    %23 = vector.load %arg3[%c0_12, %c0_13] : memref<24x256xf32, #tpu.memory_space<vmem>>, vector<1x256xf32>
    %24 = vector.broadcast %23 : vector<1x256xf32> to vector<16x256xf32>
    %25 = arith.addf %22, %24 : vector<16x256xf32>
    %26 = vector.extract_strided_slice %17 {offsets = [0, 0], sizes = [16, 1], strides = [1, 1]} : vector<16x128xf32> to vector<16x1xf32>
    %27 = vector.broadcast %26 : vector<16x1xf32> to vector<16x256xf32>
    %28 = arith.mulf %25, %27 : vector<16x256xf32>
    %c0_14 = arith.constant 0 : index
    %c256 = arith.constant 256 : index
    %29 = vector.load %arg7[%c0_14, %c256] : memref<128x4608xbf16, #tpu.memory_space<vmem>>, vector<128x256xbf16>
    %cst_15 = arith.constant dense<0.000000e+00> : vector<16x256xf32>
    %30 = tpu.matmul %15, %29, %cst_15 {dimension_numbers = #tpu.dot_dimension_numbers<[1], [0], [0], [1], [0, 0, 1, 1], [], []>} : vector<16x128xbf16>, vector<128x256xbf16>, vector<16x256xf32> -> vector<16x256xf32>
    %c1 = arith.constant 1 : index
    %c0_16 = arith.constant 0 : index
    %31 = vector.load %arg3[%c1, %c0_16] : memref<24x256xf32, #tpu.memory_space<vmem>>, vector<1x256xf32>
    %32 = vector.broadcast %31 : vector<1x256xf32> to vector<16x256xf32>
    %33 = arith.addf %30, %32 : vector<16x256xf32>
    %34 = vector.extract_strided_slice %17 {offsets = [0, 1], sizes = [16, 1], strides = [1, 1]} : vector<16x128xf32> to vector<16x1xf32>
    %35 = vector.broadcast %34 : vector<16x1xf32> to vector<16x256xf32>
    %36 = arith.mulf %33, %35 : vector<16x256xf32>
    %c0_17 = arith.constant 0 : index
    %c512 = arith.constant 512 : index
    %37 = vector.load %arg7[%c0_17, %c512] : memref<128x4608xbf16, #tpu.memory_space<vmem>>, vector<128x256xbf16>
    %cst_18 = arith.constant dense<0.000000e+00> : vector<16x256xf32>
    %38 = tpu.matmul %15, %37, %cst_18 {dimension_numbers = #tpu.dot_dimension_numbers<[1], [0], [0], [1], [0, 0, 1, 1], [], []>} : vector<16x128xbf16>, vector<128x256xbf16>, vector<16x256xf32> -> vector<16x256xf32>
    %c2 = arith.constant 2 : index
    %c0_19 = arith.constant 0 : index
    %39 = vector.load %arg3[%c2, %c0_19] : memref<24x256xf32, #tpu.memory_space<vmem>>, vector<1x256xf32>
    %40 = vector.broadcast %39 : vector<1x256xf32> to vector<16x256xf32>
    %41 = arith.addf %38, %40 : vector<16x256xf32>
    %42 = vector.extract_strided_slice %17 {offsets = [0, 2], sizes = [16, 1], strides = [1, 1]} : vector<16x128xf32> to vector<16x1xf32>
    %43 = vector.broadcast %42 : vector<16x1xf32> to vector<16x256xf32>
    %44 = arith.mulf %41, %43 : vector<16x256xf32>
    %45 = arith.addf %28, %44 : vector<16x256xf32>
    %c0_20 = arith.constant 0 : index
    %c768 = arith.constant 768 : index
    %46 = vector.load %arg7[%c0_20, %c768] : memref<128x4608xbf16, #tpu.memory_space<vmem>>, vector<128x256xbf16>
    %cst_21 = arith.constant dense<0.000000e+00> : vector<16x256xf32>
    %47 = tpu.matmul %15, %46, %cst_21 {dimension_numbers = #tpu.dot_dimension_numbers<[1], [0], [0], [1], [0, 0, 1, 1], [], []>} : vector<16x128xbf16>, vector<128x256xbf16>, vector<16x256xf32> -> vector<16x256xf32>
    %c3 = arith.constant 3 : index
    %c0_22 = arith.constant 0 : index
    %48 = vector.load %arg3[%c3, %c0_22] : memref<24x256xf32, #tpu.memory_space<vmem>>, vector<1x256xf32>
    %49 = vector.broadcast %48 : vector<1x256xf32> to vector<16x256xf32>
    %50 = arith.addf %47, %49 : vector<16x256xf32>
    %51 = vector.extract_strided_slice %17 {offsets = [0, 3], sizes = [16, 1], strides = [1, 1]} : vector<16x128xf32> to vector<16x1xf32>
    %52 = vector.broadcast %51 : vector<16x1xf32> to vector<16x256xf32>
    %53 = arith.mulf %50, %52 : vector<16x256xf32>
    %54 = arith.addf %36, %53 : vector<16x256xf32>
    %c0_23 = arith.constant 0 : index
    %c1024 = arith.constant 1024 : index
    %55 = vector.load %arg7[%c0_23, %c1024] : memref<128x4608xbf16, #tpu.memory_space<vmem>>, vector<128x256xbf16>
    %cst_24 = arith.constant dense<0.000000e+00> : vector<16x256xf32>
    %56 = tpu.matmul %15, %55, %cst_24 {dimension_numbers = #tpu.dot_dimension_numbers<[1], [0], [0], [1], [0, 0, 1, 1], [], []>} : vector<16x128xbf16>, vector<128x256xbf16>, vector<16x256xf32> -> vector<16x256xf32>
    %c4 = arith.constant 4 : index
    %c0_25 = arith.constant 0 : index
    %57 = vector.load %arg3[%c4, %c0_25] : memref<24x256xf32, #tpu.memory_space<vmem>>, vector<1x256xf32>
    %58 = vector.broadcast %57 : vector<1x256xf32> to vector<16x256xf32>
    %59 = arith.addf %56, %58 : vector<16x256xf32>
    %60 = vector.extract_strided_slice %17 {offsets = [0, 4], sizes = [16, 1], strides = [1, 1]} : vector<16x128xf32> to vector<16x1xf32>
    %61 = vector.broadcast %60 : vector<16x1xf32> to vector<16x256xf32>
    %62 = arith.mulf %59, %61 : vector<16x256xf32>
    %63 = arith.addf %45, %62 : vector<16x256xf32>
    %c0_26 = arith.constant 0 : index
    %c1280 = arith.constant 1280 : index
    %64 = vector.load %arg7[%c0_26, %c1280] : memref<128x4608xbf16, #tpu.memory_space<vmem>>, vector<128x256xbf16>
    %cst_27 = arith.constant dense<0.000000e+00> : vector<16x256xf32>
    %65 = tpu.matmul %15, %64, %cst_27 {dimension_numbers = #tpu.dot_dimension_numbers<[1], [0], [0], [1], [0, 0, 1, 1], [], []>} : vector<16x128xbf16>, vector<128x256xbf16>, vector<16x256xf32> -> vector<16x256xf32>
    %c5 = arith.constant 5 : index
    %c0_28 = arith.constant 0 : index
    %66 = vector.load %arg3[%c5, %c0_28] : memref<24x256xf32, #tpu.memory_space<vmem>>, vector<1x256xf32>
    %67 = vector.broadcast %66 : vector<1x256xf32> to vector<16x256xf32>
    %68 = arith.addf %65, %67 : vector<16x256xf32>
    %69 = vector.extract_strided_slice %17 {offsets = [0, 5], sizes = [16, 1], strides = [1, 1]} : vector<16x128xf32> to vector<16x1xf32>
    %70 = vector.broadcast %69 : vector<16x1xf32> to vector<16x256xf32>
    %71 = arith.mulf %68, %70 : vector<16x256xf32>
    %72 = arith.addf %54, %71 : vector<16x256xf32>
    %c0_29 = arith.constant 0 : index
    %c1536 = arith.constant 1536 : index
    %73 = vector.load %arg7[%c0_29, %c1536] : memref<128x4608xbf16, #tpu.memory_space<vmem>>, vector<128x256xbf16>
    %cst_30 = arith.constant dense<0.000000e+00> : vector<16x256xf32>
    %74 = tpu.matmul %15, %73, %cst_30 {dimension_numbers = #tpu.dot_dimension_numbers<[1], [0], [0], [1], [0, 0, 1, 1], [], []>} : vector<16x128xbf16>, vector<128x256xbf16>, vector<16x256xf32> -> vector<16x256xf32>
    %c6 = arith.constant 6 : index
    %c0_31 = arith.constant 0 : index
    %75 = vector.load %arg3[%c6, %c0_31] : memref<24x256xf32, #tpu.memory_space<vmem>>, vector<1x256xf32>
    %76 = vector.broadcast %75 : vector<1x256xf32> to vector<16x256xf32>
    %77 = arith.addf %74, %76 : vector<16x256xf32>
    %78 = vector.extract_strided_slice %17 {offsets = [0, 6], sizes = [16, 1], strides = [1, 1]} : vector<16x128xf32> to vector<16x1xf32>
    %79 = vector.broadcast %78 : vector<16x1xf32> to vector<16x256xf32>
    %80 = arith.mulf %77, %79 : vector<16x256xf32>
    %81 = arith.addf %63, %80 : vector<16x256xf32>
    %c0_32 = arith.constant 0 : index
    %c1792 = arith.constant 1792 : index
    %82 = vector.load %arg7[%c0_32, %c1792] : memref<128x4608xbf16, #tpu.memory_space<vmem>>, vector<128x256xbf16>
    %cst_33 = arith.constant dense<0.000000e+00> : vector<16x256xf32>
    %83 = tpu.matmul %15, %82, %cst_33 {dimension_numbers = #tpu.dot_dimension_numbers<[1], [0], [0], [1], [0, 0, 1, 1], [], []>} : vector<16x128xbf16>, vector<128x256xbf16>, vector<16x256xf32> -> vector<16x256xf32>
    %c7 = arith.constant 7 : index
    %c0_34 = arith.constant 0 : index
    %84 = vector.load %arg3[%c7, %c0_34] : memref<24x256xf32, #tpu.memory_space<vmem>>, vector<1x256xf32>
    %85 = vector.broadcast %84 : vector<1x256xf32> to vector<16x256xf32>
    %86 = arith.addf %83, %85 : vector<16x256xf32>
    %87 = vector.extract_strided_slice %17 {offsets = [0, 7], sizes = [16, 1], strides = [1, 1]} : vector<16x128xf32> to vector<16x1xf32>
    %88 = vector.broadcast %87 : vector<16x1xf32> to vector<16x256xf32>
    %89 = arith.mulf %86, %88 : vector<16x256xf32>
    %90 = arith.addf %72, %89 : vector<16x256xf32>
    %c0_35 = arith.constant 0 : index
    %c2048 = arith.constant 2048 : index
    %91 = vector.load %arg7[%c0_35, %c2048] : memref<128x4608xbf16, #tpu.memory_space<vmem>>, vector<128x256xbf16>
    %cst_36 = arith.constant dense<0.000000e+00> : vector<16x256xf32>
    %92 = tpu.matmul %15, %91, %cst_36 {dimension_numbers = #tpu.dot_dimension_numbers<[1], [0], [0], [1], [0, 0, 1, 1], [], []>} : vector<16x128xbf16>, vector<128x256xbf16>, vector<16x256xf32> -> vector<16x256xf32>
    %c8 = arith.constant 8 : index
    %c0_37 = arith.constant 0 : index
    %93 = vector.load %arg3[%c8, %c0_37] : memref<24x256xf32, #tpu.memory_space<vmem>>, vector<1x256xf32>
    %94 = vector.broadcast %93 : vector<1x256xf32> to vector<16x256xf32>
    %95 = arith.addf %92, %94 : vector<16x256xf32>
    %96 = vector.extract_strided_slice %17 {offsets = [0, 8], sizes = [16, 1], strides = [1, 1]} : vector<16x128xf32> to vector<16x1xf32>
    %97 = vector.broadcast %96 : vector<16x1xf32> to vector<16x256xf32>
    %98 = arith.mulf %95, %97 : vector<16x256xf32>
    %99 = arith.addf %81, %98 : vector<16x256xf32>
    %c0_38 = arith.constant 0 : index
    %c2304 = arith.constant 2304 : index
    %100 = vector.load %arg7[%c0_38, %c2304] : memref<128x4608xbf16, #tpu.memory_space<vmem>>, vector<128x256xbf16>
    %cst_39 = arith.constant dense<0.000000e+00> : vector<16x256xf32>
    %101 = tpu.matmul %15, %100, %cst_39 {dimension_numbers = #tpu.dot_dimension_numbers<[1], [0], [0], [1], [0, 0, 1, 1], [], []>} : vector<16x128xbf16>, vector<128x256xbf16>, vector<16x256xf32> -> vector<16x256xf32>
    %c9 = arith.constant 9 : index
    %c0_40 = arith.constant 0 : index
    %102 = vector.load %arg3[%c9, %c0_40] : memref<24x256xf32, #tpu.memory_space<vmem>>, vector<1x256xf32>
    %103 = vector.broadcast %102 : vector<1x256xf32> to vector<16x256xf32>
    %104 = arith.addf %101, %103 : vector<16x256xf32>
    %105 = vector.extract_strided_slice %17 {offsets = [0, 9], sizes = [16, 1], strides = [1, 1]} : vector<16x128xf32> to vector<16x1xf32>
    %106 = vector.broadcast %105 : vector<16x1xf32> to vector<16x256xf32>
    %107 = arith.mulf %104, %106 : vector<16x256xf32>
    %108 = arith.addf %90, %107 : vector<16x256xf32>
    %c0_41 = arith.constant 0 : index
    %c2560 = arith.constant 2560 : index
    %109 = vector.load %arg7[%c0_41, %c2560] : memref<128x4608xbf16, #tpu.memory_space<vmem>>, vector<128x256xbf16>
    %cst_42 = arith.constant dense<0.000000e+00> : vector<16x256xf32>
    %110 = tpu.matmul %15, %109, %cst_42 {dimension_numbers = #tpu.dot_dimension_numbers<[1], [0], [0], [1], [0, 0, 1, 1], [], []>} : vector<16x128xbf16>, vector<128x256xbf16>, vector<16x256xf32> -> vector<16x256xf32>
    %c10 = arith.constant 10 : index
    %c0_43 = arith.constant 0 : index
    %111 = vector.load %arg3[%c10, %c0_43] : memref<24x256xf32, #tpu.memory_space<vmem>>, vector<1x256xf32>
    %112 = vector.broadcast %111 : vector<1x256xf32> to vector<16x256xf32>
    %113 = arith.addf %110, %112 : vector<16x256xf32>
    %114 = vector.extract_strided_slice %17 {offsets = [0, 10], sizes = [16, 1], strides = [1, 1]} : vector<16x128xf32> to vector<16x1xf32>
    %115 = vector.broadcast %114 : vector<16x1xf32> to vector<16x256xf32>
    %116 = arith.mulf %113, %115 : vector<16x256xf32>
    %117 = arith.addf %99, %116 : vector<16x256xf32>
    %118 = arith.addf %117, %108 : vector<16x256xf32>
    %119 = vector.extract_strided_slice %118 {offsets = [0, 0], sizes = [8, 256], strides = [1, 1]} : vector<16x256xf32> to vector<8x256xf32>
    %120 = vector.extract_strided_slice %118 {offsets = [8, 0], sizes = [8, 256], strides = [1, 1]} : vector<16x256xf32> to vector<8x256xf32>
    %121 = arith.addf %119, %120 : vector<8x256xf32>
    %c0_44 = arith.constant 0 : index
    %c2816 = arith.constant 2816 : index
    %122 = vector.load %arg7[%c0_44, %c2816] : memref<128x4608xbf16, #tpu.memory_space<vmem>>, vector<128x256xbf16>
    %cst_45 = arith.constant dense<0.000000e+00> : vector<24x256xf32>
    %123 = tpu.matmul %16, %122, %cst_45 {dimension_numbers = #tpu.dot_dimension_numbers<[1], [0], [0], [1], [0, 0, 1, 1], [], []>} : vector<24x128xbf16>, vector<128x256xbf16>, vector<24x256xf32> -> vector<24x256xf32>
    %c11 = arith.constant 11 : index
    %c0_46 = arith.constant 0 : index
    %124 = vector.load %arg3[%c11, %c0_46] : memref<24x256xf32, #tpu.memory_space<vmem>>, vector<1x256xf32>
    %125 = vector.broadcast %124 : vector<1x256xf32> to vector<24x256xf32>
    %126 = arith.addf %123, %125 : vector<24x256xf32>
    %127 = vector.extract_strided_slice %18 {offsets = [0, 0], sizes = [24, 1], strides = [1, 1]} : vector<24x128xf32> to vector<24x1xf32>
    %128 = vector.broadcast %127 : vector<24x1xf32> to vector<24x256xf32>
    %129 = arith.mulf %126, %128 : vector<24x256xf32>
    %c0_47 = arith.constant 0 : index
    %c3072 = arith.constant 3072 : index
    %130 = vector.load %arg7[%c0_47, %c3072] : memref<128x4608xbf16, #tpu.memory_space<vmem>>, vector<128x256xbf16>
    %cst_48 = arith.constant dense<0.000000e+00> : vector<24x256xf32>
    %131 = tpu.matmul %16, %130, %cst_48 {dimension_numbers = #tpu.dot_dimension_numbers<[1], [0], [0], [1], [0, 0, 1, 1], [], []>} : vector<24x128xbf16>, vector<128x256xbf16>, vector<24x256xf32> -> vector<24x256xf32>
    %c12 = arith.constant 12 : index
    %c0_49 = arith.constant 0 : index
    %132 = vector.load %arg3[%c12, %c0_49] : memref<24x256xf32, #tpu.memory_space<vmem>>, vector<1x256xf32>
    %133 = vector.broadcast %132 : vector<1x256xf32> to vector<24x256xf32>
    %134 = arith.addf %131, %133 : vector<24x256xf32>
    %135 = vector.extract_strided_slice %18 {offsets = [0, 1], sizes = [24, 1], strides = [1, 1]} : vector<24x128xf32> to vector<24x1xf32>
    %136 = vector.broadcast %135 : vector<24x1xf32> to vector<24x256xf32>
    %137 = arith.mulf %134, %136 : vector<24x256xf32>
    %c0_50 = arith.constant 0 : index
    %c3328 = arith.constant 3328 : index
    %138 = vector.load %arg7[%c0_50, %c3328] : memref<128x4608xbf16, #tpu.memory_space<vmem>>, vector<128x256xbf16>
    %cst_51 = arith.constant dense<0.000000e+00> : vector<24x256xf32>
    %139 = tpu.matmul %16, %138, %cst_51 {dimension_numbers = #tpu.dot_dimension_numbers<[1], [0], [0], [1], [0, 0, 1, 1], [], []>} : vector<24x128xbf16>, vector<128x256xbf16>, vector<24x256xf32> -> vector<24x256xf32>
    %c13 = arith.constant 13 : index
    %c0_52 = arith.constant 0 : index
    %140 = vector.load %arg3[%c13, %c0_52] : memref<24x256xf32, #tpu.memory_space<vmem>>, vector<1x256xf32>
    %141 = vector.broadcast %140 : vector<1x256xf32> to vector<24x256xf32>
    %142 = arith.addf %139, %141 : vector<24x256xf32>
    %143 = vector.extract_strided_slice %18 {offsets = [0, 2], sizes = [24, 1], strides = [1, 1]} : vector<24x128xf32> to vector<24x1xf32>
    %144 = vector.broadcast %143 : vector<24x1xf32> to vector<24x256xf32>
    %145 = arith.mulf %142, %144 : vector<24x256xf32>
    %146 = arith.addf %129, %145 : vector<24x256xf32>
    %c0_53 = arith.constant 0 : index
    %c3584 = arith.constant 3584 : index
    %147 = vector.load %arg7[%c0_53, %c3584] : memref<128x4608xbf16, #tpu.memory_space<vmem>>, vector<128x256xbf16>
    %cst_54 = arith.constant dense<0.000000e+00> : vector<24x256xf32>
    %148 = tpu.matmul %16, %147, %cst_54 {dimension_numbers = #tpu.dot_dimension_numbers<[1], [0], [0], [1], [0, 0, 1, 1], [], []>} : vector<24x128xbf16>, vector<128x256xbf16>, vector<24x256xf32> -> vector<24x256xf32>
    %c14 = arith.constant 14 : index
    %c0_55 = arith.constant 0 : index
    %149 = vector.load %arg3[%c14, %c0_55] : memref<24x256xf32, #tpu.memory_space<vmem>>, vector<1x256xf32>
    %150 = vector.broadcast %149 : vector<1x256xf32> to vector<24x256xf32>
    %151 = arith.addf %148, %150 : vector<24x256xf32>
    %152 = vector.extract_strided_slice %18 {offsets = [0, 3], sizes = [24, 1], strides = [1, 1]} : vector<24x128xf32> to vector<24x1xf32>
    %153 = vector.broadcast %152 : vector<24x1xf32> to vector<24x256xf32>
    %154 = arith.mulf %151, %153 : vector<24x256xf32>
    %155 = arith.addf %137, %154 : vector<24x256xf32>
    %c0_56 = arith.constant 0 : index
    %c3840 = arith.constant 3840 : index
    %156 = vector.load %arg7[%c0_56, %c3840] : memref<128x4608xbf16, #tpu.memory_space<vmem>>, vector<128x256xbf16>
    %cst_57 = arith.constant dense<0.000000e+00> : vector<24x256xf32>
    %157 = tpu.matmul %16, %156, %cst_57 {dimension_numbers = #tpu.dot_dimension_numbers<[1], [0], [0], [1], [0, 0, 1, 1], [], []>} : vector<24x128xbf16>, vector<128x256xbf16>, vector<24x256xf32> -> vector<24x256xf32>
    %c15 = arith.constant 15 : index
    %c0_58 = arith.constant 0 : index
    %158 = vector.load %arg3[%c15, %c0_58] : memref<24x256xf32, #tpu.memory_space<vmem>>, vector<1x256xf32>
    %159 = vector.broadcast %158 : vector<1x256xf32> to vector<24x256xf32>
    %160 = arith.addf %157, %159 : vector<24x256xf32>
    %161 = vector.extract_strided_slice %18 {offsets = [0, 4], sizes = [24, 1], strides = [1, 1]} : vector<24x128xf32> to vector<24x1xf32>
    %162 = vector.broadcast %161 : vector<24x1xf32> to vector<24x256xf32>
    %163 = arith.mulf %160, %162 : vector<24x256xf32>
    %164 = arith.addf %146, %163 : vector<24x256xf32>
    %c0_59 = arith.constant 0 : index
    %c4096 = arith.constant 4096 : index
    %165 = vector.load %arg7[%c0_59, %c4096] : memref<128x4608xbf16, #tpu.memory_space<vmem>>, vector<128x256xbf16>
    %cst_60 = arith.constant dense<0.000000e+00> : vector<24x256xf32>
    %166 = tpu.matmul %16, %165, %cst_60 {dimension_numbers = #tpu.dot_dimension_numbers<[1], [0], [0], [1], [0, 0, 1, 1], [], []>} : vector<24x128xbf16>, vector<128x256xbf16>, vector<24x256xf32> -> vector<24x256xf32>
    %c16_61 = arith.constant 16 : index
    %c0_62 = arith.constant 0 : index
    %167 = vector.load %arg3[%c16_61, %c0_62] : memref<24x256xf32, #tpu.memory_space<vmem>>, vector<1x256xf32>
    %168 = vector.broadcast %167 : vector<1x256xf32> to vector<24x256xf32>
    %169 = arith.addf %166, %168 : vector<24x256xf32>
    %170 = vector.extract_strided_slice %18 {offsets = [0, 5], sizes = [24, 1], strides = [1, 1]} : vector<24x128xf32> to vector<24x1xf32>
    %171 = vector.broadcast %170 : vector<24x1xf32> to vector<24x256xf32>
    %172 = arith.mulf %169, %171 : vector<24x256xf32>
    %173 = arith.addf %155, %172 : vector<24x256xf32>
    %c0_63 = arith.constant 0 : index
    %c4352 = arith.constant 4352 : index
    %174 = vector.load %arg7[%c0_63, %c4352] : memref<128x4608xbf16, #tpu.memory_space<vmem>>, vector<128x256xbf16>
    %cst_64 = arith.constant dense<0.000000e+00> : vector<24x256xf32>
    %175 = tpu.matmul %16, %174, %cst_64 {dimension_numbers = #tpu.dot_dimension_numbers<[1], [0], [0], [1], [0, 0, 1, 1], [], []>} : vector<24x128xbf16>, vector<128x256xbf16>, vector<24x256xf32> -> vector<24x256xf32>
    %c17 = arith.constant 17 : index
    %c0_65 = arith.constant 0 : index
    %176 = vector.load %arg3[%c17, %c0_65] : memref<24x256xf32, #tpu.memory_space<vmem>>, vector<1x256xf32>
    %177 = vector.broadcast %176 : vector<1x256xf32> to vector<24x256xf32>
    %178 = arith.addf %175, %177 : vector<24x256xf32>
    %179 = vector.extract_strided_slice %18 {offsets = [0, 6], sizes = [24, 1], strides = [1, 1]} : vector<24x128xf32> to vector<24x1xf32>
    %180 = vector.broadcast %179 : vector<24x1xf32> to vector<24x256xf32>
    %181 = arith.mulf %178, %180 : vector<24x256xf32>
    %182 = arith.addf %164, %181 : vector<24x256xf32>
    %183 = arith.addf %182, %173 : vector<24x256xf32>
    %184 = vector.extract_strided_slice %183 {offsets = [0, 0], sizes = [8, 256], strides = [1, 1]} : vector<24x256xf32> to vector<8x256xf32>
    %185 = vector.extract_strided_slice %183 {offsets = [8, 0], sizes = [8, 256], strides = [1, 1]} : vector<24x256xf32> to vector<8x256xf32>
    %186 = arith.addf %184, %185 : vector<8x256xf32>
    %187 = vector.extract_strided_slice %183 {offsets = [16, 0], sizes = [8, 256], strides = [1, 1]} : vector<24x256xf32> to vector<8x256xf32>
    %188 = arith.addf %186, %187 : vector<8x256xf32>
    %189 = arith.addf %7, %121 : vector<8x256xf32>
    %190 = arith.addf %189, %188 : vector<8x256xf32>
    %cst_66 = arith.constant 0.000000e+00 : f32
    %191 = vector.broadcast %cst_66 : f32 to vector<8x256xf32>
    %192 = arith.maximumf %190, %191 : vector<8x256xf32>
    %c1_i32_67 = arith.constant 1 : i32
    %193 = tpu.memref_slice %arg9[%c1_i32_67] : memref<2x!tpu.dma_semaphore, #tpu.memory_space<semaphore_mem>> -> memref<1x!tpu.dma_semaphore, #tpu.memory_space<semaphore_mem>>
    %194 = tpu.memref_squeeze %193 : memref<1x!tpu.dma_semaphore, #tpu.memory_space<semaphore_mem>> -> memref<!tpu.dma_semaphore, #tpu.memory_space<semaphore_mem>>
    tpu.wait_dma2 semaphore(%194 : memref<!tpu.dma_semaphore, #tpu.memory_space<semaphore_mem>>) src(%arg5 : memref<264x256xf32, #tpu.memory_space<any>>) dst(%arg8 : memref<264x256xf32, #tpu.memory_space<vmem>>)
    %c0_68 = arith.constant 0 : index
    %c0_69 = arith.constant 0 : index
    %195 = vector.load %arg8[%c0_68, %c0_69] : memref<264x256xf32, #tpu.memory_space<vmem>>, vector<256x256xf32>
    %c256_70 = arith.constant 256 : index
    %c0_71 = arith.constant 0 : index
    %196 = vector.load %arg8[%c256_70, %c0_71] : memref<264x256xf32, #tpu.memory_space<vmem>>, vector<8x256xf32>
    %cst_72 = arith.constant dense<0.000000e+00> : vector<8x256xf32>
    %197 = tpu.matmul %192, %195, %cst_72 {dimension_numbers = #tpu.dot_dimension_numbers<[1], [0], [0], [1], [0, 0, 1, 1], [], []>} : vector<8x256xf32>, vector<256x256xf32>, vector<8x256xf32> -> vector<8x256xf32>
    %198 = vector.extract_strided_slice %196 {offsets = [0, 0], sizes = [1, 256], strides = [1, 1]} : vector<8x256xf32> to vector<1x256xf32>
    %199 = vector.broadcast %198 : vector<1x256xf32> to vector<8x256xf32>
    %200 = arith.addf %197, %199 : vector<8x256xf32>
    %cst_73 = arith.constant 0.000000e+00 : f32
    %201 = vector.broadcast %cst_73 : f32 to vector<8x256xf32>
    %202 = arith.maximumf %200, %201 : vector<8x256xf32>
    %203 = vector.extract_strided_slice %196 {offsets = [1, 0], sizes = [1, 256], strides = [1, 1]} : vector<8x256xf32> to vector<1x256xf32>
    %204 = vector.broadcast %203 : vector<1x256xf32> to vector<8x256xf32>
    %205 = arith.mulf %202, %204 : vector<8x256xf32>
    %cst_74 = arith.constant dense<0.000000e+00> : vector<8xf32>
    %206 = vector.multi_reduction <add>, %205, %cst_74 [1] : vector<8x256xf32> to vector<8xf32>
    %207 = vector.shape_cast %206 : vector<8xf32> to vector<8x1xf32>
    %208 = vector.extract_strided_slice %196 {offsets = [2, 0], sizes = [1, 128], strides = [1, 1]} : vector<8x256xf32> to vector<1x128xf32>
    %209 = vector.broadcast %207 : vector<8x1xf32> to vector<8x128xf32>
    %210 = vector.broadcast %208 : vector<1x128xf32> to vector<8x128xf32>
    %211 = arith.addf %209, %210 : vector<8x128xf32>
    %c0_75 = arith.constant 0 : index
    %c0_76 = arith.constant 0 : index
    %212 = vector.load %arg6[%c0_75, %c0_76] : memref<8x128xf32, #tpu.memory_space<vmem>>, vector<8x128xf32>
    tpu.vector_store %arg6[%c0_75, %c0_76], %211 {strides = array<i32>} : memref<8x128xf32, #tpu.memory_space<vmem>>, vector<8x128xf32>,
    return
  }
}

</mosaic_0001>

<bundles_post_ra>
// kernel: mul.5
= control target key start
LH: loop header
LB: loop body
LE: loop exit
PB: predicated region body
PF: predicated region fallthrough
CT: control target
= control target key end

     0   :  { %vm8_vm0 = vcmask 64512   ;;  %vm14_vm1 = vcmask 130112   ;;  %s42_s0 = inlined_call_operand.vmem [shape: f32[2,8], index: 0, kind: input, shape index: {}]   ;;  %s43_s1 = inlined_call_operand.vmem [shape: f32[16], index: 1, kind: output, shape index: {}]  }
   0x1   :  { %v5_v0 = vld [vmem:[%s42_s0] sm:$0x3]  ;;  %s25_s0 = smov 8  }
   0x2   :  { %6 = vst [vmem:[#allocation1] sm:$0x3] %v5_v0 }
   0x9   :  { %v11_v1 = vld [vmem:[#allocation1 + $0x1] sm:$0x1]   ;;  %v7_v2 = vld [vmem:[#allocation1] sm:$0x1]  }
   0xa   :  { %12 = vrot.lane.b32.xlu0 %v11_v1, %s25_s0  ;;  %9 = vst.msk [vmem:[#allocation0] sm:$0x1] %vm8_vm0, %v7_v2  }
  0x7c   :  { %v13_v3 = vpop.permute.xlu0 %12  }
  0x7d   :  { %15 = vst.msk [vmem:[#allocation0] sm:$0x1] %vm14_vm1, %v13_v3  }
  0x84   :  { %v20_v4 = vld [vmem:[#allocation0] sm:$0x1] }
  0x85   :  { %23 = vst [vmem:[%s43_s1] sm:$0x1] %v20_v4 }

// kernel: hpn_critic_forward.1
= control target key start
LH: loop header
LB: loop body
LE: loop exit
PB: predicated region body
PF: predicated region fallthrough
CT: control target
= control target key end

     0   :  { %11 = vsyncpa [#allocation6], 0  ;;  %s5084_s0 = inlined_call_operand.vmem [shape: f32[48,32], index: 0, kind: input, shape index: {}]   ;;  %s5085_s1 = inlined_call_operand.vmem [shape: f32[40,128], index: 1, kind: input, shape index: {}]   ;;  %s5086_s2 = inlined_call_operand.hbm [shape: f32[32,384], index: 2, kind: input, shape index: {}]   ;;  %s5087_s3 = inlined_call_operand.hbm [shape: f32[24,256], index: 3, kind: input, shape index: {}]   ;;  %s5088_s4 = inlined_call_operand.hbm [shape: bf16[128,4608], index: 4, kind: input, shape index: {}]   ;;  %s5089_s5 = inlined_call_operand.hbm [shape: f32[264,256], index: 5, kind: input, shape index: {}]   ;;  %s5090_s6 = inlined_call_operand.vmem [shape: f32[8,128], index: 6, kind: output, shape index: {}]  }
   0x1   :  { %12 = vsyncpa [#allocation8], 0  ;;  %s4551_s21 = smov [#allocation5]  }
   0x2   :  { %s22_s22 = sshll.u32 %s4551_s21, 4  ;;  %s23_s22 = int_to_ptr.vmem [resolvable:$true] %s22_s22 }
   0x3   :  { %s4471_s23 = scalar_lea.vmem %s23_s22, 1536  ;;  %p4476_p1 = scmp.lt.s32.totalorder %s23_s22, %s23_s22 }
   0x4   :  { %p4472_p0 = scmp.ne.s32.totalorder %s23_s22, %s4471_s23  ;;  %p4477_p2 = scmp.lt.s32.totalorder %s4471_s23, %s4471_s23 }
   0x6   :  { %p4478_p3 = por %p4477_p2, %p4476_p1 }
   0x8   :  { %p4479_p4 = pnand %p4478_p3, %p4472_p0 }
   0xa   :  { %4482 = shalt.err (!%p4479_p4)
}
   0xb   :  { %s4552_s24 = smov 384   ;;  %s4553_s25 = smov 24  }
   0xc   :  { %28 = dma.hbm_to_vmem [thread:$0]  %s5086_s2, 1536, %s23_s22, [#allocation6], %s4552_s24, %s4552_s24, %s4553_s25  }
   0xd   :  { %s4554_s28 = smov [#allocation7]  }
   0xe   :  { %s34_s29 = sshll.u32 %s4554_s28, 4  ;;  %s35_s29 = int_to_ptr.vmem [resolvable:$true] %s34_s29 }
   0xf   :  { %s4491_s30 = scalar_lea.vmem %s35_s29, 768  ;;  %p4496_p6 = scmp.lt.s32.totalorder %s35_s29, %s35_s29 }
  0x10   :  { %p4492_p5 = scmp.ne.s32.totalorder %s35_s29, %s4491_s30  ;;  %p4497_p7 = scmp.lt.s32.totalorder %s4491_s30, %s4491_s30 }
  0x12   :  { %p4498_p8 = por %p4497_p7, %p4496_p6 }
  0x14   :  { %p4499_p9 = pnand %p4498_p8, %p4492_p5 }
  0x16   :  { %4502 = shalt.err (!%p4499_p9)
}
  0x17   :  { %s4555_s7 = smov 256   ;;  %s4556_s8 = smov 16  }
  0x18   :  { %40 = dma.hbm_to_vmem [thread:$0]  %s5087_s3, 768, %s35_s29, [#allocation8], %s4555_s7, %s4555_s7, %s4556_s8  }
  0x19   :  { %4543 = dma.done.wait [#allocation6], 1536  }
  0x1a   :  { %4544 = vsyncadd [#allocation6], 4294965760 }
  0x1b   :  { %4545 = dma.done.wait [#allocation8], 768  }
  0x1c   :  { %4546 = vsyncadd [#allocation8], 4294966528  ;;  %v4557_v0 = vmov 0.0   ;;  %v4615_v1 = vld [vmem:[%s5085_s1] sm:$0xff]  ;;  %v4620_v2 = vld [vmem:[%s5085_s1 + $0x8] sm:$0xff]  ;;  %vm89_vm0 = vcmask 261120  }
  0x1d   :  { %172 = vmatprep.mubr.f32.mxu0 %v4557_v0  ;;  %v4625_v3 = vld [vmem:[%s5085_s1 + $0x10] sm:$0xff]  ;;  %v4630_v4 = vld [vmem:[%s5085_s1 + $0x18] sm:$0xff]  ;;  %v4635_v5 = vld [vmem:[%s5085_s1 + $0x20] sm:$0xff]  ;;  %s4558_s30 = smov [#allocation2]   ;;  %s4559_s8 = smov [#allocation3]  }
  0x1e   :  { %v87_v6 = vld [vmem:[#allocation5 + $0x50] sm:$0xff]  ;;  %v88_v7 = vld [vmem:[#allocation5 + $0x58] sm:$0xff]  ;;  %v86_v8 = vld [vmem:[#allocation5 + $0x48] sm:$0xff]  ;;  %s55_s7 = sshll.u32 %s4558_s30, 4  ;;  %s67_s9 = sshll.u32 %s4559_s8, 4  ;;  %s56_s7 = int_to_ptr.vmem [resolvable:$true] %s55_s7  ;;  %s68_s9 = int_to_ptr.vmem [resolvable:$true] %s67_s9 }
  0x1f   :  { %132 = vmatprep.subr.mxu0 %v87_v6  ;;  %v84_v9 = vld [vmem:[#allocation5 + $0x38] sm:$0xff]  ;;  %3963 = vmatprep.subr.mxu1 %v88_v7  ;;  %v85_v10 = vld [vmem:[#allocation5 + $0x40] sm:$0xff]  ;;  %v83_v11 = vld [vmem:[#allocation5 + $0x30] sm:$0xff]  ;;  %s4511_s10 = scalar_lea.vmem %s56_s7, 36864  ;;  %p4516_p11 = scmp.lt.s32.totalorder %s56_s7, %s56_s7 }
  0x20   :  { %133 = vmatpush1.msra.mxu0 %v86_v8  ;;  %v81_v12 = vld [vmem:[#allocation5 + $0x20] sm:$0xff]  ;;  %3964 = vmatpush3.msra.mxu1 %v88_v7  ;;  %v82_v13 = vld [vmem:[#allocation5 + $0x28] sm:$0xff]  ;;  %v80_v14 = vld [vmem:[#allocation5 + $0x18] sm:$0xff]  ;;  %p4512_p10 = scmp.ne.s32.totalorder %s56_s7, %s4511_s10  ;;  %p4517_p12 = scmp.lt.s32.totalorder %s4511_s10, %s4511_s10 }
  0x21   :  { %134 = vmatprep.subr.mxu0 %v84_v9  ;;  %3965 = vmatprep.subr.mxu1 %v85_v10  ;;  %v78_v15 = vld [vmem:[#allocation5 + $0x8] sm:$0xff]  ;;  %v79_v16 = vld [vmem:[#allocation5 + $0x10] sm:$0xff]  ;;  %v77_v17 = vld [vmem:[#allocation5] sm:$0xff] }
  0x22   :  { %135 = vmatpush1.msra.mxu0 %v83_v11  ;;  %3966 = vmatpush3.msra.mxu1 %v85_v10  ;;  %v71_v18 = vld [vmem:[%s5084_s0] sm:$0xff]  ;;  %v72_v19 = vld [vmem:[%s5084_s0 + $0x8] sm:$0xff]  ;;  %v73_v20 = vld [vmem:[%s5084_s0 + $0x10] sm:$0xff]  ;;  %p4518_p13 = por %p4517_p12, %p4516_p11 }
  0x23   :  { %136 = vmatprep.subr.mxu0 %v81_v12  ;;  %3967 = vmatprep.subr.mxu1 %v82_v13  ;;  %v74_v21 = vld [vmem:[%s5084_s0 + $0x18] sm:$0xff]  ;;  %v75_v22 = vld [vmem:[%s5084_s0 + $0x20] sm:$0xff]  ;;  %v76_v23 = vld [vmem:[%s5084_s0 + $0x28] sm:$0xff] }
  0x24   :  { %137 = vmatpush1.msra.mxu0 %v80_v14  ;;  %3968 = vmatpush3.msra.mxu1 %v82_v13  ;;  %p4519_p0 = pnand %p4518_p13, %p4512_p10 }
  0x25   :  { %138 = vmatprep.subr.mxu0 %v78_v15  ;;  %3969 = vmatprep.subr.mxu1 %v79_v16 }
  0x26   :  { %139 = vmatpush1.msra.mxu0 %v77_v17  ;;  %3970 = vmatpush3.msra.mxu1 %v79_v16 }
  0x27   :  { %3971 = vmatprep.mubr.msk.f32.mxu1 %vm89_vm0, %v71_v18  ;;  %3651 = vmatmul.mubr.msk.f32.vlgmr.msra.gmra.mxu0 %vm89_vm0, %v71_v18 }
  0x28   :  { %3972 = vmatmul.mubr.msk.f32.vlgmr.msra.gmra.mxu1 %vm89_vm0, %v72_v19  ;;  %178 = vmatprep.mubr.f32.mxu0 %v4557_v0 }
  0x29   :  { %3974 = vmatprep.mubr.msk.f32.mxu1 %vm89_vm0, %v73_v20 }
  0x2b   :  { %3652 = vmatmul.mubr.msk.f32.gmra.mxu0 %vm89_vm0, %v72_v19 }
  0x2c   :  { %3975 = vmatmul.mubr.msk.f32.gmra.mxu1 %vm89_vm0, %v74_v21  ;;  %182 = vmatprep.mubr.f32.mxu0 %v4557_v0 }
  0x2d   :  { %3977 = vmatprep.mubr.msk.f32.mxu1 %vm89_vm0, %v75_v22 }
  0x2f   :  { %3653 = vmatmul.mubr.msk.f32.gmra.mxu0 %vm89_vm0, %v73_v20 }
  0x30   :  { %3978 = vmatmul.mubr.msk.f32.gmra.mxu1 %vm89_vm0, %v76_v23  ;;  %186 = vmatprep.mubr.f32.mxu0 %v4557_v0 }
  0x33   :  { %3654 = vmatmul.mubr.msk.f32.gmra.mxu0 %vm89_vm0, %v74_v21 }
  0x34   :  { %190 = vmatprep.mubr.f32.mxu0 %v4557_v0 }
  0x37   :  { %3655 = vmatmul.mubr.msk.f32.gmra.mxu0 %vm89_vm0, %v75_v22 }
  0x38   :  { %194 = vmatprep.mubr.f32.mxu0 %v4557_v0 }
  0x3b   :  { %3656 = vmatmul.mubr.msk.f32.gmra.mxu0 %vm89_vm0, %v76_v23 }
  0x3c   :  { %4522 = shalt.err (!%p4519_p0)  }
  0x3d   :  { %58 = dma.hbm_to_vmem [thread:$0]  %s5088_s4, 36864, %s56_s7, [#allocation4] }
  0x3e   :  { %s4531_s11 = scalar_lea.vmem %s68_s9, 8448  ;;  %p4536_p2 = scmp.lt.s32.totalorder %s68_s9, %s68_s9 }
  0x3f   :  { %p4532_p1 = scmp.ne.s32.totalorder %s68_s9, %s4531_s11  ;;  %p4537_p3 = scmp.lt.s32.totalorder %s4531_s11, %s4531_s11 }
  0x41   :  { %p4538_p4 = por %p4537_p3, %p4536_p2 }
  0x43   :  { %p4539_p5 = pnand %p4538_p4, %p4532_p1 }
  0x45   :  { %4542 = shalt.err (!%p4539_p5)  }
  0x46   :  { %70 = dma.hbm_to_vmem [thread:$0]  %s5089_s5, 8448, %s68_s9, [#allocation4 + $0x1] }
  0xe7   :  { %v4673_v24 = vpop.f32.mrf.mxu0 }
  0xe8   :  { %v3973_v25 = vpop.f32.mrf.mxu1 }
  0xe9   :  { %v4675_v26 = vpop.f32.mrf.mxu0  ;;  %v298_v28 = vmul.f32 0.01, %v3973_v25  ;;  %vm293_vm1 = vcmp.gt.f32.partialorder %v3973_v25, 0.0 }
  0xea   :  { %v265_v27 = vpop.f32.mrf.mxu1 }
  0xeb   :  { %v180_v29 = vpop.f32.mrf.mxu0  ;;  %v303_v33 = vsel %vm293_vm1, %v3973_v25, %v298_v28 }
  0xec   :  { %v3976_v30 = vpop.f32.mrf.mxu1 }
  0xed   :  { %v181_v31 = vpop.f32.mrf.mxu0  ;;  %v300_v34 = vmul.f32 0.01, %v3976_v30  ;;  %vm295_vm3 = vcmp.gt.f32.partialorder %v3976_v30, 0.0 }
  0xee   :  { %v274_v32 = vpop.f32.mrf.mxu1 }
  0xef   :  { %vm294_vm2 = vcmp.gt.f32.partialorder %v274_v32, 0.0  ;;  %v299_v35 = vmul.f32 0.01, %v274_v32  ;;  %v184_v36 = vpop.f32.mrf.mxu0  ;;  %v305_v43 = vsel %vm295_vm3, %v3976_v30, %v300_v34 }
  0xf0   :  { %v3979_v37 = vpop.f32.mrf.mxu1 }
  0xf1   :  { %v304_v38 = vsel %vm294_vm2, %v274_v32, %v299_v35  ;;  %vm297_vm4 = vcmp.gt.f32.partialorder %v3979_v37, 0.0  ;;  %v302_v39 = vmul.f32 0.01, %v3979_v37  ;;  %v185_v41 = vpop.f32.mrf.mxu0 }
  0xf2   :  { %v4677_v40 = vpack.c.bf16 %v304_v38, %v303_v33  ;;  %v284_v42 = vpop.f32.mrf.mxu1 }
  0xf3   :  { %v307_v44 = vsel %vm297_vm4, %v3979_v37, %v302_v39  ;;  %vm296_vm5 = vcmp.gt.f32.partialorder %v284_v42, 0.0  ;;  %v301_v45 = vmul.f32 0.01, %v284_v42  ;;  %v188_v47 = vpop.f32.mrf.mxu0 }
  0xf4   :  { %v4679_v46 = vpack.c.bf16 %v307_v44, %v307_v44 }
  0xf5   :  { %v306_v48 = vsel %vm296_vm5, %v284_v42, %v301_v45  ;;  %v189_v50 = vpop.f32.mrf.mxu0 }
  0xf6   :  { %v4681_v49 = vpack.c.bf16 %v306_v48, %v305_v43 }
  0xf7   :  { %v192_v51 = vpop.f32.mrf.mxu0 }
  0xf9   :  { %v193_v52 = vpop.f32.mrf.mxu0 }
  0xfb   :  { %v196_v53 = vpop.f32.mrf.mxu0 }
  0xfd   :  { %v197_v54 = vpop.f32.mrf.mxu0 }
  0xfe   :  { %4547 = dma.done.wait [#allocation4], 36864 }
  0xff   :  { %4548 = vsyncadd [#allocation4], 4294930432  ;;  %v4560_v55 = vmov 0   ;;  %v4561_v56 = vmov 8   ;;  %v4562_v57 = vmov 1   ;;  %v4563_v59 = vmov 9  }
 0x100   :  { %460 = vmatprep.mubr.bf16.mxu1 %v4560_v55  ;;  %790 = vmatprep.mubr.bf16.mxu0 %v4560_v55  ;;  %v4031_v58 = vld [vmem:[#allocation2 + $0x7e4] ss:$144 sps:$4 sm:$0xff]   ;;  %v4035_v61 = vld [vmem:[#allocation2 + $0x7e0] ss:$144 sps:$4 sm:$0xff]   ;;  %v4564_v12 = vmov 2   ;;  %v4565_v19 = vmov 3  }
 0x101   :  { %4007 = vset.pattern.permute.xlu0 %v4561_v56  ;;  %4000 = vset.pattern.permute.xlu1 %v4562_v57  ;;  %v4033_v60 = vld [vmem:[#allocation2 + $0x7f4] ss:$144 sps:$4 sm:$0xff]   ;;  %v4036_v62 = vld [vmem:[#allocation2 + $0x7f0] ss:$144 sps:$4 sm:$0xff]   ;;  %v4566_v27 = vmov 4   ;;  %v4567_v52 = vmov 5  }
 0x102   :  { %1810 = vperm.xlu0 %4007, %v4615_v1   ;;  %638 = vperm.xlu1 %4000, %v4615_v1   ;;  %v4037_v63 = vld [vmem:[#allocation2 + $0x6c4] ss:$144 sps:$4 sm:$0xff]   ;;  %v4041_v6 = vld [vmem:[#allocation2 + $0x6c0] ss:$144 sps:$4 sm:$0xff]   ;;  %v4081_v37 = vld [vmem:[#allocation2 + $0x7ec] ss:$144 sps:$4 sm:$0xff]  }
 0x103   :  { %428 = vmatprep.subr.bf16.mxu1 %v4031_v58  ;;  %758 = vmatprep.subr.bf16.mxu0 %v4033_v60  ;;  %v4039_v0 = vld [vmem:[#allocation2 + $0x6d4] ss:$144 sps:$4 sm:$0xff]   ;;  %v4042_v7 = vld [vmem:[#allocation2 + $0x6d0] ss:$144 sps:$4 sm:$0xff]   ;;  %v4079_v39 = vld [vmem:[#allocation2 + $0x7e8] ss:$144 sps:$4 sm:$0xff]  }
 0x104   :  { %429 = vmatpush1.bf16.msra.mxu1 %v4035_v61  ;;  %759 = vmatpush1.bf16.msra.mxu0 %v4036_v62  ;;  %v4043_v8 = vld [vmem:[#allocation2 + $0x5a4] ss:$144 sps:$4 sm:$0xff]   ;;  %v4047_v10 = vld [vmem:[#allocation2 + $0x5a0] ss:$144 sps:$4 sm:$0xff]   ;;  %v4087_v42 = vld [vmem:[#allocation2 + $0x6cc] ss:$144 sps:$4 sm:$0xff]  }
 0x105   :  { %430 = vmatprep.subr.bf16.mxu1 %v4037_v63  ;;  %760 = vmatprep.subr.bf16.mxu0 %v4039_v0  ;;  %v4045_v9 = vld [vmem:[#allocation2 + $0x5b4] ss:$144 sps:$4 sm:$0xff]   ;;  %v4048_v11 = vld [vmem:[#allocation2 + $0x5b0] ss:$144 sps:$4 sm:$0xff]   ;;  %v4085_v44 = vld [vmem:[#allocation2 + $0x6c8] ss:$144 sps:$4 sm:$0xff]  }
 0x106   :  { %4010 = vset.pattern.permute.xlu0 %v4563_v59  ;;  %642 = vperm.xlu1 %4000, %v4620_v2   ;;  %v4049_v13 = vld [vmem:[#allocation2 + $0x484] ss:$144 sps:$4 sm:$0xff]   ;;  %v4053_v15 = vld [vmem:[#allocation2 + $0x480] ss:$144 sps:$4 sm:$0xff]   ;;  %v4093_v47 = vld [vmem:[#allocation2 + $0x5ac] ss:$144 sps:$4 sm:$0xff]  }
 0x107   :  { %1982 = vperm.xlu0 %4010, %v4620_v2   ;;  %v4051_v14 = vld [vmem:[#allocation2 + $0x494] ss:$144 sps:$4 sm:$0xff]   ;;  %v4054_v16 = vld [vmem:[#allocation2 + $0x490] ss:$144 sps:$4 sm:$0xff]   ;;  %v4091_v50 = vld [vmem:[#allocation2 + $0x5a8] ss:$144 sps:$4 sm:$0xff]  }
 0x108   :  { %431 = vmatpush1.bf16.msra.mxu1 %v4041_v6  ;;  %761 = vmatpush1.bf16.msra.mxu0 %v4042_v7  ;;  %v4055_v17 = vld [vmem:[#allocation2 + $0x364] ss:$144 sps:$4 sm:$0xff]   ;;  %v4059_v20 = vld [vmem:[#allocation2 + $0x360] ss:$144 sps:$4 sm:$0xff]   ;;  %v4099_v53 = vld [vmem:[#allocation2 + $0x48c] ss:$144 sps:$4 sm:$0xff]  }
 0x109   :  { %432 = vmatprep.subr.bf16.mxu1 %v4043_v8  ;;  %762 = vmatprep.subr.bf16.mxu0 %v4045_v9  ;;  %v4057_v18 = vld [vmem:[#allocation2 + $0x374] ss:$144 sps:$4 sm:$0xff]   ;;  %v4060_v21 = vld [vmem:[#allocation2 + $0x370] ss:$144 sps:$4 sm:$0xff]   ;;  %v4097_v58 = vld [vmem:[#allocation2 + $0x488] ss:$144 sps:$4 sm:$0xff]  }
 0x10a   :  { %4001 = vset.pattern.permute.xlu1 %v4564_v12  ;;  %v4061_v22 = vld [vmem:[#allocation2 + $0x244] ss:$144 sps:$4 sm:$0xff]   ;;  %v4065_v25 = vld [vmem:[#allocation2 + $0x240] ss:$144 sps:$4 sm:$0xff]   ;;  %v4105_v61 = vld [vmem:[#allocation2 + $0x36c] ss:$144 sps:$4 sm:$0xff]  }
 0x10b   :  { %4011 = vset.pattern.permute.xlu0 %v4560_v55  ;;  %806 = vperm.xlu1 %4001, %v4620_v2   ;;  %v4063_v23 = vld [vmem:[#allocation2 + $0x254] ss:$144 sps:$4 sm:$0xff]   ;;  %v4066_v28 = vld [vmem:[#allocation2 + $0x250] ss:$144 sps:$4 sm:$0xff]   ;;  %v4568_v63 = vmov 6  }
 0x10c   :  { %473 = vperm.xlu0 %4011, %v4615_v1   ;;  %433 = vmatpush1.bf16.msra.mxu1 %v4047_v10  ;;  %v4067_v29 = vld [vmem:[#allocation2 + $0x124] ss:$144 sps:$4 sm:$0xff]   ;;  %v4071_v31 = vld [vmem:[#allocation2 + $0x120] ss:$144 sps:$4 sm:$0xff]   ;;  %v4103_v0 = vld [vmem:[#allocation2 + $0x368] ss:$144 sps:$4 sm:$0xff]  }
 0x10d   :  { %763 = vmatpush1.bf16.msra.mxu0 %v4048_v11  ;;  %434 = vmatprep.subr.bf16.mxu1 %v4049_v13  ;;  %v4069_v30 = vld [vmem:[#allocation2 + $0x134] ss:$144 sps:$4 sm:$0xff]   ;;  %v4072_v32 = vld [vmem:[#allocation2 + $0x130] ss:$144 sps:$4 sm:$0xff]   ;;  %v4111_v7 = vld [vmem:[#allocation2 + $0x24c] ss:$144 sps:$4 sm:$0xff]  }
 0x10e   :  { %764 = vmatprep.subr.bf16.mxu0 %v4051_v14  ;;  %v4073_v33 = vld [vmem:[#allocation2 + $0x4] ss:$144 sps:$4 sm:$0xff]   ;;  %v4077_v35 = vld [vmem:[#allocation2] ss:$144 sps:$4 sm:$0xff]   ;;  %v4109_v9 = vld [vmem:[#allocation2 + $0x248] ss:$144 sps:$4 sm:$0xff]  }
 0x10f   :  { %4002 = vset.pattern.permute.xlu1 %v4565_v19  ;;  %v4075_v34 = vld [vmem:[#allocation2 + $0x14] ss:$144 sps:$4 sm:$0xff]   ;;  %v4078_v36 = vld [vmem:[#allocation2 + $0x10] ss:$144 sps:$4 sm:$0xff]   ;;  %v4117_v11 = vld [vmem:[#allocation2 + $0x12c] ss:$144 sps:$4 sm:$0xff]  }
 0x110   :  { %478 = vperm.xlu0 %4011, %v4620_v2   ;;  %970 = vperm.xlu1 %4002, %v4615_v1   ;;  %v4084_v38 = vld [vmem:[#allocation2 + $0x804] ss:$144 sps:$4 sm:$0xff]   ;;  %v4082_v41 = vld [vmem:[#allocation2 + $0x800] ss:$144 sps:$4 sm:$0xff]   ;;  %v4115_v14 = vld [vmem:[#allocation2 + $0x128] ss:$144 sps:$4 sm:$0xff]  }
 0x111   :  { %435 = vmatpush1.bf16.msra.mxu1 %v4053_v15  ;;  %765 = vmatpush1.bf16.msra.mxu0 %v4054_v16  ;;  %v4090_v43 = vld [vmem:[#allocation2 + $0x6e4] ss:$144 sps:$4 sm:$0xff]   ;;  %v4088_v45 = vld [vmem:[#allocation2 + $0x6e0] ss:$144 sps:$4 sm:$0xff]   ;;  %v4123_v16 = vld [vmem:[#allocation2 + $0xc] ss:$144 sps:$4 sm:$0xff]  }
 0x112   :  { %436 = vmatprep.subr.bf16.mxu1 %v4055_v17  ;;  %766 = vmatprep.subr.bf16.mxu0 %v4057_v18  ;;  %v4096_v48 = vld [vmem:[#allocation2 + $0x5c4] ss:$144 sps:$4 sm:$0xff]   ;;  %v4094_v51 = vld [vmem:[#allocation2 + $0x5c0] ss:$144 sps:$4 sm:$0xff]   ;;  %v4121_v18 = vld [vmem:[#allocation2 + $0x8] ss:$144 sps:$4 sm:$0xff]  }
 0x113   :  { %v4102_v54 = vld [vmem:[#allocation2 + $0x4a4] ss:$144 sps:$4 sm:$0xff]   ;;  %v4100_v60 = vld [vmem:[#allocation2 + $0x4a0] ss:$144 sps:$4 sm:$0xff]  }
 0x114   :  { %2329 = vperm.xlu0 %4011, %v4625_v3   ;;  %4003 = vset.pattern.permute.xlu1 %v4566_v27  ;;  %v4108_v62 = vld [vmem:[#allocation2 + $0x384] ss:$144 sps:$4 sm:$0xff]   ;;  %v4106_v6 = vld [vmem:[#allocation2 + $0x380] ss:$144 sps:$4 sm:$0xff]  }
 0x115   :  { %437 = vmatpush1.bf16.msra.mxu1 %v4059_v20  ;;  %767 = vmatpush1.bf16.msra.mxu0 %v4060_v21  ;;  %v4114_v8 = vld [vmem:[#allocation2 + $0x264] ss:$144 sps:$4 sm:$0xff]   ;;  %v4112_v10 = vld [vmem:[#allocation2 + $0x260] ss:$144 sps:$4 sm:$0xff]   ;;  %v4129_v21 = vld [vmem:[#allocation2 + $0x7fc] ss:$144 sps:$4 sm:$0xff]  }
 0x116   :  { %438 = vmatprep.subr.bf16.mxu1 %v4061_v22  ;;  %768 = vmatprep.subr.bf16.mxu0 %v4063_v23  ;;  %v4120_v13 = vld [vmem:[#allocation2 + $0x144] ss:$144 sps:$4 sm:$0xff]   ;;  %v4118_v15 = vld [vmem:[#allocation2 + $0x140] ss:$144 sps:$4 sm:$0xff]   ;;  %v4127_v23 = vld [vmem:[#allocation2 + $0x7f8] ss:$144 sps:$4 sm:$0xff]  }
 0x117   :  { %1138 = vperm.xlu1 %4003, %v4615_v1   ;;  %v4126_v17 = vld [vmem:[#allocation2 + $0x24] ss:$144 sps:$4 sm:$0xff]   ;;  %v4124_v20 = vld [vmem:[#allocation2 + $0x20] ss:$144 sps:$4 sm:$0xff]  }
 0x118   :  { %4013 = vset.pattern.permute.xlu0 %v4564_v12  ;;  %v4132_v22 = vld [vmem:[#allocation2 + $0x814] ss:$144 sps:$4 sm:$0xff]  }
 0x119   :  { %802 = vperm.xlu0 %4013, %v4615_v1   ;;  %439 = vmatpush1.bf16.msra.mxu1 %v4065_v25  ;;  %v4130_v25 = vld [vmem:[#allocation2 + $0x810] ss:$144 sps:$4 sm:$0xff]  }
 0x11a   :  { %769 = vmatpush1.bf16.msra.mxu0 %v4066_v28  ;;  %440 = vmatprep.subr.bf16.mxu1 %v4067_v29  ;;  %v4135_v28 = vld [vmem:[#allocation2 + $0x6dc] ss:$144 sps:$4 sm:$0xff]   ;;  %v4138_v29 = vld [vmem:[#allocation2 + $0x6f4] ss:$144 sps:$4 sm:$0xff]  }
 0x11b   :  { %770 = vmatprep.subr.bf16.mxu0 %v4069_v30  ;;  %1142 = vperm.xlu1 %4003, %v4620_v2   ;;  %v4133_v30 = vld [vmem:[#allocation2 + $0x6d8] ss:$144 sps:$4 sm:$0xff]  }
 0x11d   :  { %2691 = vperm.xlu0 %4013, %v4630_v4   ;;  %441 = vmatpush1.bf16.msra.mxu1 %v4071_v31  ;;  %v4136_v31 = vld [vmem:[#allocation2 + $0x6f0] ss:$144 sps:$4 sm:$0xff]  }
 0x11e   :  { %771 = vmatpush1.bf16.msra.mxu0 %v4072_v32  ;;  %442 = vmatprep.subr.bf16.mxu1 %v4073_v33  ;;  %v4141_v32 = vld [vmem:[#allocation2 + $0x5bc] ss:$144 sps:$4 sm:$0xff]   ;;  %v4144_v33 = vld [vmem:[#allocation2 + $0x5d4] ss:$144 sps:$4 sm:$0xff]  }
 0x11f   :  { %772 = vmatprep.subr.bf16.mxu0 %v4075_v34  ;;  %4004 = vset.pattern.permute.xlu1 %v4567_v52  ;;  %v4139_v34 = vld [vmem:[#allocation2 + $0x5b8] ss:$144 sps:$4 sm:$0xff]  }
 0x120   :  { %1310 = vperm.xlu1 %4004, %v4620_v2  }
 0x121   :  { %4016 = vset.pattern.permute.xlu0 %v4565_v19  ;;  %443 = vmatpush1.bf16.msra.mxu1 %v4077_v35  ;;  %v4142_v35 = vld [vmem:[#allocation2 + $0x5d0] ss:$144 sps:$4 sm:$0xff]  }
 0x122   :  { %974 = vperm.xlu0 %4016, %v4620_v2   ;;  %773 = vmatpush1.bf16.msra.mxu0 %v4078_v36  ;;  %v4569_v36 = vmov 7  }
 0x123   :  { %594 = vmatprep.subr.bf16.mxu1 %v4081_v37  ;;  %1094 = vmatprep.subr.bf16.mxu0 %v4084_v38  ;;  %v4147_v37 = vld [vmem:[#allocation2 + $0x49c] ss:$144 sps:$4 sm:$0xff]   ;;  %v4150_v38 = vld [vmem:[#allocation2 + $0x4b4] ss:$144 sps:$4 sm:$0xff]  }
 0x124   :  { %461 = vmatmul.mubr.bf16.vlgmr.msra.gmra.mxu1 %v4677_v40  ;;  %4005 = vset.pattern.permute.xlu1 %v4568_v63 }
 0x125   :  { %791 = vmatmul.mubr.bf16.vlgmr.msra.gmra.mxu0 %v4677_v40  ;;  %595 = vmatpush1.bf16.msra.mxu1 %v4079_v39  ;;  %v4145_v39 = vld [vmem:[#allocation2 + $0x498] ss:$144 sps:$4 sm:$0xff]  }
 0x126   :  { %2875 = vperm.xlu0 %4016, %v4630_v4   ;;  %1095 = vmatpush1.bf16.msra.mxu0 %v4082_v41  ;;  %v4148_v41 = vld [vmem:[#allocation2 + $0x4b0] ss:$144 sps:$4 sm:$0xff]  }
 0x127   :  { %596 = vmatprep.subr.bf16.mxu1 %v4087_v42  ;;  %1096 = vmatprep.subr.bf16.mxu0 %v4090_v43  ;;  %v4153_v42 = vld [vmem:[#allocation2 + $0x37c] ss:$144 sps:$4 sm:$0xff]   ;;  %v4156_v43 = vld [vmem:[#allocation2 + $0x394] ss:$144 sps:$4 sm:$0xff]  }
 0x128   :  { %626 = vmatprep.mubr.bf16.mxu1 %v4560_v55  ;;  %1126 = vmatprep.mubr.bf16.mxu0 %v4560_v55 }
 0x129   :  { %597 = vmatpush1.bf16.msra.mxu1 %v4085_v44  ;;  %1474 = vperm.xlu1 %4005, %v4615_v1   ;;  %v4151_v44 = vld [vmem:[#allocation2 + $0x378] ss:$144 sps:$4 sm:$0xff]  }
 0x12a   :  { %4021 = vset.pattern.permute.xlu0 %v4562_v57  ;;  %1097 = vmatpush1.bf16.msra.mxu0 %v4088_v45  ;;  %v4154_v45 = vld [vmem:[#allocation2 + $0x390] ss:$144 sps:$4 sm:$0xff]  }
 0x12b   :  { %598 = vmatprep.subr.bf16.mxu1 %v4093_v47  ;;  %1098 = vmatprep.subr.bf16.mxu0 %v4096_v48  ;;  %v4159_v47 = vld [vmem:[#allocation2 + $0x25c] ss:$144 sps:$4 sm:$0xff]   ;;  %v4162_v48 = vld [vmem:[#allocation2 + $0x274] ss:$144 sps:$4 sm:$0xff]  }
 0x12c   :  { %2513 = vperm.xlu0 %4021, %v4630_v4  }
 0x12d   :  { %599 = vmatpush1.bf16.msra.mxu1 %v4091_v50  ;;  %4006 = vset.pattern.permute.xlu1 %v4569_v36  ;;  %v4157_v50 = vld [vmem:[#allocation2 + $0x258] ss:$144 sps:$4 sm:$0xff]  }
 0x12e   :  { %1099 = vmatpush1.bf16.msra.mxu0 %v4094_v51  ;;  %600 = vmatprep.subr.bf16.mxu1 %v4099_v53  ;;  %v4160_v51 = vld [vmem:[#allocation2 + $0x270] ss:$144 sps:$4 sm:$0xff]   ;;  %v4165_v53 = vld [vmem:[#allocation2 + $0x13c] ss:$144 sps:$4 sm:$0xff]   ;;  %v4211_v36 = vld [vmem:[#allocation2 + $0x148] ss:$144 sps:$4 sm:$0xff]  }
 0x12f   :  { %1100 = vmatprep.subr.bf16.mxu0 %v4102_v54  ;;  %1642 = vperm.xlu1 %4006, %v4615_v1   ;;  %v4168_v54 = vld [vmem:[#allocation2 + $0x154] ss:$144 sps:$4 sm:$0xff]  }
 0x130   :  { %2517 = vperm.xlu0 %4021, %v4635_v5  }
 0x131   :  { %601 = vmatpush1.bf16.msra.mxu1 %v4097_v58  ;;  %v4163_v58 = vld [vmem:[#allocation2 + $0x138] ss:$144 sps:$4 sm:$0xff]  }
 0x132   :  { %1101 = vmatpush1.bf16.msra.mxu0 %v4100_v60  ;;  %602 = vmatprep.subr.bf16.mxu1 %v4105_v61  ;;  %v4166_v60 = vld [vmem:[#allocation2 + $0x150] ss:$144 sps:$4 sm:$0xff]   ;;  %v4171_v61 = vld [vmem:[#allocation2 + $0x1c] ss:$144 sps:$4 sm:$0xff]  }
 0x133   :  { %1102 = vmatprep.subr.bf16.mxu0 %v4108_v62  ;;  %1646 = vperm.xlu1 %4006, %v4620_v2   ;;  %v4169_v62 = vld [vmem:[#allocation2 + $0x18] ss:$144 sps:$4 sm:$0xff]  }
 0x134   :  { %4023 = vset.pattern.permute.xlu0 %v4567_v52 }
 0x135   :  { %1306 = vperm.xlu0 %4023, %v4615_v1   ;;  %603 = vmatpush1.bf16.msra.mxu1 %v4103_v0  ;;  %v4172_v0 = vld [vmem:[#allocation2 + $0x30] ss:$144 sps:$4 sm:$0xff]  }
 0x136   :  { %1103 = vmatpush1.bf16.msra.mxu0 %v4106_v6  ;;  %604 = vmatprep.subr.bf16.mxu1 %v4111_v7  ;;  %v4177_v6 = vld [vmem:[#allocation2 + $0x80c] ss:$144 sps:$4 sm:$0xff]   ;;  %v4180_v7 = vld [vmem:[#allocation2 + $0x824] ss:$144 sps:$4 sm:$0xff]  }
 0x137   :  { %1104 = vmatprep.subr.bf16.mxu0 %v4114_v8  ;;  %4008 = vset.pattern.permute.xlu1 %v4561_v56  ;;  %v4174_v56 = vld [vmem:[#allocation2 + $0x34] ss:$144 sps:$4 sm:$0xff]   ;;  %v4175_v8 = vld [vmem:[#allocation2 + $0x808] ss:$144 sps:$4 sm:$0xff]  }
 0x138   :  { %1814 = vperm.xlu1 %4008, %v4620_v2  }
 0x139   :  { %3239 = vperm.xlu0 %4023, %v4625_v3   ;;  %605 = vmatpush1.bf16.msra.mxu1 %v4109_v9  ;;  %v4178_v9 = vld [vmem:[#allocation2 + $0x820] ss:$144 sps:$4 sm:$0xff]  }
 0x13a   :  { %1105 = vmatpush1.bf16.msra.mxu0 %v4112_v10  ;;  %606 = vmatprep.subr.bf16.mxu1 %v4117_v11  ;;  %v4186_v10 = vld [vmem:[#allocation2 + $0x704] ss:$144 sps:$4 sm:$0xff]   ;;  %v4181_v11 = vld [vmem:[#allocation2 + $0x6e8] ss:$144 sps:$4 sm:$0xff]  }
 0x13b   :  { %1106 = vmatprep.subr.bf16.mxu0 %v4120_v13  ;;  %v4184_v13 = vld [vmem:[#allocation2 + $0x700] ss:$144 sps:$4 sm:$0xff]  }
 0x13c   :  { %4009 = vset.pattern.permute.xlu1 %v4563_v59  ;;  %v4183_v59 = vld [vmem:[#allocation2 + $0x6ec] ss:$144 sps:$4 sm:$0xff]  }
 0x13d   :  { %4026 = vset.pattern.permute.xlu0 %v4568_v63  ;;  %607 = vmatpush1.bf16.msra.mxu1 %v4115_v14  ;;  %v4189_v14 = vld [vmem:[#allocation2 + $0x5cc] ss:$144 sps:$4 sm:$0xff]  }
 0x13e   :  { %1107 = vmatpush1.bf16.msra.mxu0 %v4118_v15  ;;  %608 = vmatprep.subr.bf16.mxu1 %v4123_v16  ;;  %v4192_v15 = vld [vmem:[#allocation2 + $0x5e4] ss:$144 sps:$4 sm:$0xff]   ;;  %v4187_v16 = vld [vmem:[#allocation2 + $0x5c8] ss:$144 sps:$4 sm:$0xff]  }
 0x13f   :  { %1108 = vmatprep.subr.bf16.mxu0 %v4126_v17  ;;  %1478 = vperm.xlu0 %4026, %v4620_v2   ;;  %v4190_v17 = vld [vmem:[#allocation2 + $0x5e0] ss:$144 sps:$4 sm:$0xff]  }
 0x140   :  { %1978 = vperm.xlu1 %4009, %v4615_v1  }
 0x141   :  { %609 = vmatpush1.bf16.msra.mxu1 %v4121_v18  ;;  %v4195_v18 = vld [vmem:[#allocation2 + $0x4ac] ss:$144 sps:$4 sm:$0xff]  }
 0x142   :  { %1109 = vmatpush1.bf16.msra.mxu0 %v4124_v20  ;;  %926 = vmatprep.subr.bf16.mxu1 %v4129_v21  ;;  %v4198_v20 = vld [vmem:[#allocation2 + $0x4c4] ss:$144 sps:$4 sm:$0xff]   ;;  %v4570_v21 = vmov 10  }
 0x143   :  { %1430 = vmatprep.subr.bf16.mxu0 %v4132_v22  ;;  %3427 = vperm.xlu0 %4026, %v4630_v4   ;;  %v4193_v22 = vld [vmem:[#allocation2 + $0x4a8] ss:$144 sps:$4 sm:$0xff]  }
 0x144   :  { %627 = vmatmul.mubr.bf16.vlgmr.msra.gmra.mxu1 %v4677_v40  ;;  %4012 = vset.pattern.permute.xlu1 %v4570_v21  ;;  %v4273_v21 = vld [vmem:[#allocation2 + $0x82c] ss:$144 sps:$4 sm:$0xff]  }
 0x145   :  { %1127 = vmatmul.mubr.bf16.vlgmr.msra.gmra.mxu0 %v4677_v40  ;;  %927 = vmatpush1.bf16.msra.mxu1 %v4127_v23  ;;  %v4196_v23 = vld [vmem:[#allocation2 + $0x4c0] ss:$144 sps:$4 sm:$0xff]  }
 0x146   :  { %1431 = vmatpush1.bf16.msra.mxu0 %v4130_v25  ;;  %928 = vmatprep.subr.bf16.mxu1 %v4135_v28  ;;  %v4201_v25 = vld [vmem:[#allocation2 + $0x38c] ss:$144 sps:$4 sm:$0xff]   ;;  %v4204_v28 = vld [vmem:[#allocation2 + $0x3a4] ss:$144 sps:$4 sm:$0xff]  }
 0x147   :  { %1432 = vmatprep.subr.bf16.mxu0 %v4138_v29  ;;  %958 = vmatprep.mubr.bf16.mxu1 %v4560_v55  ;;  %v4199_v29 = vld [vmem:[#allocation2 + $0x388] ss:$144 sps:$4 sm:$0xff]  }
 0x148   :  { %1462 = vmatprep.mubr.bf16.mxu0 %v4560_v55  ;;  %2146 = vperm.xlu1 %4012, %v4615_v1   ;;  %v4213_v1 = vld [vmem:[#allocation2 + $0x14c] ss:$144 sps:$4 sm:$0xff]  }
 0x149   :  { %929 = vmatpush1.bf16.msra.mxu1 %v4133_v30  ;;  %v4202_v30 = vld [vmem:[#allocation2 + $0x3a0] ss:$144 sps:$4 sm:$0xff]  }
 0x14a   :  { %1433 = vmatpush1.bf16.msra.mxu0 %v4136_v31  ;;  %930 = vmatprep.subr.bf16.mxu1 %v4141_v32  ;;  %v4207_v31 = vld [vmem:[#allocation2 + $0x26c] ss:$144 sps:$4 sm:$0xff]   ;;  %v4210_v32 = vld [vmem:[#allocation2 + $0x284] ss:$144 sps:$4 sm:$0xff]  }
 0x14b   :  { %1434 = vmatprep.subr.bf16.mxu0 %v4144_v33  ;;  %v4205_v33 = vld [vmem:[#allocation2 + $0x268] ss:$144 sps:$4 sm:$0xff]  }
 0x14c   :  { %2150 = vperm.xlu1 %4012, %v4620_v2   ;;  %v4214_v2 = vld [vmem:[#allocation2 + $0x160] ss:$144 sps:$4 sm:$0xff]  }
 0x14d   :  { %931 = vmatpush1.bf16.msra.mxu1 %v4139_v34  ;;  %v4208_v34 = vld [vmem:[#allocation2 + $0x280] ss:$144 sps:$4 sm:$0xff]  }
 0x14e   :  { %1435 = vmatpush1.bf16.msra.mxu0 %v4142_v35  ;;  %932 = vmatprep.subr.bf16.mxu1 %v4147_v37  ;;  %v4216_v35 = vld [vmem:[#allocation2 + $0x164] ss:$144 sps:$4 sm:$0xff]   ;;  %v4219_v37 = vld [vmem:[#allocation2 + $0x2c] ss:$144 sps:$4 sm:$0xff]  }
 0x14f   :  { %1436 = vmatprep.subr.bf16.mxu0 %v4150_v38  ;;  %v4222_v38 = vld [vmem:[#allocation2 + $0x44] ss:$144 sps:$4 sm:$0xff]  }
 0x150   :  { %4014 = vset.pattern.permute.xlu1 %v4560_v55 }
 0x151   :  { %933 = vmatpush1.bf16.msra.mxu1 %v4145_v39  ;;  %2334 = vperm.xlu1 %4014, %v4630_v4   ;;  %v4217_v39 = vld [vmem:[#allocation2 + $0x28] ss:$144 sps:$4 sm:$0xff]  }
 0x152   :  { %1437 = vmatpush1.bf16.msra.mxu0 %v4148_v41  ;;  %934 = vmatprep.subr.bf16.mxu1 %v4153_v42  ;;  %v4220_v41 = vld [vmem:[#allocation2 + $0x40] ss:$144 sps:$4 sm:$0xff]   ;;  %v4225_v42 = vld [vmem:[#allocation2 + $0x81c] ss:$144 sps:$4 sm:$0xff]  }
 0x153   :  { %1438 = vmatprep.subr.bf16.mxu0 %v4156_v43  ;;  %v4228_v43 = vld [vmem:[#allocation2 + $0x834] ss:$144 sps:$4 sm:$0xff]  }
 0x155   :  { %935 = vmatpush1.bf16.msra.mxu1 %v4151_v44  ;;  %4015 = vset.pattern.permute.xlu1 %v4564_v12  ;;  %v4223_v44 = vld [vmem:[#allocation2 + $0x818] ss:$144 sps:$4 sm:$0xff]  }
 0x156   :  { %1439 = vmatpush1.bf16.msra.mxu0 %v4154_v45  ;;  %936 = vmatprep.subr.bf16.mxu1 %v4159_v47  ;;  %v4226_v45 = vld [vmem:[#allocation2 + $0x830] ss:$144 sps:$4 sm:$0xff]   ;;  %v4231_v47 = vld [vmem:[#allocation2 + $0x6fc] ss:$144 sps:$4 sm:$0xff]  }
 0x157   :  { %1440 = vmatprep.subr.bf16.mxu0 %v4162_v48  ;;  %2687 = vperm.xlu1 %4015, %v4625_v3   ;;  %v4234_v48 = vld [vmem:[#allocation2 + $0x714] ss:$144 sps:$4 sm:$0xff]  }
 0x159   :  { %937 = vmatpush1.bf16.msra.mxu1 %v4157_v50  ;;  %v4229_v50 = vld [vmem:[#allocation2 + $0x6f8] ss:$144 sps:$4 sm:$0xff]  }
 0x15a   :  { %1441 = vmatpush1.bf16.msra.mxu0 %v4160_v51  ;;  %938 = vmatprep.subr.bf16.mxu1 %v4165_v53  ;;  %v4232_v51 = vld [vmem:[#allocation2 + $0x710] ss:$144 sps:$4 sm:$0xff]   ;;  %v4237_v53 = vld [vmem:[#allocation2 + $0x5dc] ss:$144 sps:$4 sm:$0xff]  }
 0x15b   :  { %1442 = vmatprep.subr.bf16.mxu0 %v4168_v54  ;;  %4017 = vset.pattern.permute.xlu1 %v4560_v55  ;;  %v4240_v54 = vld [vmem:[#allocation2 + $0x5f4] ss:$144 sps:$4 sm:$0xff]  }
 0x15c   :  { %2339 = vperm.xlu1 %4017, %v4635_v5  }
 0x15d   :  { %939 = vmatpush1.bf16.msra.mxu1 %v4163_v58  ;;  %v4235_v58 = vld [vmem:[#allocation2 + $0x5d8] ss:$144 sps:$4 sm:$0xff]  }
 0x15e   :  { %1443 = vmatpush1.bf16.msra.mxu0 %v4166_v60  ;;  %940 = vmatprep.subr.bf16.mxu1 %v4171_v61  ;;  %v4238_v60 = vld [vmem:[#allocation2 + $0x5f0] ss:$144 sps:$4 sm:$0xff]   ;;  %v4243_v61 = vld [vmem:[#allocation2 + $0x4bc] ss:$144 sps:$4 sm:$0xff]  }
 0x15f   :  { %1444 = vmatprep.subr.bf16.mxu0 %v4174_v56  ;;  %v4246_v56 = vld [vmem:[#allocation2 + $0x4d4] ss:$144 sps:$4 sm:$0xff]  }
 0x160   :  { %4018 = vset.pattern.permute.xlu1 %v4562_v57  ;;  %v4250_v57 = vld [vmem:[#allocation2 + $0x3b0] ss:$144 sps:$4 sm:$0xff]  }
 0x161   :  { %941 = vmatpush1.bf16.msra.mxu1 %v4169_v62  ;;  %2509 = vperm.xlu1 %4018, %v4625_v3   ;;  %v4241_v62 = vld [vmem:[#allocation2 + $0x4b8] ss:$144 sps:$4 sm:$0xff]  }
 0x162   :  { %1445 = vmatpush1.bf16.msra.mxu0 %v4172_v0  ;;  %1262 = vmatprep.subr.bf16.mxu1 %v4177_v6  ;;  %v4244_v0 = vld [vmem:[#allocation2 + $0x4d0] ss:$144 sps:$4 sm:$0xff]   ;;  %v4249_v6 = vld [vmem:[#allocation2 + $0x39c] ss:$144 sps:$4 sm:$0xff]  }
 0x163   :  { %1766 = vmatprep.subr.bf16.mxu0 %v4180_v7  ;;  %v4252_v7 = vld [vmem:[#allocation2 + $0x3b4] ss:$144 sps:$4 sm:$0xff]  }
 0x164   :  { %959 = vmatmul.mubr.bf16.vlgmr.msra.gmra.mxu1 %v4677_v40 }
 0x165   :  { %1463 = vmatmul.mubr.bf16.vlgmr.msra.gmra.mxu0 %v4677_v40  ;;  %1263 = vmatpush1.bf16.msra.mxu1 %v4175_v8  ;;  %v4247_v8 = vld [vmem:[#allocation2 + $0x398] ss:$144 sps:$4 sm:$0xff]  }
 0x166   :  { %1767 = vmatpush1.bf16.msra.mxu0 %v4178_v9  ;;  %1264 = vmatprep.subr.bf16.mxu1 %v4183_v59  ;;  %v4255_v9 = vld [vmem:[#allocation2 + $0x27c] ss:$144 sps:$4 sm:$0xff]   ;;  %v4258_v59 = vld [vmem:[#allocation2 + $0x294] ss:$144 sps:$4 sm:$0xff]  }
 0x167   :  { %1768 = vmatprep.subr.bf16.mxu0 %v4186_v10  ;;  %1294 = vmatprep.mubr.bf16.mxu1 %v4560_v55  ;;  %v4253_v10 = vld [vmem:[#allocation2 + $0x278] ss:$144 sps:$4 sm:$0xff]  }
 0x168   :  { %1798 = vmatprep.mubr.bf16.mxu0 %v4560_v55  ;;  %4019 = vset.pattern.permute.xlu1 %v4564_v12  ;;  %v4264_v12 = vld [vmem:[#allocation2 + $0x174] ss:$144 sps:$4 sm:$0xff]  }
 0x169   :  { %1265 = vmatpush1.bf16.msra.mxu1 %v4181_v11  ;;  %2695 = vperm.xlu1 %4019, %v4635_v5   ;;  %v4256_v11 = vld [vmem:[#allocation2 + $0x290] ss:$144 sps:$4 sm:$0xff]  }
 0x16a   :  { %1769 = vmatpush1.bf16.msra.mxu0 %v4184_v13  ;;  %1266 = vmatprep.subr.bf16.mxu1 %v4189_v14  ;;  %v4261_v13 = vld [vmem:[#allocation2 + $0x15c] ss:$144 sps:$4 sm:$0xff]   ;;  %v4259_v14 = vld [vmem:[#allocation2 + $0x158] ss:$144 sps:$4 sm:$0xff]  }
 0x16b   :  { %1770 = vmatprep.subr.bf16.mxu0 %v4192_v15  ;;  %v4262_v15 = vld [vmem:[#allocation2 + $0x170] ss:$144 sps:$4 sm:$0xff]  }
 0x16d   :  { %1267 = vmatpush1.bf16.msra.mxu1 %v4187_v16  ;;  %4020 = vset.pattern.permute.xlu1 %v4565_v19  ;;  %v4267_v16 = vld [vmem:[#allocation2 + $0x3c] ss:$144 sps:$4 sm:$0xff]  }
 0x16e   :  { %1771 = vmatpush1.bf16.msra.mxu0 %v4190_v17  ;;  %1268 = vmatprep.subr.bf16.mxu1 %v4195_v18  ;;  %v4270_v17 = vld [vmem:[#allocation2 + $0x54] ss:$144 sps:$4 sm:$0xff]   ;;  %v4265_v18 = vld [vmem:[#allocation2 + $0x38] ss:$144 sps:$4 sm:$0xff]  }
 0x16f   :  { %1772 = vmatprep.subr.bf16.mxu0 %v4198_v20  ;;  %2871 = vperm.xlu1 %4020, %v4625_v3   ;;  %v4268_v20 = vld [vmem:[#allocation2 + $0x50] ss:$144 sps:$4 sm:$0xff]  }
 0x171   :  { %1269 = vmatpush1.bf16.msra.mxu1 %v4193_v22  ;;  %v4276_v22 = vld [vmem:[#allocation2 + $0x844] ss:$144 sps:$4 sm:$0xff]  }
 0x172   :  { %1773 = vmatpush1.bf16.msra.mxu0 %v4196_v23  ;;  %1270 = vmatprep.subr.bf16.mxu1 %v4201_v25  ;;  %v4271_v23 = vld [vmem:[#allocation2 + $0x828] ss:$144 sps:$4 sm:$0xff]   ;;  %v4274_v25 = vld [vmem:[#allocation2 + $0x840] ss:$144 sps:$4 sm:$0xff]  }
 0x173   :  { %1774 = vmatprep.subr.bf16.mxu0 %v4204_v28  ;;  %4022 = vset.pattern.permute.xlu1 %v4566_v27  ;;  %v4279_v28 = vld [vmem:[#allocation2 + $0x70c] ss:$144 sps:$4 sm:$0xff]  }
 0x174   :  { %3055 = vperm.xlu1 %4022, %v4625_v3  }
 0x175   :  { %1271 = vmatpush1.bf16.msra.mxu1 %v4199_v29  ;;  %v4282_v29 = vld [vmem:[#allocation2 + $0x724] ss:$144 sps:$4 sm:$0xff]  }
 0x176   :  { %1775 = vmatpush1.bf16.msra.mxu0 %v4202_v30  ;;  %1272 = vmatprep.subr.bf16.mxu1 %v4207_v31  ;;  %v4277_v30 = vld [vmem:[#allocation2 + $0x708] ss:$144 sps:$4 sm:$0xff]   ;;  %v4280_v31 = vld [vmem:[#allocation2 + $0x720] ss:$144 sps:$4 sm:$0xff]  }
 0x177   :  { %1776 = vmatprep.subr.bf16.mxu0 %v4210_v32  ;;  %v4285_v32 = vld [vmem:[#allocation2 + $0x5ec] ss:$144 sps:$4 sm:$0xff]  }
 0x178   :  { %3059 = vperm.xlu1 %4022, %v4630_v4  }
 0x179   :  { %1273 = vmatpush1.bf16.msra.mxu1 %v4205_v33  ;;  %v4288_v33 = vld [vmem:[#allocation2 + $0x604] ss:$144 sps:$4 sm:$0xff]  }
 0x17a   :  { %1777 = vmatpush1.bf16.msra.mxu0 %v4208_v34  ;;  %1274 = vmatprep.subr.bf16.mxu1 %v4213_v1  ;;  %v4283_v34 = vld [vmem:[#allocation2 + $0x5e8] ss:$144 sps:$4 sm:$0xff]   ;;  %v4286_v1 = vld [vmem:[#allocation2 + $0x600] ss:$144 sps:$4 sm:$0xff]  }
 0x17b   :  { %1778 = vmatprep.subr.bf16.mxu0 %v4216_v35  ;;  %v4291_v35 = vld [vmem:[#allocation2 + $0x4cc] ss:$144 sps:$4 sm:$0xff]  }
 0x17c   :  { %4024 = vset.pattern.permute.xlu1 %v4565_v19  ;;  %v4295_v19 = vld [vmem:[#allocation2 + $0x3a8] ss:$144 sps:$4 sm:$0xff]  }
 0x17d   :  { %1275 = vmatpush1.bf16.msra.mxu1 %v4211_v36  ;;  %v4294_v36 = vld [vmem:[#allocation2 + $0x4e4] ss:$144 sps:$4 sm:$0xff]   ;;  %2879 = vperm.xlu1 %4024, %v4635_v5  }
 0x17e   :  { %1779 = vmatpush1.bf16.msra.mxu0 %v4214_v2  ;;  %1276 = vmatprep.subr.bf16.mxu1 %v4219_v37  ;;  %v4289_v2 = vld [vmem:[#allocation2 + $0x4c8] ss:$144 sps:$4 sm:$0xff]   ;;  %v4292_v37 = vld [vmem:[#allocation2 + $0x4e0] ss:$144 sps:$4 sm:$0xff]  }
 0x17f   :  { %1780 = vmatprep.subr.bf16.mxu0 %v4222_v38  ;;  %v4297_v38 = vld [vmem:[#allocation2 + $0x3ac] ss:$144 sps:$4 sm:$0xff]  }
 0x181   :  { %1277 = vmatpush1.bf16.msra.mxu1 %v4217_v39  ;;  %v4300_v39 = vld [vmem:[#allocation2 + $0x3c4] ss:$144 sps:$4 sm:$0xff]   ;;  %4025 = vset.pattern.permute.xlu1 %v4566_v27 }
 0x182   :  { %1781 = vmatpush1.bf16.msra.mxu0 %v4220_v41  ;;  %1598 = vmatprep.subr.bf16.mxu1 %v4225_v42  ;;  %v4298_v41 = vld [vmem:[#allocation2 + $0x3c0] ss:$144 sps:$4 sm:$0xff]   ;;  %v4303_v42 = vld [vmem:[#allocation2 + $0x28c] ss:$144 sps:$4 sm:$0xff]   ;;  %v4312_v27 = vld [vmem:[#allocation2 + $0x184] ss:$144 sps:$4 sm:$0xff]  }
 0x183   :  { %2102 = vmatprep.subr.bf16.mxu0 %v4228_v43  ;;  %3063 = vperm.xlu1 %4025, %v4635_v5   ;;  %v4306_v43 = vld [vmem:[#allocation2 + $0x2a4] ss:$144 sps:$4 sm:$0xff]  }
 0x184   :  { %1295 = vmatmul.mubr.bf16.vlgmr.msra.gmra.mxu1 %v4677_v40 }
 0x185   :  { %1799 = vmatmul.mubr.bf16.vlgmr.msra.gmra.mxu0 %v4677_v40  ;;  %1599 = vmatpush1.bf16.msra.mxu1 %v4223_v44  ;;  %v4301_v44 = vld [vmem:[#allocation2 + $0x288] ss:$144 sps:$4 sm:$0xff]  }
 0x186   :  { %2103 = vmatpush1.bf16.msra.mxu0 %v4226_v45  ;;  %1600 = vmatprep.subr.bf16.mxu1 %v4231_v47  ;;  %v4304_v45 = vld [vmem:[#allocation2 + $0x2a0] ss:$144 sps:$4 sm:$0xff]   ;;  %v4309_v47 = vld [vmem:[#allocation2 + $0x16c] ss:$144 sps:$4 sm:$0xff]  }
 0x187   :  { %2104 = vmatprep.subr.bf16.mxu0 %v4234_v48  ;;  %1630 = vmatprep.mubr.bf16.mxu1 %v4560_v55  ;;  %v4307_v48 = vld [vmem:[#allocation2 + $0x168] ss:$144 sps:$4 sm:$0xff]  }
 0x188   :  { %2134 = vmatprep.mubr.bf16.mxu0 %v4560_v55  ;;  %4027 = vset.pattern.permute.xlu1 %v4567_v52 }
 0x189   :  { %1601 = vmatpush1.bf16.msra.mxu1 %v4229_v50  ;;  %3243 = vperm.xlu1 %4027, %v4630_v4   ;;  %v4310_v50 = vld [vmem:[#allocation2 + $0x180] ss:$144 sps:$4 sm:$0xff]   ;;  %v4324_v4 = vld [vmem:[#allocation2 + $0x854] ss:$144 sps:$4 sm:$0xff]  }
 0x18a   :  { %2105 = vmatpush1.bf16.msra.mxu0 %v4232_v51  ;;  %1602 = vmatprep.subr.bf16.mxu1 %v4237_v53  ;;  %v4315_v51 = vld [vmem:[#allocation2 + $0x4c] ss:$144 sps:$4 sm:$0xff]   ;;  %v4318_v53 = vld [vmem:[#allocation2 + $0x64] ss:$144 sps:$4 sm:$0xff]  }
 0x18b   :  { %2106 = vmatprep.subr.bf16.mxu0 %v4240_v54  ;;  %v4313_v54 = vld [vmem:[#allocation2 + $0x48] ss:$144 sps:$4 sm:$0xff]  }
 0x18d   :  { %1603 = vmatpush1.bf16.msra.mxu1 %v4235_v58  ;;  %4028 = vset.pattern.permute.xlu1 %v4568_v63  ;;  %v4316_v58 = vld [vmem:[#allocation2 + $0x60] ss:$144 sps:$4 sm:$0xff]  }
 0x18e   :  { %2107 = vmatpush1.bf16.msra.mxu0 %v4238_v60  ;;  %1604 = vmatprep.subr.bf16.mxu1 %v4243_v61  ;;  %v4321_v60 = vld [vmem:[#allocation2 + $0x83c] ss:$144 sps:$4 sm:$0xff]   ;;  %v4319_v61 = vld [vmem:[#allocation2 + $0x838] ss:$144 sps:$4 sm:$0xff]  }
 0x18f   :  { %2108 = vmatprep.subr.bf16.mxu0 %v4246_v56  ;;  %3423 = vperm.xlu1 %4028, %v4625_v3   ;;  %v4322_v56 = vld [vmem:[#allocation2 + $0x850] ss:$144 sps:$4 sm:$0xff]   ;;  %v4325_v3 = vld [vmem:[#allocation2 + $0x718] ss:$144 sps:$4 sm:$0xff]  }
 0x191   :  { %1605 = vmatpush1.bf16.msra.mxu1 %v4241_v62  ;;  %v4327_v62 = vld [vmem:[#allocation2 + $0x71c] ss:$144 sps:$4 sm:$0xff]  }
 0x192   :  { %2109 = vmatpush1.bf16.msra.mxu0 %v4244_v0  ;;  %1606 = vmatprep.subr.bf16.mxu1 %v4249_v6  ;;  %v4330_v0 = vld [vmem:[#allocation2 + $0x734] ss:$144 sps:$4 sm:$0xff]   ;;  %v4328_v6 = vld [vmem:[#allocation2 + $0x730] ss:$144 sps:$4 sm:$0xff]  }
 0x193   :  { %2110 = vmatprep.subr.bf16.mxu0 %v4252_v7  ;;  %4029 = vset.pattern.permute.xlu1 %v4567_v52  ;;  %v4777_v7 = vpop.permute.xlu0 %1810  ;;  %v4333_v52 = vld [vmem:[#allocation2 + $0x5fc] ss:$144 sps:$4 sm:$0xff]  }
 0x194   :  { %3247 = vperm.xlu1 %4029, %v4635_v5  }
 0x195   :  { %1607 = vmatpush1.bf16.msra.mxu1 %v4247_v8  ;;  %v4336_v8 = vld [vmem:[#allocation2 + $0x614] ss:$144 sps:$4 sm:$0xff]  }
 0x196   :  { %2111 = vmatpush1.bf16.msra.mxu0 %v4250_v57  ;;  %1608 = vmatprep.subr.bf16.mxu1 %v4255_v9  ;;  %v4334_v57 = vld [vmem:[#allocation2 + $0x610] ss:$144 sps:$4 sm:$0xff]   ;;  %v4339_v9 = vld [vmem:[#allocation2 + $0x4dc] ss:$144 sps:$4 sm:$0xff]  }
 0x197   :  { %2112 = vmatprep.subr.bf16.mxu0 %v4258_v59  ;;  %v4342_v59 = vld [vmem:[#allocation2 + $0x4f4] ss:$144 sps:$4 sm:$0xff]  }
 0x198   :  { %4030 = vset.pattern.permute.xlu1 %v4568_v63  ;;  %v4345_v63 = vld [vmem:[#allocation2 + $0x3bc] ss:$144 sps:$4 sm:$0xff]  }
 0x199   :  { %1609 = vmatpush1.bf16.msra.mxu1 %v4253_v10  ;;  %v4782_v10 = vpop.permute.xlu0 %1982  ;;  %3431 = vperm.xlu1 %4030, %v4635_v5   ;;  %v4351_v5 = vld [vmem:[#allocation2 + $0x29c] ss:$144 sps:$4 sm:$0xff]  }
 0x19a   :  { %2113 = vmatpush1.bf16.msra.mxu0 %v4256_v11  ;;  %1610 = vmatprep.subr.bf16.mxu1 %v4261_v13  ;;  %v4337_v11 = vld [vmem:[#allocation2 + $0x4d8] ss:$144 sps:$4 sm:$0xff]   ;;  %v4340_v13 = vld [vmem:[#allocation2 + $0x4f0] ss:$144 sps:$4 sm:$0xff]  }
 0x19b   :  { %2114 = vmatprep.subr.bf16.mxu0 %v4264_v12  ;;  %v4348_v12 = vld [vmem:[#allocation2 + $0x3d4] ss:$144 sps:$4 sm:$0xff]  }
 0x19d   :  { %1611 = vmatpush1.bf16.msra.mxu1 %v4259_v14  ;;  %v4343_v14 = vld [vmem:[#allocation2 + $0x3b8] ss:$144 sps:$4 sm:$0xff]  }
 0x19e   :  { %2115 = vmatpush1.bf16.msra.mxu0 %v4262_v15  ;;  %1612 = vmatprep.subr.bf16.mxu1 %v4267_v16  ;;  %v4346_v15 = vld [vmem:[#allocation2 + $0x3d0] ss:$144 sps:$4 sm:$0xff]   ;;  %v4787_v16 = vpop.permute.xlu0 %473 }
 0x19f   :  { %2116 = vmatprep.subr.bf16.mxu0 %v4270_v17  ;;  %v4354_v17 = vld [vmem:[#allocation2 + $0x2b4] ss:$144 sps:$4 sm:$0xff]  }
 0x1a1   :  { %1613 = vmatpush1.bf16.msra.mxu1 %v4265_v18  ;;  %v338_v18 = vlaneseq }
 0x1a2   :  { %2117 = vmatpush1.bf16.msra.mxu0 %v4268_v20  ;;  %1934 = vmatprep.subr.bf16.mxu1 %v4273_v21  ;;  %v4349_v20 = vld [vmem:[#allocation2 + $0x298] ss:$144 sps:$4 sm:$0xff]   ;;  %v4352_v21 = vld [vmem:[#allocation2 + $0x2b0] ss:$144 sps:$4 sm:$0xff]  }
 0x1a3   :  { %2457 = vmatprep.subr.bf16.mxu0 %v4276_v22  ;;  %v4357_v22 = vld [vmem:[#allocation2 + $0x17c] ss:$144 sps:$4 sm:$0xff]  }
 0x1a4   :  { %1631 = vmatmul.mubr.bf16.vlgmr.msra.gmra.mxu1 %v4677_v40 }
 0x1a5   :  { %2135 = vmatmul.mubr.bf16.vlgmr.msra.gmra.mxu0 %v4677_v40  ;;  %1935 = vmatpush1.bf16.msra.mxu1 %v4271_v23  ;;  %v4360_v23 = vld [vmem:[#allocation2 + $0x194] ss:$144 sps:$4 sm:$0xff]  }
 0x1a6   :  { %2458 = vmatpush1.bf16.msra.mxu0 %v4274_v25  ;;  %1936 = vmatprep.subr.bf16.mxu1 %v4279_v28  ;;  %v4789_v25 = vpop.permute.xlu0 %478  ;;  %v4791_v28 = vshrl.u32 %v338_v18, 7  ;;  %v4382_v18 = vld [vmem:[#allocation2 + $0x620] ss:$144 sps:$4 sm:$0xff]  }
 0x1a7   :  { %2459 = vmatprep.subr.bf16.mxu0 %v4282_v29  ;;  %1966 = vmatprep.mubr.bf16.mxu1 %v4560_v55  ;;  %v4355_v29 = vld [vmem:[#allocation2 + $0x178] ss:$144 sps:$4 sm:$0xff]  }
 0x1a8   :  { %2489 = vmatprep.mubr.bf16.mxu0 %v4560_v55 }
 0x1a9   :  { %1937 = vmatpush1.bf16.msra.mxu1 %v4277_v30  ;;  %v4358_v30 = vld [vmem:[#allocation2 + $0x190] ss:$144 sps:$4 sm:$0xff]  }
 0x1aa   :  { %2460 = vmatpush1.bf16.msra.mxu0 %v4280_v31  ;;  %1938 = vmatprep.subr.bf16.mxu1 %v4285_v32  ;;  %v4363_v31 = vld [vmem:[#allocation2 + $0x5c] ss:$144 sps:$4 sm:$0xff]   ;;  %v4366_v32 = vld [vmem:[#allocation2 + $0x74] ss:$144 sps:$4 sm:$0xff]  }
 0x1ab   :  { %2461 = vmatprep.subr.bf16.mxu0 %v4288_v33  ;;  %v4361_v33 = vld [vmem:[#allocation2 + $0x58] ss:$144 sps:$4 sm:$0xff]  }
 0x1ad   :  { %1939 = vmatpush1.bf16.msra.mxu1 %v4283_v34  ;;  %v4364_v34 = vld [vmem:[#allocation2 + $0x70] ss:$144 sps:$4 sm:$0xff]  }
 0x1ae   :  { %2462 = vmatpush1.bf16.msra.mxu0 %v4286_v1  ;;  %1940 = vmatprep.subr.bf16.mxu1 %v4291_v35  ;;  %v4794_v1 = vsub.s32 0, %v4791_v28  ;;  %v4796_v35 = vpop.permute.xlu1 %638 }
 0x1af   :  { %2463 = vmatprep.subr.bf16.mxu0 %v4294_v36  ;;  %v4798_v36 = vpop.permute.xlu0 %2329 }
 0x1b1   :  { %1941 = vmatpush1.bf16.msra.mxu1 %v4289_v2  ;;  %v336_v2 = vld [vmem:[#allocation7] ss:$8 sm:$0x3] }
 0x1b2   :  { %2464 = vmatpush1.bf16.msra.mxu0 %v4292_v37  ;;  %1942 = vmatprep.subr.bf16.mxu1 %v4297_v38  ;;  %v666_v37 = vld [vmem:[#allocation7 + $0x2] ss:$8 sm:$0x3]  ;;  %v4369_v38 = vld [vmem:[#allocation2 + $0x84c] ss:$144 sps:$4 sm:$0xff]  }
 0x1b3   :  { %2465 = vmatprep.subr.bf16.mxu0 %v4300_v39  ;;  %v4372_v39 = vld [vmem:[#allocation2 + $0x864] ss:$144 sps:$4 sm:$0xff]  }
 0x1b5   :  { %1943 = vmatpush1.bf16.msra.mxu1 %v4295_v19  ;;  %v4801_v19 = vsub.s32 1, %v4791_v28 }
 0x1b6   :  { %2466 = vmatpush1.bf16.msra.mxu0 %v4298_v41  ;;  %1944 = vmatprep.subr.bf16.mxu1 %v4303_v42  ;;  %v341_v41 = vrot.slane %v336_v2, %v4794_v1  ;;  %v671_v42 = vrot.slane %v666_v37, %v4794_v1 }
 0x1b7   :  { %2467 = vmatprep.subr.bf16.mxu0 %v4306_v43  ;;  %v4367_v43 = vld [vmem:[#allocation2 + $0x848] ss:$144 sps:$4 sm:$0xff]  }
 0x1b9   :  { %1945 = vmatpush1.bf16.msra.mxu1 %v4301_v44  ;;  %v4370_v44 = vld [vmem:[#allocation2 + $0x860] ss:$144 sps:$4 sm:$0xff]  }
 0x1ba   :  { %2468 = vmatpush1.bf16.msra.mxu0 %v4304_v45  ;;  %1946 = vmatprep.subr.bf16.mxu1 %v4309_v47  ;;  %v4375_v45 = vld [vmem:[#allocation2 + $0x72c] ss:$144 sps:$4 sm:$0xff]   ;;  %v4378_v47 = vld [vmem:[#allocation2 + $0x744] ss:$144 sps:$4 sm:$0xff]  }
 0x1bb   :  { %2469 = vmatprep.subr.bf16.mxu0 %v4312_v27  ;;  %v4805_v27 = vpop.permute.xlu1 %642 }
 0x1bd   :  { %1947 = vmatpush1.bf16.msra.mxu1 %v4307_v48  ;;  %v345_v48 = vrot.slane %v336_v2, %v4801_v19  ;;  %v4388_v2 = vld [vmem:[#allocation2 + $0x500] ss:$144 sps:$4 sm:$0xff]  }
 0x1be   :  { %2470 = vmatpush1.bf16.msra.mxu0 %v4310_v50  ;;  %1948 = vmatprep.subr.bf16.mxu1 %v4315_v51  ;;  %v675_v50 = vrot.slane %v666_v37, %v4801_v19  ;;  %v803_v51 = vpop.permute.xlu0 %802  ;;  %v4393_v37 = vld [vmem:[#allocation2 + $0x3cc] ss:$144 sps:$4 sm:$0xff]  }
 0x1bf   :  { %2471 = vmatprep.subr.bf16.mxu0 %v4318_v53 }
 0x1c1   :  { %1949 = vmatpush1.bf16.msra.mxu1 %v4313_v54 }
 0x1c2   :  { %2472 = vmatpush1.bf16.msra.mxu0 %v4316_v58  ;;  %2276 = vmatprep.subr.bf16.mxu1 %v4321_v60 }
 0x1c3   :  { %2819 = vmatprep.subr.bf16.mxu0 %v4324_v4  ;;  %v4373_v4 = vld [vmem:[#allocation2 + $0x728] ss:$144 sps:$4 sm:$0xff]  }
 0x1c4   :  { %1967 = vmatmul.mubr.bf16.vlgmr.msra.gmra.mxu1 %v4677_v40  ;;  %v4331_v40 = vld [vmem:[#allocation2 + $0x5f8] ss:$144 sps:$4 sm:$0xff]  }
 0x1c5   :  { %2490 = vmatmul.mubr.bf16.vlgmr.msra.gmra.mxu0 %v4681_v49  ;;  %2277 = vmatpush1.bf16.msra.mxu1 %v4319_v61 }
 0x1c6   :  { %2820 = vmatpush1.bf16.msra.mxu0 %v4322_v56  ;;  %2278 = vmatprep.subr.bf16.mxu1 %v4327_v62  ;;  %v4376_v62 = vld [vmem:[#allocation2 + $0x740] ss:$144 sps:$4 sm:$0xff]  }
 0x1c7   :  { %2821 = vmatprep.subr.bf16.mxu0 %v4330_v0  ;;  %2499 = vmatprep.mubr.bf16.mxu0 %v4560_v55  ;;  %v4381_v0 = vld [vmem:[#allocation2 + $0x60c] ss:$144 sps:$4 sm:$0xff]  }
 0x1c8   :  { %2308 = vmatprep.mubr.bf16.mxu1 %v4560_v55 }
 0x1c9   :  { %2279 = vmatpush1.bf16.msra.mxu1 %v4325_v3 }
 0x1ca   :  { %2822 = vmatpush1.bf16.msra.mxu0 %v4328_v6  ;;  %2280 = vmatprep.subr.bf16.mxu1 %v4333_v52 }
 0x1cb   :  { %2823 = vmatprep.subr.bf16.mxu0 %v4336_v8 }
 0x1cd   :  { %2500 = vmatmul.mubr.bf16.gmra.mxu0 %v4679_v46  ;;  %2281 = vmatpush1.bf16.msra.mxu1 %v4331_v40  ;;  %v4384_v40 = vld [vmem:[#allocation2 + $0x624] ss:$144 sps:$4 sm:$0xff]  }
 0x1ce   :  { %2824 = vmatpush1.bf16.msra.mxu0 %v4334_v57  ;;  %2282 = vmatprep.subr.bf16.mxu1 %v4339_v9 }
 0x1cf   :  { %2825 = vmatprep.subr.bf16.mxu0 %v4342_v59  ;;  %2851 = vmatprep.mubr.bf16.mxu0 %v4560_v55 }
 0x1d1   :  { %2283 = vmatpush1.bf16.msra.mxu1 %v4337_v11 }
 0x1d2   :  { %2826 = vmatpush1.bf16.msra.mxu0 %v4340_v13  ;;  %2284 = vmatprep.subr.bf16.mxu1 %v4345_v63 }
 0x1d3   :  { %2827 = vmatprep.subr.bf16.mxu0 %v4348_v12  ;;  %v807_v12 = vpop.permute.xlu1 %806 }
 0x1d5   :  { %2285 = vmatpush1.bf16.msra.mxu1 %v4343_v14  ;;  %v4379_v14 = vld [vmem:[#allocation2 + $0x608] ss:$144 sps:$4 sm:$0xff]  }
 0x1d6   :  { %2828 = vmatpush1.bf16.msra.mxu0 %v4346_v15  ;;  %2286 = vmatprep.subr.bf16.mxu1 %v4351_v5 }
 0x1d7   :  { %2829 = vmatprep.subr.bf16.mxu0 %v4354_v17 }
 0x1d9   :  { %2287 = vmatpush1.bf16.msra.mxu1 %v4349_v20  ;;  %v4387_v20 = vld [vmem:[#allocation2 + $0x4ec] ss:$144 sps:$4 sm:$0xff]  }
 0x1da   :  { %2830 = vmatpush1.bf16.msra.mxu0 %v4352_v21  ;;  %2288 = vmatprep.subr.bf16.mxu1 %v4357_v22 }
 0x1db   :  { %2831 = vmatprep.subr.bf16.mxu0 %v4360_v23 }
 0x1dd   :  { %2289 = vmatpush1.bf16.msra.mxu1 %v4355_v29  ;;  %v4390_v29 = vld [vmem:[#allocation2 + $0x504] ss:$144 sps:$4 sm:$0xff]  }
 0x1de   :  { %2832 = vmatpush1.bf16.msra.mxu0 %v4358_v30  ;;  %2290 = vmatprep.subr.bf16.mxu1 %v4363_v31 }
 0x1df   :  { %2833 = vmatprep.subr.bf16.mxu0 %v4366_v32 }
 0x1e1   :  { %2291 = vmatpush1.bf16.msra.mxu1 %v4361_v33  ;;  %v4385_v33 = vld [vmem:[#allocation2 + $0x4e8] ss:$144 sps:$4 sm:$0xff]  }
 0x1e2   :  { %2834 = vmatpush1.bf16.msra.mxu0 %v4364_v34  ;;  %2635 = vmatprep.subr.bf16.mxu1 %v4369_v38 }
 0x1e3   :  { %3187 = vmatprep.subr.bf16.mxu0 %v4372_v39  ;;  %v4396_v39 = vld [vmem:[#allocation2 + $0x3e4] ss:$144 sps:$4 sm:$0xff]  }
 0x1e4   :  { %v462_v53 = vpop.f32.mrf.mxu1  ;;  %2309 = vmatmul.mubr.bf16.vlgmr.msra.gmra.mxu1 %v4681_v49 }
 0x1e5   :  { %v792_v54 = vpop.f32.mrf.mxu0  ;;  %2852 = vmatmul.mubr.bf16.vlgmr.msra.gmra.mxu0 %v4681_v49  ;;  %v463_v58 = vadd.f32 %v462_v53, %v341_v41  ;;  %2636 = vmatpush1.bf16.msra.mxu1 %v4367_v43  ;;  %v4402_v43 = vld [vmem:[#allocation2 + $0x2c4] ss:$144 sps:$4 sm:$0xff]   ;;  %v4411_v53 = vld [vmem:[#allocation2 + $0x6c] ss:$144 sps:$4 sm:$0xff]  }
 0x1e6   :  { %v793_v60 = vadd.f32 %v792_v54, %v671_v42  ;;  %3188 = vmatpush1.bf16.msra.mxu0 %v4370_v44  ;;  %v464_v61 = vpop.f32.mrf.mxu1  ;;  %2637 = vmatprep.subr.bf16.mxu1 %v4375_v45  ;;  %v4397_v44 = vld [vmem:[#allocation2 + $0x2a8] ss:$144 sps:$4 sm:$0xff]   ;;  %v4400_v45 = vld [vmem:[#allocation2 + $0x2c0] ss:$144 sps:$4 sm:$0xff]   ;;  %v4414_v54 = vld [vmem:[#allocation2 + $0x84] ss:$144 sps:$4 sm:$0xff]  }
 0x1e7   :  { %v794_v56 = vpop.f32.mrf.mxu0  ;;  %3189 = vmatprep.subr.bf16.mxu0 %v4378_v47  ;;  %v481_v3 = vmul.f32 %v4787_v16, %v463_v58  ;;  %v465_v6 = vadd.f32 %v464_v61, %v345_v48  ;;  %2318 = vmatprep.mubr.bf16.mxu1 %v4560_v55  ;;  %v4405_v47 = vld [vmem:[#allocation2 + $0x18c] ss:$144 sps:$4 sm:$0xff]   ;;  %v4409_v58 = vld [vmem:[#allocation2 + $0x68] ss:$144 sps:$4 sm:$0xff]  }
 0x1e8   :  { %v795_v52 = vadd.f32 %v794_v56, %v675_v50  ;;  %v809_v8 = vmul.f32 %v803_v51, %v793_v60  ;;  %v466_v57 = vpop.f32.mrf.mxu1  ;;  %2861 = vmatprep.mubr.bf16.mxu0 %v4560_v55  ;;  %v4412_v60 = vld [vmem:[#allocation2 + $0x80] ss:$144 sps:$4 sm:$0xff]   ;;  %v1002_v61 = vld [vmem:[#allocation7 + $0x4] ss:$8 sm:$0x3] }
 0x1e9   :  { %v796_v9 = vpop.f32.mrf.mxu0  ;;  %v482_v59 = vmul.f32 %v4787_v16, %v465_v6  ;;  %v467_v63 = vadd.f32 %v466_v57, %v341_v41  ;;  %2638 = vmatpush1.bf16.msra.mxu1 %v4373_v4  ;;  %v4391_v41 = vld [vmem:[#allocation2 + $0x3c8] ss:$144 sps:$4 sm:$0xff]   ;;  %v4829_v4 = vpop.permute.xlu1 %970  ;;  %v4417_v56 = vld [vmem:[#allocation2 + $0x85c] ss:$144 sps:$4 sm:$0xff]  }
 0x1ea   :  { %v810_v11 = vmul.f32 %v803_v51, %v795_v52  ;;  %v4815_v13 = vadd.f32 %v809_v8, %v481_v3  ;;  %v797_v15 = vadd.f32 %v796_v9, %v671_v42  ;;  %3190 = vmatpush1.bf16.msra.mxu0 %v4376_v62  ;;  %v468_v5 = vpop.f32.mrf.mxu1  ;;  %2639 = vmatprep.subr.bf16.mxu1 %v4381_v0  ;;  %v4399_v42 = vld [vmem:[#allocation2 + $0x2ac] ss:$144 sps:$4 sm:$0xff]   ;;  %v4406_v51 = vld [vmem:[#allocation2 + $0x1a0] ss:$144 sps:$4 sm:$0xff]   ;;  %v4831_v62 = vpop.permute.xlu0 %2691  ;;  %v4415_v3 = vld [vmem:[#allocation2 + $0x858] ss:$144 sps:$4 sm:$0xff]  }
 0x1eb   :  { %v798_v17 = vpop.f32.mrf.mxu0  ;;  %v483_v22 = vmul.f32 %v4789_v25, %v467_v63  ;;  %v469_v23 = vadd.f32 %v468_v5, %v345_v48  ;;  %3191 = vmatprep.subr.bf16.mxu0 %v4384_v40  ;;  %v4408_v48 = vld [vmem:[#allocation2 + $0x1a4] ss:$144 sps:$4 sm:$0xff]   ;;  %v1007_v0 = vrot.slane %v1002_v61, %v4794_v1  ;;  %v4420_v6 = vld [vmem:[#allocation2 + $0x73c] ss:$144 sps:$4 sm:$0xff]   ;;  %v1011_v8 = vrot.slane %v1002_v61, %v4801_v19  ;;  %v4418_v9 = vld [vmem:[#allocation2 + $0x738] ss:$144 sps:$4 sm:$0xff]  }
 0x1ec   :  { %v4817_v21 = vadd.f32 %v810_v11, %v482_v59  ;;  %v799_v16 = vadd.f32 %v798_v17, %v675_v50  ;;  %v811_v30 = vmul.f32 %v807_v12, %v797_v15  ;;  %2319 = vmatmul.mubr.bf16.gmra.mxu1 %v4679_v46  ;;  %v4403_v50 = vld [vmem:[#allocation2 + $0x188] ss:$144 sps:$4 sm:$0xff]   ;;  %v4423_v63 = vld [vmem:[#allocation2 + $0x61c] ss:$144 sps:$4 sm:$0xff]  }
 0x1ed   :  { %2862 = vmatmul.mubr.bf16.gmra.mxu0 %v4679_v46  ;;  %v484_v31 = vmul.f32 %v4789_v25, %v469_v23  ;;  %2640 = vmatpush1.bf16.msra.mxu1 %v4379_v14  ;;  %v4394_v25 = vld [vmem:[#allocation2 + $0x3e0] ss:$144 sps:$4 sm:$0xff]   ;;  %v1139_v52 = vpop.permute.xlu1 %1138  ;;  %v1338_v61 = vld [vmem:[#allocation7 + $0x6] ss:$8 sm:$0x3] }
 0x1ee   :  { %v812_v32 = vmul.f32 %v807_v12, %v799_v16  ;;  %2667 = vmatprep.mubr.bf16.mxu1 %v4560_v55  ;;  %v4824_v34 = vadd.f32 %v811_v30, %v483_v22  ;;  %3192 = vmatpush1.bf16.msra.mxu0 %v4382_v18  ;;  %v4837_v59 = vpop.permute.xlu0 %974  ;;  %v4426_v16 = vld [vmem:[#allocation2 + $0x4fc] ss:$144 sps:$4 sm:$0xff]  }
 0x1ef   :  { %2641 = vmatprep.subr.bf16.mxu1 %v4387_v20  ;;  %3193 = vmatprep.subr.bf16.mxu0 %v4390_v29  ;;  %v4421_v20 = vld [vmem:[#allocation2 + $0x618] ss:$144 sps:$4 sm:$0xff]  }
 0x1f0   :  { %v4826_v38 = vadd.f32 %v812_v32, %v484_v31  ;;  %3219 = vmatprep.mubr.bf16.mxu0 %v4560_v55 }
 0x1f1   :  { %2642 = vmatpush1.bf16.msra.mxu1 %v4385_v33  ;;  %v1143_v18 = vpop.permute.xlu1 %1142 }
 0x1f2   :  { %3194 = vmatpush1.bf16.msra.mxu0 %v4388_v2  ;;  %2643 = vmatprep.subr.bf16.mxu1 %v4393_v37  ;;  %v4847_v31 = vpop.permute.xlu0 %2875  ;;  %v4429_v37 = vld [vmem:[#allocation2 + $0x3dc] ss:$144 sps:$4 sm:$0xff]  }
 0x1f3   :  { %3195 = vmatprep.subr.bf16.mxu0 %v4396_v39  ;;  %v4427_v39 = vld [vmem:[#allocation2 + $0x3d8] ss:$144 sps:$4 sm:$0xff]  }
 0x1f5   :  { %2644 = vmatpush1.bf16.msra.mxu1 %v4391_v41 }
 0x1f6   :  { %3196 = vmatpush1.bf16.msra.mxu0 %v4394_v25  ;;  %2645 = vmatprep.subr.bf16.mxu1 %v4399_v42  ;;  %v4858_v41 = vpop.permute.xlu0 %2513  ;;  %v4432_v25 = vld [vmem:[#allocation2 + $0x2bc] ss:$144 sps:$4 sm:$0xff]   ;;  %v4430_v42 = vld [vmem:[#allocation2 + $0x2b8] ss:$144 sps:$4 sm:$0xff]  }
 0x1f7   :  { %3197 = vmatprep.subr.bf16.mxu0 %v4402_v43 }
 0x1f9   :  { %2646 = vmatpush1.bf16.msra.mxu1 %v4397_v44  ;;  %v4435_v44 = vld [vmem:[#allocation2 + $0x19c] ss:$144 sps:$4 sm:$0xff]  }
 0x1fa   :  { %3198 = vmatpush1.bf16.msra.mxu0 %v4400_v45  ;;  %2647 = vmatprep.subr.bf16.mxu1 %v4405_v47  ;;  %v4433_v45 = vld [vmem:[#allocation2 + $0x198] ss:$144 sps:$4 sm:$0xff]  }
 0x1fb   :  { %3199 = vmatprep.subr.bf16.mxu0 %v4408_v48  ;;  %v4438_v48 = vld [vmem:[#allocation2 + $0x7c] ss:$144 sps:$4 sm:$0xff]  }
 0x1fd   :  { %2648 = vmatpush1.bf16.msra.mxu1 %v4403_v50  ;;  %v4436_v50 = vld [vmem:[#allocation2 + $0x78] ss:$144 sps:$4 sm:$0xff]  }
 0x1fe   :  { %3200 = vmatpush1.bf16.msra.mxu0 %v4406_v51  ;;  %2649 = vmatprep.subr.bf16.mxu1 %v4411_v53  ;;  %v4862_v51 = vpop.permute.xlu1 %1310 }
 0x1ff   :  { %3201 = vmatprep.subr.bf16.mxu0 %v4414_v54  ;;  %v834_v54 = vld [vmem:[#allocation7 + $0x3] ss:$8 sm:$0x3] }
 0x201   :  { %2650 = vmatpush1.bf16.msra.mxu1 %v4409_v58 }
 0x202   :  { %3202 = vmatpush1.bf16.msra.mxu0 %v4412_v60  ;;  %3003 = vmatprep.subr.bf16.mxu1 %v4417_v56  ;;  %v4441_v56 = vld [vmem:[#allocation2 + $0x86c] ss:$144 sps:$4 sm:$0xff]  }
 0x204   :  { %2668 = vmatmul.mubr.bf16.vlgmr.msra.gmra.mxu1 %v4681_v49  ;;  %v628_v43 = vpop.f32.mrf.mxu1 }
 0x205   :  { %v1128_v40 = vpop.f32.mrf.mxu0  ;;  %3220 = vmatmul.mubr.bf16.vlgmr.msra.gmra.mxu0 %v4681_v49  ;;  %3004 = vmatpush1.bf16.msra.mxu1 %v4415_v3  ;;  %v839_v3 = vrot.slane %v834_v54, %v4794_v1 }
 0x206   :  { %v1129_v57 = vadd.f32 %v1128_v40, %v1007_v0  ;;  %3005 = vmatprep.subr.bf16.mxu1 %v4420_v6  ;;  %2677 = vmatprep.mubr.bf16.mxu1 %v4560_v55  ;;  %v630_v47 = vpop.f32.mrf.mxu1  ;;  %v1343_v6 = vrot.slane %v1338_v61, %v4794_v1 }
 0x207   :  { %v1130_v11 = vpop.f32.mrf.mxu0  ;;  %3229 = vmatprep.mubr.bf16.mxu0 %v4560_v55 }
 0x208   :  { %v1145_v12 = vmul.f32 %v1139_v52, %v1129_v57  ;;  %v1131_v14 = vadd.f32 %v1130_v11, %v1011_v8  ;;  %v632_v60 = vpop.f32.mrf.mxu1  ;;  %v4444_v57 = vld [vmem:[#allocation2 + $0x74c] ss:$144 sps:$4 sm:$0xff]  }
 0x209   :  { %v1132_v15 = vpop.f32.mrf.mxu0  ;;  %3006 = vmatpush1.bf16.msra.mxu1 %v4418_v9  ;;  %v1475_v9 = vpop.permute.xlu1 %1474 }
 0x20a   :  { %v4842_v5 = vadd.f32 %v1145_v12, %v4815_v13  ;;  %v1146_v17 = vmul.f32 %v1139_v52, %v1131_v14  ;;  %v1133_v22 = vadd.f32 %v1132_v15, %v1007_v0  ;;  %3007 = vmatprep.subr.bf16.mxu1 %v4423_v63  ;;  %v4424_v13 = vld [vmem:[#allocation2 + $0x4f8] ss:$144 sps:$4 sm:$0xff]   ;;  %v634_v40 = vpop.f32.mrf.mxu1  ;;  %v843_v63 = vrot.slane %v834_v54, %v4801_v19 }
 0x20b   :  { %v1134_v23 = vpop.f32.mrf.mxu0  ;;  %v4439_v52 = vld [vmem:[#allocation2 + $0x868] ss:$144 sps:$4 sm:$0xff]   ;;  %v1347_v12 = vrot.slane %v1338_v61, %v4801_v19 }
 0x20c   :  { %v4845_v29 = vadd.f32 %v1146_v17, %v4817_v21  ;;  %v1135_v30 = vadd.f32 %v1134_v23, %v1011_v8  ;;  %v1147_v32 = vmul.f32 %v1143_v18, %v1133_v22  ;;  %2678 = vmatmul.mubr.bf16.gmra.mxu1 %v4679_v46  ;;  %v4442_v22 = vld [vmem:[#allocation2 + $0x748] ss:$144 sps:$4 sm:$0xff]  }
 0x20d   :  { %3008 = vmatpush1.bf16.msra.mxu1 %v4421_v20  ;;  %3230 = vmatmul.mubr.bf16.gmra.mxu0 %v4679_v46  ;;  %v4445_v61 = vld [vmem:[#allocation2 + $0x628] ss:$144 sps:$4 sm:$0xff]  }
 0x20e   :  { %v1148_v33 = vmul.f32 %v1143_v18, %v1135_v30  ;;  %v4852_v2 = vadd.f32 %v1147_v32, %v4824_v34  ;;  %3009 = vmatprep.subr.bf16.mxu1 %v4426_v16  ;;  %3035 = vmatprep.mubr.bf16.mxu1 %v4560_v55  ;;  %v4860_v34 = vpop.permute.xlu0 %2517  ;;  %v4447_v32 = vld [vmem:[#allocation2 + $0x62c] ss:$144 sps:$4 sm:$0xff]  }
 0x210   :  { %v4856_v21 = vadd.f32 %v1148_v33, %v4826_v38  ;;  %v502_v38 = vld [vmem:[#allocation7 + $0x1] ss:$8 sm:$0x3] }
 0x211   :  { %3010 = vmatpush1.bf16.msra.mxu1 %v4424_v13  ;;  %v507_v58 = vrot.slane %v502_v38, %v4794_v1  ;;  %v511_v0 = vrot.slane %v502_v38, %v4801_v19 }
 0x212   :  { %3011 = vmatprep.subr.bf16.mxu1 %v4429_v37  ;;  %v4864_v53 = vpop.permute.xlu0 %1306 }
 0x213   :  { %v629_v8 = vadd.f32 %v628_v43, %v507_v58  ;;  %v631_v14 = vadd.f32 %v630_v47, %v511_v0  ;;  %v635_v43 = vadd.f32 %v634_v40, %v511_v0 }
 0x215   :  { %3012 = vmatpush1.bf16.msra.mxu1 %v4427_v39  ;;  %v645_v23 = vmul.f32 %v4796_v35, %v629_v8 }
 0x216   :  { %3013 = vmatprep.subr.bf16.mxu1 %v4432_v25  ;;  %v4870_v11 = vpop.permute.xlu0 %3239  ;;  %v646_v25 = vmul.f32 %v4796_v35, %v631_v14  ;;  %v4450_v35 = vld [vmem:[#allocation2 + $0x50c] ss:$144 sps:$4 sm:$0xff]  }
 0x219   :  { %3014 = vmatpush1.bf16.msra.mxu1 %v4430_v42  ;;  %v633_v42 = vadd.f32 %v632_v60, %v507_v58 }
 0x21a   :  { %3015 = vmatprep.subr.bf16.mxu1 %v4435_v44  ;;  %v1479_v54 = vpop.permute.xlu0 %1478 }
 0x21b   :  { %v647_v40 = vmul.f32 %v4805_v27, %v633_v42 }
 0x21d   :  { %3016 = vmatpush1.bf16.msra.mxu1 %v4433_v45 }
 0x21e   :  { %3017 = vmatprep.subr.bf16.mxu1 %v4438_v48 }
 0x221   :  { %3018 = vmatpush1.bf16.msra.mxu1 %v4436_v50 }
 0x222   :  { %3371 = vmatprep.subr.bf16.mxu1 %v4441_v56 }
 0x224   :  { %v960_v15 = vpop.f32.mrf.mxu1  ;;  %3036 = vmatmul.mubr.bf16.vlgmr.msra.gmra.mxu1 %v4681_v49 }
 0x225   :  { %v1464_v17 = vpop.f32.mrf.mxu0  ;;  %v961_v18 = vadd.f32 %v960_v15, %v839_v3  ;;  %3372 = vmatpush1.bf16.msra.mxu1 %v4439_v52  ;;  %3045 = vmatprep.mubr.bf16.mxu1 %v4560_v55  ;;  %v4448_v15 = vld [vmem:[#allocation2 + $0x508] ss:$144 sps:$4 sm:$0xff]  }
 0x226   :  { %v1465_v20 = vadd.f32 %v1464_v17, %v1343_v6  ;;  %v962_v16 = vpop.f32.mrf.mxu1  ;;  %3373 = vmatprep.subr.bf16.mxu1 %v4444_v57 }
 0x227   :  { %v1466_v30 = vpop.f32.mrf.mxu0  ;;  %v977_v33 = vmul.f32 %v4829_v4, %v961_v18  ;;  %v963_v37 = vadd.f32 %v962_v16, %v843_v63  ;;  %v4462_v16 = vld [vmem:[#allocation2 + $0x8c] ss:$144 sps:$4 sm:$0xff]  }
 0x228   :  { %v1481_v13 = vmul.f32 %v1475_v9, %v1465_v20  ;;  %v1467_v39 = vadd.f32 %v1466_v30, %v1347_v12  ;;  %v964_v44 = vpop.f32.mrf.mxu1  ;;  %v4451_v20 = vld [vmem:[#allocation2 + $0x3e8] ss:$144 sps:$4 sm:$0xff]  }
 0x229   :  { %v1468_v45 = vpop.f32.mrf.mxu0  ;;  %v4879_v47 = vadd.f32 %v977_v33, %v645_v23  ;;  %v978_v38 = vmul.f32 %v4829_v4, %v963_v37  ;;  %3374 = vmatpush1.bf16.msra.mxu1 %v4442_v22  ;;  %v965_v56 = vadd.f32 %v964_v44, %v839_v3  ;;  %v648_v3 = vmul.f32 %v4805_v27, %v635_v43  ;;  %v4456_v22 = vld [vmem:[#allocation2 + $0x2cc] ss:$144 sps:$4 sm:$0xff]   ;;  %v4454_v27 = vld [vmem:[#allocation2 + $0x2c8] ss:$144 sps:$4 sm:$0xff]  }
 0x22a   :  { %v4882_v48 = vadd.f32 %v1481_v13, %v4842_v5  ;;  %v1482_v50 = vmul.f32 %v1475_v9, %v1467_v39  ;;  %v1469_v52 = vadd.f32 %v1468_v45, %v1343_v6  ;;  %v966_v8 = vpop.f32.mrf.mxu1  ;;  %3375 = vmatprep.subr.bf16.mxu1 %v4447_v32  ;;  %v4457_v23 = vld [vmem:[#allocation2 + $0x1a8] ss:$144 sps:$4 sm:$0xff]   ;;  %v1170_v32 = vld [vmem:[#allocation7 + $0x5] ss:$8 sm:$0x3] }
 0x22b   :  { %v1470_v57 = vpop.f32.mrf.mxu0  ;;  %v4885_v58 = vadd.f32 %v978_v38, %v646_v25  ;;  %v967_v0 = vadd.f32 %v966_v8, %v843_v63  ;;  %v979_v4 = vmul.f32 %v4837_v59, %v965_v56  ;;  %v4460_v30 = vld [vmem:[#allocation2 + $0x88] ss:$144 sps:$4 sm:$0xff]   ;;  %v1179_v39 = vrot.slane %v1170_v32, %v4801_v19 }
 0x22c   :  { %v4888_v60 = vadd.f32 %v1482_v50, %v4845_v29  ;;  %v1471_v5 = vadd.f32 %v1470_v57, %v1347_v12  ;;  %v1483_v9 = vmul.f32 %v1479_v54, %v1469_v52  ;;  %3046 = vmatmul.mubr.bf16.gmra.mxu1 %v4679_v46  ;;  %v4453_v12 = vld [vmem:[#allocation2 + $0x3ec] ss:$144 sps:$4 sm:$0xff]   ;;  %v1674_v33 = vld [vmem:[#allocation7 + $0x10] ss:$8 sm:$0x3] }
 0x22d   :  { %v980_v6 = vmul.f32 %v4837_v59, %v967_v0  ;;  %3376 = vmatpush1.bf16.msra.mxu1 %v4445_v61  ;;  %3403 = vmatprep.mubr.bf16.mxu1 %v4560_v55  ;;  %v983_v29 = vadd.f32 %v979_v4, %v647_v40  ;;  %v4459_v59 = vld [vmem:[#allocation2 + $0x1ac] ss:$144 sps:$4 sm:$0xff]   ;;  %v1679_v13 = vrot.slane %v1674_v33, %v4794_v1 }
 0x22e   :  { %v1484_v14 = vmul.f32 %v1479_v54, %v1471_v5  ;;  %v1487_v63 = vadd.f32 %v1483_v9, %v4852_v2  ;;  %3377 = vmatprep.subr.bf16.mxu1 %v4450_v35  ;;  %v4898_v2 = vpop.permute.xlu1 %1642  ;;  %v1683_v25 = vrot.slane %v1674_v33, %v4801_v19 }
 0x22f   :  { %v984_v17 = vadd.f32 %v980_v6, %v648_v3 }
 0x230   :  { %v1488_v18 = vadd.f32 %v1484_v14, %v4856_v21  ;;  %v1175_v21 = vrot.slane %v1170_v32, %v4794_v1 }
 0x231   :  { %3378 = vmatpush1.bf16.msra.mxu1 %v4448_v15 }
 0x232   :  { %3379 = vmatprep.subr.bf16.mxu1 %v4453_v12  ;;  %v4902_v37 = vpop.permute.xlu1 %1646 }
 0x235   :  { %3380 = vmatpush1.bf16.msra.mxu1 %v4451_v20 }
 0x236   :  { %3381 = vmatprep.subr.bf16.mxu1 %v4456_v22  ;;  %v1815_v40 = vpop.permute.xlu1 %1814 }
 0x239   :  { %3382 = vmatpush1.bf16.msra.mxu1 %v4454_v27 }
 0x23a   :  { %3383 = vmatprep.subr.bf16.mxu1 %v4459_v59 }
 0x23d   :  { %3384 = vmatpush1.bf16.msra.mxu1 %v4457_v23  ;;  %v1979_v23 = vpop.permute.xlu1 %1978 }
 0x23e   :  { %3385 = vmatprep.subr.bf16.mxu1 %v4462_v16  ;;  %v1506_v16 = vld [vmem:[#allocation7 + $0x7] ss:$8 sm:$0x3] }
 0x23f   :  { %v1515_v33 = vrot.slane %v1506_v16, %v4801_v19 }
 0x241   :  { %3386 = vmatpush1.bf16.msra.mxu1 %v4460_v30  ;;  %v2010_v30 = vld [vmem:[#allocation7 + $0x12] ss:$8 sm:$0x3]  ;;  %v2147_v32 = vpop.permute.xlu1 %2146 }
 0x244   :  { %v1296_v42 = vpop.f32.mrf.mxu1  ;;  %3404 = vmatmul.mubr.bf16.vlgmr.msra.gmra.mxu1 %v4681_v49 }
 0x245   :  { %v1800_v43 = vpop.f32.mrf.mxu0  ;;  %v1297_v44 = vadd.f32 %v1296_v42, %v1175_v21  ;;  %3413 = vmatprep.mubr.bf16.mxu1 %v4560_v55 }
 0x246   :  { %v1801_v45 = vadd.f32 %v1800_v43, %v1679_v13  ;;  %v1298_v38 = vpop.f32.mrf.mxu1 }
 0x247   :  { %v1802_v50 = vpop.f32.mrf.mxu0  ;;  %v1313_v54 = vmul.f32 %v4864_v53, %v1297_v44  ;;  %v1299_v56 = vadd.f32 %v1298_v38, %v1179_v39 }
 0x248   :  { %v1817_v61 = vmul.f32 %v4777_v7, %v1801_v45  ;;  %v1803_v52 = vadd.f32 %v1802_v50, %v1683_v25  ;;  %v1300_v8 = vpop.f32.mrf.mxu1 }
 0x249   :  { %v1804_v57 = vpop.f32.mrf.mxu0  ;;  %v1317_v35 = vadd.f32 %v1313_v54, %v4879_v47  ;;  %v1314_v49 = vmul.f32 %v4864_v53, %v1299_v56  ;;  %v1301_v55 = vadd.f32 %v1300_v8, %v1175_v21  ;;  %v2019_v21 = vrot.slane %v2010_v30, %v4801_v19 }
 0x24a   :  { %v1821_v0 = vadd.f32 %v1817_v61, %v4882_v48  ;;  %v1818_v5 = vmul.f32 %v4777_v7, %v1803_v52  ;;  %v1805_v4 = vadd.f32 %v1804_v57, %v1679_v13  ;;  %v1302_v9 = vpop.f32.mrf.mxu1  ;;  %v2151_v61 = vpop.permute.xlu1 %2150 }
 0x24b   :  { %v1806_v3 = vpop.f32.mrf.mxu0  ;;  %v1318_v6 = vadd.f32 %v1314_v49, %v4885_v58  ;;  %v1303_v15 = vadd.f32 %v1302_v9, %v1179_v39  ;;  %v1315_v20 = vmul.f32 %v4862_v51, %v1301_v55  ;;  %v1511_v58 = vrot.slane %v1506_v16, %v4794_v1 }
 0x24c   :  { %v1822_v14 = vadd.f32 %v1818_v5, %v4888_v60  ;;  %v1807_v12 = vadd.f32 %v1806_v3, %v1683_v25  ;;  %v1819_v47 = vmul.f32 %v1815_v40, %v1805_v4  ;;  %3414 = vmatmul.mubr.bf16.gmra.mxu1 %v4679_v46  ;;  %v2015_v60 = vrot.slane %v2010_v30, %v4794_v1 }
 0x24d   :  { %v1316_v53 = vmul.f32 %v4862_v51, %v1303_v15  ;;  %v1319_v7 = vadd.f32 %v1315_v20, %v983_v29  ;;  %v1842_v20 = vld [vmem:[#allocation7 + $0x11] ss:$8 sm:$0x3] }
 0x24e   :  { %v1820_v48 = vmul.f32 %v1815_v40, %v1807_v12  ;;  %v1823_v22 = vadd.f32 %v1819_v47, %v1487_v63  ;;  %v4927_v47 = vpop.permute.xlu1 %2334 }
 0x24f   :  { %v1320_v27 = vadd.f32 %v1316_v53, %v984_v17  ;;  %v1847_v53 = vrot.slane %v1842_v20, %v4794_v1 }
 0x250   :  { %v1824_v59 = vadd.f32 %v1820_v48, %v1488_v18 }
 0x252   :  { %v4931_v30 = vpop.permute.xlu1 %2687 }
 0x264   :  { %v1632_v46 = vpop.f32.mrf.mxu1 }
 0x265   :  { %v2136_v13 = vpop.f32.mrf.mxu0  ;;  %v1633_v51 = vadd.f32 %v1632_v46, %v1511_v58 }
 0x266   :  { %v2137_v39 = vadd.f32 %v2136_v13, %v2015_v60  ;;  %v1634_v29 = vpop.f32.mrf.mxu1 }
 0x267   :  { %v2138_v63 = vpop.f32.mrf.mxu0  ;;  %v1649_v17 = vmul.f32 %v4898_v2, %v1633_v51  ;;  %v1635_v25 = vadd.f32 %v1634_v29, %v1515_v33 }
 0x268   :  { %v2153_v18 = vmul.f32 %v2147_v32, %v2137_v39  ;;  %v2139_v42 = vadd.f32 %v2138_v63, %v2019_v21  ;;  %v1636_v43 = vpop.f32.mrf.mxu1  ;;  %v4934_v63 = vpop.permute.xlu1 %2339 }
 0x269   :  { %v2140_v44 = vpop.f32.mrf.mxu0  ;;  %v1653_v45 = vadd.f32 %v1649_v17, %v1317_v35  ;;  %v1650_v50 = vmul.f32 %v4898_v2, %v1635_v25  ;;  %v1637_v56 = vadd.f32 %v1636_v43, %v1511_v58 }
 0x26a   :  { %v2157_v38 = vadd.f32 %v2153_v18, %v1821_v0  ;;  %v2154_v54 = vmul.f32 %v2147_v32, %v2139_v42  ;;  %v2141_v52 = vadd.f32 %v2140_v44, %v2015_v60  ;;  %v1638_v8 = vpop.f32.mrf.mxu1 }
 0x26b   :  { %v2142_v57 = vpop.f32.mrf.mxu0  ;;  %v1654_v49 = vadd.f32 %v1650_v50, %v1318_v6  ;;  %v1639_v40 = vadd.f32 %v1638_v8, %v1515_v33  ;;  %v1651_v4 = vmul.f32 %v4902_v37, %v1637_v56  ;;  %v1851_v6 = vrot.slane %v1842_v20, %v4801_v19  ;;  %v2365_v8 = vld [vmem:[#allocation7 + $0x14] ss:$8 sm:$0x3] }
 0x26c   :  { %v2158_v5 = vadd.f32 %v2154_v54, %v1822_v14  ;;  %v2143_v55 = vadd.f32 %v2142_v57, %v2019_v21  ;;  %v2155_v9 = vmul.f32 %v2151_v61, %v2141_v52  ;;  %v2370_v57 = vrot.slane %v2365_v8, %v4794_v1 }
 0x26d   :  { %v1652_v3 = vmul.f32 %v4902_v37, %v1639_v40  ;;  %v1655_v35 = vadd.f32 %v1651_v4, %v1319_v7 }
 0x26e   :  { %v2156_v15 = vmul.f32 %v2151_v61, %v2143_v55  ;;  %v2159_v0 = vadd.f32 %v2155_v9, %v1823_v22  ;;  %v2510_v61 = vpop.permute.xlu1 %2509 }
 0x26f   :  { %v1656_v12 = vadd.f32 %v1652_v3, %v1320_v27 }
 0x270   :  { %v2160_v2 = vadd.f32 %v2156_v15, %v1824_v59 }
 0x272   :  { %v4941_v52 = vpop.permute.xlu1 %2695 }
 0x284   :  { %v1968_v14 = vpop.f32.mrf.mxu1 }
 0x285   :  { %v2491_v48 = vpop.f32.mrf.mxu0  ;;  %v1969_v16 = vadd.f32 %v1968_v14, %v1847_v53 }
 0x286   :  { %v1970_v58 = vpop.f32.mrf.mxu1  ;;  %v2492_v40 = vadd.f32 %v2491_v48, %v2370_v57 }
 0x287   :  { %v2493_v60 = vpop.f32.mrf.mxu0  ;;  %v1985_v37 = vmul.f32 %v1979_v23, %v1969_v16  ;;  %v1971_v32 = vadd.f32 %v1970_v58, %v1851_v6 }
 0x288   :  { %v1972_v7 = vpop.f32.mrf.mxu1 }
 0x289   :  { %v2495_v22 = vpop.f32.mrf.mxu0  ;;  %v1989_v27 = vadd.f32 %v1985_v37, %v1653_v45  ;;  %v1986_v59 = vmul.f32 %v1979_v23, %v1971_v32  ;;  %v1973_v33 = vadd.f32 %v1972_v7, %v1847_v53 }
 0x28a   :  { %v1974_v21 = vpop.f32.mrf.mxu1  ;;  %v2496_v20 = vadd.f32 %v2495_v22, %v2370_v57 }
 0x28b   :  { %v2497_v46 = vpop.f32.mrf.mxu0  ;;  %v2161_v13 = vadd.f32 %v2157_v38, %v1989_v27  ;;  %v1990_v51 = vadd.f32 %v1986_v59, %v1654_v49  ;;  %v1987_v39 = vmul.f32 %v4782_v10, %v1973_v33  ;;  %v1975_v29 = vadd.f32 %v1974_v21, %v1851_v6  ;;  %v2872_v49 = vpop.permute.xlu1 %2871 }
 0x28c   :  { %v2522_v27 = vmul.f32 %v4858_v41, %v2496_v20 }
 0x28d   :  { %v2501_v17 = vpop.f32.mrf.mxu0  ;;  %v2162_v18 = vadd.f32 %v2158_v5, %v1990_v51  ;;  %v1991_v25 = vadd.f32 %v1987_v39, %v1655_v35  ;;  %v1988_v42 = vmul.f32 %v4782_v10, %v1975_v29  ;;  %v2727_v5 = vld [vmem:[#allocation7 + $0x16] ss:$8 sm:$0x3]  ;;  %v2374_v10 = vrot.slane %v2365_v8, %v4801_v19 }
 0x28e   :  { %v2732_v55 = vrot.slane %v2727_v5, %v4794_v1  ;;  %v2736_v9 = vrot.slane %v2727_v5, %v4801_v19  ;;  %v2502_v33 = vadd.f32 %v2501_v17, %v2370_v57 }
 0x28f   :  { %v2503_v43 = vpop.f32.mrf.mxu0  ;;  %v2163_v44 = vadd.f32 %v2159_v0, %v1991_v25  ;;  %v1992_v50 = vadd.f32 %v1988_v42, %v1656_v12  ;;  %v2494_v4 = vadd.f32 %v2493_v60, %v2374_v10  ;;  %v4947_v3 = vpop.permute.xlu1 %3055  ;;  %v2520_v0 = vmul.f32 %v2510_v61, %v2492_v40 }
 0x290   :  { %v2498_v6 = vadd.f32 %v2497_v46, %v2374_v10  ;;  %v2504_v46 = vadd.f32 %v2503_v43, %v2374_v10 }
 0x291   :  { %v2505_v45 = vpop.f32.mrf.mxu0  ;;  %v4937_v23 = vadd.f32 %v2163_v44, %v2161_v13  ;;  %v2164_v54 = vadd.f32 %v2160_v2, %v1992_v50  ;;  %v2521_v14 = vmul.f32 %v2510_v61, %v2494_v4  ;;  %v2524_v50 = vmul.f32 %v4860_v34, %v2502_v33  ;;  %v2184_v4 = vld [vmem:[#allocation7 + $0x13] ss:$8 sm:$0x3] }
 0x292   :  { %v2523_v22 = vmul.f32 %v4858_v41, %v2498_v6  ;;  %v2525_v41 = vmul.f32 %v4860_v34, %v2504_v46  ;;  %v3095_v34 = vld [vmem:[#allocation7 + $0x20] ss:$8 sm:$0x3] }
 0x293   :  { %v2506_v38 = vpop.f32.mrf.mxu0  ;;  %v4939_v56 = vadd.f32 %v2164_v54, %v2162_v18  ;;  %v4951_v7 = vpop.permute.xlu1 %3059 }
 0x297   :  { %v2880_v38 = vpop.permute.xlu1 %2879 }
 0x2a4   :  { %v2310_v15 = vpop.f32.mrf.mxu1 }
 0x2a5   :  { %v2853_v35 = vpop.f32.mrf.mxu0 }
 0x2a6   :  { %v2854_v12 = vadd.f32 %v2853_v35, %v2732_v55  ;;  %v2312_v2 = vpop.f32.mrf.mxu1  ;;  %v4971_v35 = vpop.permute.xlu1 %3063 }
 0x2a7   :  { %v2855_v53 = vpop.f32.mrf.mxu0 }
 0x2a8   :  { %v2882_v16 = vmul.f32 %v2872_v49, %v2854_v12  ;;  %v2856_v58 = vadd.f32 %v2855_v53, %v2736_v9  ;;  %v2314_v37 = vpop.f32.mrf.mxu1  ;;  %v4974_v12 = vrot.slane %v2184_v4, %v4794_v1  ;;  %v3100_v53 = vrot.slane %v3095_v34, %v4794_v1 }
 0x2a9   :  { %v2857_v48 = vpop.f32.mrf.mxu0 }
 0x2aa   :  { %v4949_v32 = vadd.f32 %v2882_v16, %v2520_v0  ;;  %v2883_v60 = vmul.f32 %v2872_v49, %v2856_v58  ;;  %v4954_v59 = vpop.f32.mrf.mxu1  ;;  %v2858_v21 = vadd.f32 %v2857_v48, %v2732_v55  ;;  %v2543_v0 = vld [vmem:[#allocation7 + $0x15] ss:$8 sm:$0x3]  ;;  %v2311_v6 = vadd.f32 %v2310_v15, %v4974_v12  ;;  %v3244_v16 = vpop.permute.xlu1 %3243 }
 0x2ab   :  { %v2859_v13 = vpop.f32.mrf.mxu0  ;;  %v4980_v20 = vrot.slane %v2543_v0, %v4794_v1  ;;  %v4988_v48 = vrot.slane %v3095_v34, %v4801_v19  ;;  %v2315_v46 = vadd.f32 %v2314_v37, %v4974_v12 }
 0x2ac   :  { %v4957_v51 = vadd.f32 %v2883_v60, %v2521_v14  ;;  %v2860_v39 = vadd.f32 %v2859_v13, %v2736_v9  ;;  %v4959_v29 = vpop.f32.mrf.mxu1  ;;  %v2884_v18 = vmul.f32 %v4847_v31, %v2858_v21  ;;  %v4985_v14 = vrot.slane %v2543_v0, %v4801_v19 }
 0x2ad   :  { %v2863_v25 = vpop.f32.mrf.mxu0 }
 0x2ae   :  { %v2885_v42 = vmul.f32 %v4847_v31, %v2860_v39  ;;  %v2864_v44 = vadd.f32 %v2863_v25, %v2732_v55  ;;  %v2890_v45 = vadd.f32 %v2884_v18, %v2522_v27  ;;  %v4964_v17 = vpop.f32.mrf.mxu1  ;;  %v4996_v25 = vpop.permute.xlu1 %3423 }
 0x2af   :  { %v2865_v54 = vpop.f32.mrf.mxu0 }
 0x2b0   :  { %v4967_v43 = vadd.f32 %v2885_v42, %v2523_v22  ;;  %v2866_v61 = vadd.f32 %v2865_v54, %v2736_v9  ;;  %v2324_v8 = vpop.f32.mrf.mxu1  ;;  %v2886_v49 = vmul.f32 %v2880_v38, %v2864_v44  ;;  %v4977_v9 = vrot.slane %v2184_v4, %v4801_v19 }
 0x2b1   :  { %v2867_v57 = vpop.f32.mrf.mxu0  ;;  %v2342_v22 = vmul.f32 %v4798_v36, %v2311_v6 }
 0x2b2   :  { %v2887_v5 = vmul.f32 %v2880_v38, %v2866_v61  ;;  %v2325_v10 = vpop.f32.mrf.mxu1  ;;  %v2892_v40 = vadd.f32 %v2886_v49, %v2524_v50  ;;  %v2313_v60 = vadd.f32 %v2312_v2, %v4977_v9 }
 0x2b3   :  { %v2868_v31 = vpop.f32.mrf.mxu0 }
 0x2b4   :  { %v4969_v55 = vadd.f32 %v2887_v5, %v2525_v41  ;;  %v2343_v50 = vmul.f32 %v4798_v36, %v2313_v60  ;;  %v2344_v5 = vmul.f32 %v4927_v47, %v2315_v46 }
 0x2c4   :  { %v2669_v58 = vpop.f32.mrf.mxu1 }
 0x2c5   :  { %v2670_v27 = vadd.f32 %v2669_v58, %v4980_v20  ;;  %v3221_v33 = vpop.f32.mrf.mxu0 }
 0x2c6   :  { %v3222_v21 = vadd.f32 %v3221_v33, %v3100_v53  ;;  %v2671_v13 = vpop.f32.mrf.mxu1 }
 0x2c7   :  { %v2698_v15 = vmul.f32 %v4931_v30, %v2670_v27  ;;  %v2672_v39 = vadd.f32 %v2671_v13, %v4985_v14  ;;  %v3223_v18 = vpop.f32.mrf.mxu0 }
 0x2c8   :  { %v3250_v42 = vmul.f32 %v4870_v11, %v3222_v21  ;;  %v3224_v2 = vadd.f32 %v3223_v18, %v4988_v48  ;;  %v2673_v44 = vpop.f32.mrf.mxu1 }
 0x2c9   :  { %v5001_v54 = vadd.f32 %v2698_v15, %v2342_v22  ;;  %v2699_v41 = vmul.f32 %v4931_v30, %v2672_v39  ;;  %v2674_v37 = vadd.f32 %v2673_v44, %v4980_v20  ;;  %v3225_v61 = vpop.f32.mrf.mxu0 }
 0x2ca   :  { %v5006_v38 = vadd.f32 %v3250_v42, %v4949_v32  ;;  %v3251_v8 = vmul.f32 %v4870_v11, %v3224_v2  ;;  %v3226_v57 = vadd.f32 %v3225_v61, %v3100_v53  ;;  %v2675_v49 = vpop.f32.mrf.mxu1  ;;  %v5019_v11 = vpop.permute.xlu1 %3247 }
 0x2cb   :  { %v5010_v10 = vadd.f32 %v2699_v41, %v2343_v50  ;;  %v2700_v36 = vmul.f32 %v4831_v62, %v2674_v37  ;;  %v3227_v31 = vpop.f32.mrf.mxu0  ;;  %v2911_v37 = vld [vmem:[#allocation7 + $0x17] ss:$8 sm:$0x3] }
 0x2cc   :  { %v5014_v4 = vadd.f32 %v3251_v8, %v4957_v51  ;;  %v3252_v30 = vmul.f32 %v3244_v16, %v3226_v57  ;;  %v3228_v0 = vadd.f32 %v3227_v31, %v4988_v48  ;;  %v2679_v34 = vpop.f32.mrf.mxu1  ;;  %v2920_v61 = vrot.slane %v2911_v37, %v4801_v19  ;;  %v3279_v8 = vld [vmem:[#allocation7 + $0x21] ss:$8 sm:$0x3] }
 0x2cd   :  { %v5017_v32 = vadd.f32 %v2700_v36, %v2344_v5  ;;  %v3231_v6 = vpop.f32.mrf.mxu0  ;;  %v2676_v5 = vadd.f32 %v2675_v49, %v4985_v14  ;;  %v3284_v31 = vrot.slane %v3279_v8, %v4794_v1 }
 0x2ce   :  { %v5021_v58 = vadd.f32 %v3252_v30, %v2890_v45  ;;  %v3253_v60 = vmul.f32 %v3244_v16, %v3228_v0  ;;  %v2681_v27 = vpop.f32.mrf.mxu1  ;;  %v3232_v33 = vadd.f32 %v3231_v6, %v3100_v53  ;;  %v2321_v30 = vadd.f32 %v4959_v29, %v4974_v12 }
 0x2cf   :  { %v3233_v21 = vpop.f32.mrf.mxu0  ;;  %v2682_v29 = vadd.f32 %v2681_v27, %v4985_v14  ;;  %v3428_v14 = vpop.permute.xlu0 %3427 }
 0x2d0   :  { %v5024_v13 = vadd.f32 %v3253_v60, %v4967_v43  ;;  %v2683_v51 = vpop.f32.mrf.mxu1  ;;  %v3254_v22 = vmul.f32 %v5019_v11, %v3232_v33  ;;  %v2916_v43 = vrot.slane %v2911_v37, %v4794_v1  ;;  %v3288_v60 = vrot.slane %v3279_v8, %v4801_v19 }
 0x2d1   :  { %v3235_v46 = vpop.f32.mrf.mxu0  ;;  %v2701_v33 = vmul.f32 %v4831_v62, %v2676_v5  ;;  %v2680_v51 = vadd.f32 %v2679_v34, %v4980_v20  ;;  %v2323_v62 = vadd.f32 %v4964_v17, %v4977_v9  ;;  %v2703_v17 = vmul.f32 %v4941_v52, %v2682_v29 }
 0x2d2   :  { %v2684_v15 = vpop.f32.mrf.mxu1  ;;  %v5027_v39 = vadd.f32 %v3254_v22, %v2892_v40  ;;  %v2317_v40 = vadd.f32 %v4954_v59, %v4977_v9  ;;  %v3234_v9 = vadd.f32 %v3233_v21, %v4988_v48 }
 0x2d3   :  { %v3236_v18 = vpop.f32.mrf.mxu0 }
 0x2d4   :  { %v2345_v46 = vmul.f32 %v4927_v47, %v2317_v40  ;;  %v2346_v18 = vmul.f32 %v4934_v63, %v2321_v30 }
 0x2d6   :  { %v2707_v47 = vadd.f32 %v2701_v33, %v2345_v46  ;;  %v3255_v33 = vmul.f32 %v5019_v11, %v3234_v9 }
 0x2e4   :  { %v3037_v42 = vpop.f32.mrf.mxu1 }
 0x2e5   :  { %v3038_v57 = vadd.f32 %v3037_v42, %v2916_v43 }
 0x2e6   :  { %v3039_v2 = vpop.f32.mrf.mxu1 }
 0x2e7   :  { %v3040_v36 = vadd.f32 %v3039_v2, %v2920_v61  ;;  %v3066_v6 = vmul.f32 %v4947_v3, %v3038_v57 }
 0x2e8   :  { %v3041_v44 = vpop.f32.mrf.mxu1 }
 0x2e9   :  { %v3042_v0 = vadd.f32 %v3041_v44, %v2916_v43  ;;  %v3067_v59 = vmul.f32 %v4947_v3, %v3040_v36  ;;  %v3072_v20 = vadd.f32 %v3066_v6, %v5001_v54  ;;  %v2702_v3 = vmul.f32 %v4941_v52, %v2680_v51  ;;  %v3432_v52 = vpop.permute.xlu1 %3431 }
 0x2ea   :  { %v3043_v45 = vpop.f32.mrf.mxu1 }
 0x2eb   :  { %v3044_v22 = vadd.f32 %v3043_v45, %v2920_v61  ;;  %v3068_v12 = vmul.f32 %v4951_v7, %v3042_v0  ;;  %v3073_v27 = vadd.f32 %v3067_v59, %v5010_v10  ;;  %v2347_v10 = vmul.f32 %v4934_v63, %v2323_v62 }
 0x2ec   :  { %v3047_v50 = vpop.f32.mrf.mxu1  ;;  %v2708_v40 = vadd.f32 %v2702_v3, %v2346_v18 }
 0x2ed   :  { %v3048_v42 = vadd.f32 %v3047_v50, %v2916_v43  ;;  %v3069_v45 = vmul.f32 %v4951_v7, %v3044_v22  ;;  %v3074_v8 = vadd.f32 %v3068_v12, %v5017_v32  ;;  %v2709_v32 = vadd.f32 %v2703_v17, %v2347_v10 }
 0x2ee   :  { %v3049_v16 = vpop.f32.mrf.mxu1 }
 0x2ef   :  { %v3070_v54 = vmul.f32 %v4971_v35, %v3048_v42  ;;  %v3075_v36 = vadd.f32 %v3069_v45, %v2707_v47 }
 0x2f0   :  { %v3051_v41 = vpop.f32.mrf.mxu1 }
 0x2f1   :  { %v3050_v41 = vadd.f32 %v3049_v16, %v2920_v61 }
 0x2f2   :  { %v3052_v53 = vpop.f32.mrf.mxu1 }
 0x304   :  { %v3405_v49 = vpop.f32.mrf.mxu1 }
 0x305   :  { %v3406_v15 = vadd.f32 %v3405_v49, %v3284_v31 }
 0x306   :  { %v3407_v2 = vpop.f32.mrf.mxu1 }
 0x307   :  { %v3434_v34 = vmul.f32 %v4996_v25, %v3406_v15  ;;  %v3408_v44 = vadd.f32 %v3407_v2, %v3288_v60 }
 0x308   :  { %v3409_v53 = vpop.f32.mrf.mxu1 }
 0x309   :  { %v3440_v50 = vadd.f32 %v3434_v34, %v3072_v20  ;;  %v3435_v37 = vmul.f32 %v4996_v25, %v3408_v44  ;;  %v3410_v43 = vadd.f32 %v3409_v53, %v3284_v31  ;;  %v3071_v25 = vmul.f32 %v4971_v35, %v3050_v41 }
 0x30a   :  { %v3411_v57 = vpop.f32.mrf.mxu1 }
 0x30b   :  { %v3446_v7 = vadd.f32 %v3440_v50, %v5006_v38  ;;  %v3441_v16 = vadd.f32 %v3435_v37, %v3073_v27  ;;  %v3436_v61 = vmul.f32 %v3428_v14, %v3410_v43  ;;  %v3412_v5 = vadd.f32 %v3411_v57, %v3288_v60 }
 0x30c   :  { %v3415_v30 = vpop.f32.mrf.mxu1  ;;  %v3076_v38 = vadd.f32 %v3070_v54, %v2708_v40  ;;  %v3077_v59 = vadd.f32 %v3071_v25, %v2709_v32 }
 0x30d   :  { %v3447_v48 = vadd.f32 %v3441_v16, %v5014_v4  ;;  %v3442_v21 = vadd.f32 %v3436_v61, %v3074_v8  ;;  %v3437_v0 = vmul.f32 %v3428_v14, %v3412_v5  ;;  %v3416_v6 = vadd.f32 %v3415_v30, %v3284_v31 }
 0x30e   :  { %v3417_v51 = vpop.f32.mrf.mxu1  ;;  %v3261_v31 = vadd.f32 %v3255_v33, %v4969_v55 }
 0x30f   :  { %v3448_v22 = vadd.f32 %v3442_v21, %v5021_v58  ;;  %v3443_v49 = vadd.f32 %v3437_v0, %v3075_v36  ;;  %v3438_v63 = vmul.f32 %v3432_v52, %v3416_v6  ;;  %v3418_v46 = vadd.f32 %v3417_v51, %v3288_v60 }
 0x310   :  { %v3419_v15 = vpop.f32.mrf.mxu1  ;;  %v3456_v58 = vadd.f32 %v4937_v23, %v4673_v24  ;;  %v3457_v60 = vadd.f32 %v4939_v56, %v4675_v26 }
 0x311   :  { %v3452_v35 = vadd.f32 %v3448_v22, %v3446_v7  ;;  %v3449_v18 = vadd.f32 %v3443_v49, %v5024_v13  ;;  %v3444_v29 = vadd.f32 %v3438_v63, %v3076_v38  ;;  %v3439_v4 = vmul.f32 %v3432_v52, %v3418_v46 }
 0x312   :  { %v3420_v12 = vpop.f32.mrf.mxu1 }
 0x313   :  { %v3453_v42 = vadd.f32 %v3449_v18, %v3447_v48  ;;  %v3450_v11 = vadd.f32 %v3444_v29, %v5027_v39  ;;  %v3445_v2 = vadd.f32 %v3439_v4, %v3077_v59 }
 0x315   :  { %v3454_v62 = vadd.f32 %v3452_v35, %v3450_v11  ;;  %v3451_v20 = vadd.f32 %v3445_v2, %v3261_v31 }
 0x317   :  { %v5071_v34 = vadd.f32 %v3456_v58, %v3454_v62  ;;  %v3455_v13 = vadd.f32 %v3453_v42, %v3451_v20 }
 0x319   :  { %v3460_v44 = vmax.f32 %v5071_v34, 0.0  ;;  %v3459_v47 = vadd.f32 %v3457_v60, %v3455_v13 }
 0x31b   :  { %v3461_v3 = vmax.f32 %v3459_v47, 0.0 }
 0x31c   :  { %4549 = dma.done.wait [#allocation4 + $0x1], 8448 }
 0x31d   :  { %4550 = vsyncadd [#allocation4 + $0x1], 4294958848  ;;  %3604 = vmatprep.mubr.f32.mxu0 %v3461_v3  ;;  %v3497_v55 = vld [vmem:[#allocation3 + $0xf8] sm:$0xff]  ;;  %v3496_v39 = vld [vmem:[#allocation3 + $0xf0] sm:$0xff] }
 0x31e   :  { %v3495_v45 = vld [vmem:[#allocation3 + $0xe8] sm:$0xff]  ;;  %3540 = vmatprep.subr.mxu0 %v3497_v55  ;;  %v3494_v24 = vld [vmem:[#allocation3 + $0xe0] sm:$0xff]  ;;  %v3493_v23 = vld [vmem:[#allocation3 + $0xd8] sm:$0xff] }
 0x31f   :  { %3541 = vmatpush1.msra.mxu0 %v3496_v39  ;;  %v3492_v41 = vld [vmem:[#allocation3 + $0xd0] sm:$0xff]  ;;  %v3491_v26 = vld [vmem:[#allocation3 + $0xc8] sm:$0xff]  ;;  %v3490_v56 = vld [vmem:[#allocation3 + $0xc0] sm:$0xff] }
 0x320   :  { %3542 = vmatprep.subr.mxu0 %v3495_v45  ;;  %v3489_v53 = vld [vmem:[#allocation3 + $0xb8] sm:$0xff]  ;;  %v3488_v14 = vld [vmem:[#allocation3 + $0xb0] sm:$0xff]  ;;  %v3487_v27 = vld [vmem:[#allocation3 + $0xa8] sm:$0xff] }
 0x321   :  { %3543 = vmatpush1.msra.mxu0 %v3494_v24  ;;  %v3486_v50 = vld [vmem:[#allocation3 + $0xa0] sm:$0xff]  ;;  %v3485_v37 = vld [vmem:[#allocation3 + $0x98] sm:$0xff]  ;;  %v3484_v43 = vld [vmem:[#allocation3 + $0x90] sm:$0xff] }
 0x322   :  { %3544 = vmatprep.subr.mxu0 %v3493_v23  ;;  %v3483_v17 = vld [vmem:[#allocation3 + $0x88] sm:$0xff]  ;;  %v3482_v9 = vld [vmem:[#allocation3 + $0x80] sm:$0xff]  ;;  %v3481_v54 = vld [vmem:[#allocation3 + $0x78] sm:$0xff] }
 0x323   :  { %3545 = vmatpush1.msra.mxu0 %v3492_v41  ;;  %v3480_v8 = vld [vmem:[#allocation3 + $0x70] sm:$0xff]  ;;  %v3479_v57 = vld [vmem:[#allocation3 + $0x68] sm:$0xff]  ;;  %v3478_v7 = vld [vmem:[#allocation3 + $0x60] sm:$0xff] }
 0x324   :  { %3546 = vmatprep.subr.mxu0 %v3491_v26  ;;  %v3477_v16 = vld [vmem:[#allocation3 + $0x58] sm:$0xff]  ;;  %v3476_v61 = vld [vmem:[#allocation3 + $0x50] sm:$0xff]  ;;  %v3475_v5 = vld [vmem:[#allocation3 + $0x48] sm:$0xff] }
 0x325   :  { %3547 = vmatpush1.msra.mxu0 %v3490_v56  ;;  %v3474_v10 = vld [vmem:[#allocation3 + $0x40] sm:$0xff]  ;;  %v3473_v40 = vld [vmem:[#allocation3 + $0x38] sm:$0xff]  ;;  %v3472_v36 = vld [vmem:[#allocation3 + $0x30] sm:$0xff] }
 0x326   :  { %3548 = vmatprep.subr.mxu0 %v3489_v53  ;;  %v3471_v25 = vld [vmem:[#allocation3 + $0x28] sm:$0xff]  ;;  %v3470_v30 = vld [vmem:[#allocation3 + $0x20] sm:$0xff]  ;;  %v3469_v52 = vld [vmem:[#allocation3 + $0x18] sm:$0xff] }
 0x327   :  { %3549 = vmatpush1.msra.mxu0 %v3488_v14  ;;  %v3468_v48 = vld [vmem:[#allocation3 + $0x10] sm:$0xff]  ;;  %v3467_v21 = vld [vmem:[#allocation3 + $0x8] sm:$0xff]  ;;  %v3466_v0 = vld [vmem:[#allocation3] sm:$0xff] }
 0x328   :  { %3550 = vmatprep.subr.mxu0 %v3487_v27  ;;  %v3529_v6 = vld [vmem:[#allocation3 + $0x1f8] sm:$0xff]  ;;  %v3528_v32 = vld [vmem:[#allocation3 + $0x1f0] sm:$0xff]  ;;  %v3527_v33 = vld [vmem:[#allocation3 + $0x1e8] sm:$0xff] }
 0x329   :  { %3551 = vmatpush1.msra.mxu0 %v3486_v50  ;;  %v3526_v38 = vld [vmem:[#allocation3 + $0x1e0] sm:$0xff]  ;;  %v3525_v51 = vld [vmem:[#allocation3 + $0x1d8] sm:$0xff]  ;;  %v3524_v22 = vld [vmem:[#allocation3 + $0x1d0] sm:$0xff] }
 0x32a   :  { %3552 = vmatprep.subr.mxu0 %v3485_v37  ;;  %v3523_v49 = vld [vmem:[#allocation3 + $0x1c8] sm:$0xff]  ;;  %v3522_v63 = vld [vmem:[#allocation3 + $0x1c0] sm:$0xff]  ;;  %v3521_v46 = vld [vmem:[#allocation3 + $0x1b8] sm:$0xff] }
 0x32b   :  { %3553 = vmatpush1.msra.mxu0 %v3484_v43  ;;  %v3520_v59 = vld [vmem:[#allocation3 + $0x1b0] sm:$0xff]  ;;  %v3519_v15 = vld [vmem:[#allocation3 + $0x1a8] sm:$0xff]  ;;  %v3518_v35 = vld [vmem:[#allocation3 + $0x1a0] sm:$0xff] }
 0x32c   :  { %3554 = vmatprep.subr.mxu0 %v3483_v17  ;;  %v3517_v18 = vld [vmem:[#allocation3 + $0x198] sm:$0xff]  ;;  %v3516_v29 = vld [vmem:[#allocation3 + $0x190] sm:$0xff]  ;;  %v3515_v4 = vld [vmem:[#allocation3 + $0x188] sm:$0xff] }
 0x32d   :  { %3555 = vmatpush1.msra.mxu0 %v3482_v9  ;;  %v3514_v12 = vld [vmem:[#allocation3 + $0x180] sm:$0xff]  ;;  %v3513_v31 = vld [vmem:[#allocation3 + $0x178] sm:$0xff]  ;;  %v3512_v42 = vld [vmem:[#allocation3 + $0x170] sm:$0xff] }
 0x32e   :  { %3556 = vmatprep.subr.mxu0 %v3481_v54  ;;  %v3511_v11 = vld [vmem:[#allocation3 + $0x168] sm:$0xff]  ;;  %v3510_v2 = vld [vmem:[#allocation3 + $0x160] sm:$0xff]  ;;  %v3509_v58 = vld [vmem:[#allocation3 + $0x158] sm:$0xff] }
 0x32f   :  { %3557 = vmatpush1.msra.mxu0 %v3480_v8  ;;  %v3508_v62 = vld [vmem:[#allocation3 + $0x150] sm:$0xff]  ;;  %v3507_v20 = vld [vmem:[#allocation3 + $0x148] sm:$0xff]  ;;  %v3506_v60 = vld [vmem:[#allocation3 + $0x140] sm:$0xff] }
 0x330   :  { %3558 = vmatprep.subr.mxu0 %v3479_v57  ;;  %v3505_v13 = vld [vmem:[#allocation3 + $0x138] sm:$0xff]  ;;  %v3504_v47 = vld [vmem:[#allocation3 + $0x130] sm:$0xff]  ;;  %v3503_v3 = vld [vmem:[#allocation3 + $0x128] sm:$0xff] }
 0x331   :  { %3559 = vmatpush1.msra.mxu0 %v3478_v7  ;;  %v3502_v55 = vld [vmem:[#allocation3 + $0x120] sm:$0xff]  ;;  %v3501_v39 = vld [vmem:[#allocation3 + $0x118] sm:$0xff]  ;;  %v3500_v45 = vld [vmem:[#allocation3 + $0x110] sm:$0xff] }
 0x332   :  { %3560 = vmatprep.subr.mxu0 %v3477_v16  ;;  %v3499_v24 = vld [vmem:[#allocation3 + $0x108] sm:$0xff]  ;;  %v3498_v23 = vld [vmem:[#allocation3 + $0x100] sm:$0xff] }
 0x333   :  { %3561 = vmatpush1.msra.mxu0 %v3476_v61  ;;  %v3530_v41 = vld [vmem:[#allocation3 + $0x200] sm:$0xff]  ;;  %v3531_v26 = vld [vmem:[#allocation3 + $0x208] sm:$0xff] }
 0x334   :  { %3562 = vmatprep.subr.mxu0 %v3475_v5  ;;  %v3535_v56 = vrot.slane %v3530_v41, %v4794_v1  ;;  %v3539_v53 = vrot.slane %v3531_v26, %v4794_v1  ;;  %v3616_v17 = vrot.slane %v3530_v41, %v4801_v19  ;;  %v3620_v9 = vrot.slane %v3531_v26, %v4801_v19 }
 0x335   :  { %3563 = vmatpush1.msra.mxu0 %v3474_v10 }
 0x336   :  { %3564 = vmatprep.subr.mxu0 %v3473_v40 }
 0x337   :  { %3565 = vmatpush1.msra.mxu0 %v3472_v36 }
 0x338   :  { %3566 = vmatprep.subr.mxu0 %v3471_v25 }
 0x339   :  { %3567 = vmatpush1.msra.mxu0 %v3470_v30 }
 0x33a   :  { %3568 = vmatprep.subr.mxu0 %v3469_v52 }
 0x33b   :  { %3569 = vmatpush1.msra.mxu0 %v3468_v48 }
 0x33c   :  { %3570 = vmatprep.subr.mxu0 %v3467_v21 }
 0x33d   :  { %3571 = vmatpush1.msra.mxu0 %v3466_v0 }
 0x33e   :  { %3572 = vmatprep.subr.mxu0 %v3529_v6 }
 0x33f   :  { %3573 = vmatpush2.msra.mxu0 %v3528_v32 }
 0x340   :  { %3574 = vmatprep.subr.mxu0 %v3527_v33 }
 0x341   :  { %3575 = vmatpush2.msra.mxu0 %v3526_v38 }
 0x342   :  { %3576 = vmatprep.subr.mxu0 %v3525_v51 }
 0x343   :  { %3577 = vmatpush2.msra.mxu0 %v3524_v22 }
 0x344   :  { %3578 = vmatprep.subr.mxu0 %v3523_v49 }
 0x345   :  { %3579 = vmatpush2.msra.mxu0 %v3522_v63 }
 0x346   :  { %3580 = vmatprep.subr.mxu0 %v3521_v46 }
 0x347   :  { %3581 = vmatpush2.msra.mxu0 %v3520_v59 }
 0x348   :  { %3582 = vmatprep.subr.mxu0 %v3519_v15 }
 0x349   :  { %3583 = vmatpush2.msra.mxu0 %v3518_v35 }
 0x34a   :  { %3584 = vmatprep.subr.mxu0 %v3517_v18 }
 0x34b   :  { %3585 = vmatpush2.msra.mxu0 %v3516_v29 }
 0x34c   :  { %3586 = vmatprep.subr.mxu0 %v3515_v4 }
 0x34d   :  { %3587 = vmatpush2.msra.mxu0 %v3514_v12 }
 0x34e   :  { %3588 = vmatprep.subr.mxu0 %v3513_v31 }
 0x34f   :  { %3589 = vmatpush2.msra.mxu0 %v3512_v42 }
 0x350   :  { %3590 = vmatprep.subr.mxu0 %v3511_v11 }
 0x351   :  { %3591 = vmatpush2.msra.mxu0 %v3510_v2 }
 0x352   :  { %3592 = vmatprep.subr.mxu0 %v3509_v58 }
 0x353   :  { %3593 = vmatpush2.msra.mxu0 %v3508_v62 }
 0x354   :  { %3594 = vmatprep.subr.mxu0 %v3507_v20 }
 0x355   :  { %3595 = vmatpush2.msra.mxu0 %v3506_v60 }
 0x356   :  { %3596 = vmatprep.subr.mxu0 %v3505_v13 }
 0x357   :  { %3597 = vmatpush2.msra.mxu0 %v3504_v47 }
 0x358   :  { %3598 = vmatprep.subr.mxu0 %v3503_v3 }
 0x359   :  { %3599 = vmatpush2.msra.mxu0 %v3502_v55 }
 0x35a   :  { %3600 = vmatprep.subr.mxu0 %v3501_v39 }
 0x35b   :  { %3601 = vmatpush2.msra.mxu0 %v3500_v45 }
 0x35c   :  { %3602 = vmatprep.subr.mxu0 %v3499_v24 }
 0x35d   :  { %3603 = vmatpush2.msra.mxu0 %v3498_v23 }
 0x35e   :  { %3605 = vmatmul.mubr.f32.vlgmr.msra.gmra.mxu0 %v3460_v44  ;;  %v3628_v44 = vsub.s32 2, %v4791_v28 }
 0x360   :  { %v3629_v7 = vrot.slane %v3530_v41, %v3628_v44 }
 0x41e   :  { %v3606_v14 = vpop.f32.mrf.mxu0 }
 0x41f   :  { %v3607_v27 = vadd.f32 %v3606_v14, %v3535_v56 }
 0x420   :  { %v3608_v50 = vpop.f32.mrf.mxu0 }
 0x421   :  { %v3611_v37 = vmax.f32 %v3607_v27, 0.0  ;;  %v3609_v43 = vadd.f32 %v3608_v50, %v3539_v53 }
 0x423   :  { %v3612_v54 = vmax.f32 %v3609_v43, 0.0  ;;  %v3621_v8 = vmul.f32 %v3616_v17, %v3611_v37 }
 0x425   :  { %v3622_v57 = vmul.f32 %v3620_v9, %v3612_v54 }
 0x427   :  { %v3623_v34 = vadd.f32 %v3622_v57, %v3621_v8 }
 0x429   :  { %3624 = vadd.xlane.f32.xlu0 %v3623_v34 }
 0x4b2   :  { %v3625_v16 = vpop.xlane.xlu0 %3624 }
 0x4b3   :  { %v3630_v61 = vadd.f32 %v3629_v7, %v3625_v16 }
 0x4b5   :  { %3631 = vst [vmem:[%s5090_s6] sm:$0xff] %v3630_v61 }
 0x4b6   :  { %3636 = vsyncpa [#allocation6], 1 }
 0x4b7   :  { %3637 = vsyncpa [#allocation8], 1 }
 0x4b8   :  { %3638 = vsyncmov [#allocation4] }
 0x4bb   :  { %s3639_s14 = vpop.sfrf %3638 }
 0x4bc   :  { %p3951_p6 = scmp.ne.s32.totalorder %s3639_s14, 0 }
 0x4be   :  { %3643 = shalt.err (%p3951_p6)  }
 0x4bf   :  { %3645 = vsyncmov [#allocation4 + $0x1] }
 0x4c2   :  { %s3646_s15 = vpop.sfrf %3645 }
 0x4c3   :  { %p3952_p7 = scmp.ne.s32.totalorder %s3646_s15, 0 }
 0x4c5   :  { %3650 = shalt.err (%p3952_p7)  }

</bundles_post_ra>
